<compile_context>
chip_gen: v7x
topology: tpu7x:2x2x1
jax: 0.10.0
libtpu: 0.0.40
codegen_flags: <defaults>
</compile_context>

<pallas_src>
import jax
import jax.numpy as jnp
from jax.experimental import pallas as pl
from jax.experimental.pallas import tpu as pltpu


def _mul_conv1x1_kernel(x_ref, s_ref, w_ref, o_ref):
    # x_ref: [Cin, M] f32, s_ref: [Cin, 1] f32, w_ref: [Cout, Cin] bf16, o_ref: [Cout, M] f32
    gated = (x_ref[...] * s_ref[...]).astype(jnp.bfloat16)   # f32 VPU mul, cast after
    o_ref[...] = jnp.dot(w_ref[...], gated,
                         preferred_element_type=jnp.float32)  # bf16 MXU, f32 accumulate


def prepare_conv_weight(weight_oi11):
    """One-time (init-time) prep of Conv2d weight [Cout, Cin, 1, 1] -> bf16 [Cout, Cin].

    Do this once and keep the result as the stored parameter; converting per
    call would round-trip both f32 and bf16 copies through HBM and lose the win.
    """
    Cout, Cin = weight_oi11.shape[0], weight_oi11.shape[1]
    return weight_oi11.reshape(Cout, Cin).astype(jnp.bfloat16)


def mul_conv1x1(x_nchw, scale_nc11, weight_bf16_oc):
    """x_nchw: [1, Cin, H, W] f32, scale_nc11: [1, Cin, 1, 1] f32,
    weight_bf16_oc: [Cout, Cin] bf16 (from prepare_conv_weight)."""
    N, Cin, H, W = x_nchw.shape
    Cout = weight_bf16_oc.shape[0]
    assert N == 1, "kernel assumes batch 1 (matches the module's forward)"
    M = H * W

    # Free views only -- no XLA transpose / pad / slice ops on the critical path.
    x_cm = x_nchw.reshape(Cin, M)       # [Cin, M]   (NCHW row-major view)
    s_c1 = scale_nc11.reshape(Cin, 1)   # [Cin, 1]

    # Honest byte count: x/s/out in f32 (4B), weight in bf16 (2B).
    bytes_accessed = 4 * (Cin * M + Cin + Cout * M) + 2 * (Cout * Cin)
    flops = 2 * Cout * Cin * M + Cin * M   # matmul + gate multiply

    out_cm = pl.pallas_call(
        _mul_conv1x1_kernel,
        out_shape=jax.ShapeDtypeStruct((Cout, M), jnp.float32),
        in_specs=[
            pl.BlockSpec((Cin, M), lambda: (0, 0)),      # block == full array
            pl.BlockSpec((Cin, 1), lambda: (0, 0)),
            pl.BlockSpec((Cout, Cin), lambda: (0, 0)),
        ],
        out_specs=pl.BlockSpec((Cout, M), lambda: (0, 0)),
        compiler_params=pltpu.CompilerParams(vmem_limit_bytes=8 << 20),
        cost_estimate=pl.CostEstimate(
            flops=flops, transcendentals=0, bytes_accessed=bytes_accessed),
    )(x_cm, s_c1, weight_bf16_oc)

    return out_cm.reshape(N, Cout, H, W)   # free view back to NCHW


if __name__ == "__main__":
    key = jax.random.PRNGKey(0)
    k1, k2, k3 = jax.random.split(key, 3)

    # Shapes implied by the module's forward.
    N, Cin, H, W, Cout = 1, 1392, 7, 7, 232
    x299 = jax.random.normal(k1, (N, Cin, H, W), dtype=jnp.float32)
    x304 = jax.random.normal(k2, (N, Cin, 1, 1), dtype=jnp.float32)
    # Deterministic conv weight (Conv2d(1392, 232, 1, bias=False)).
    weight = jax.random.normal(k3, (Cout, Cin, 1, 1), dtype=jnp.float32) * 0.02

    # One-time parameter prep (materialize the bf16 weight, as a module would at init).
    w_bf16 = jax.block_until_ready(prepare_conv_weight(weight))

    out = mul_conv1x1(x299, x304, w_bf16)
    out = jax.block_until_ready(out)

    # Reference in plain JAX (same semantics as the PyTorch forward, f32).
    ref = jnp.einsum("nchw,oc->nohw", x299 * x304, weight.reshape(Cout, Cin))
    assert out.shape == (N, Cout, H, W)
    # bf16 matmul operands (f32 accumulation) => bf16-level tolerance vs f32 ref.
    assert jnp.allclose(out, ref, atol=2e-2, rtol=2e-2)

    print("KERNEL_OK")
</pallas_src>

<mosaic_0001>
module attributes {stable_mosaic.version = 11 : i64} {
  func.func @_mul_conv1x1_kernel(%arg0: memref<1392x49xf32, #tpu.memory_space<vmem>>, %arg1: memref<1392x1xf32, #tpu.memory_space<vmem>>, %arg2: memref<232x1392xbf16, #tpu.memory_space<vmem>>, %arg3: memref<232x49xf32, #tpu.memory_space<vmem>>) attributes {dimension_semantics = [], scalar_prefetch = 0 : i64, scratch_operands = 0 : i64, tpu.core_type = #tpu.core_type<tc>} {
    %c0 = arith.constant 0 : index
    %c0_0 = arith.constant 0 : index
    %0 = vector.load %arg0[%c0, %c0_0] : memref<1392x49xf32, #tpu.memory_space<vmem>>, vector<1392x49xf32>
    %c0_1 = arith.constant 0 : index
    %c0_2 = arith.constant 0 : index
    %1 = vector.load %arg1[%c0_1, %c0_2] : memref<1392x1xf32, #tpu.memory_space<vmem>>, vector<1392x1xf32>
    %2 = vector.broadcast %1 : vector<1392x1xf32> to vector<1392x49xf32>
    %3 = arith.mulf %0, %2 : vector<1392x49xf32>
    %4 = arith.truncf %3 : vector<1392x49xf32> to vector<1392x49xbf16>
    %c0_3 = arith.constant 0 : index
    %c0_4 = arith.constant 0 : index
    %5 = vector.load %arg2[%c0_3, %c0_4] : memref<232x1392xbf16, #tpu.memory_space<vmem>>, vector<232x1392xbf16>
    %cst = arith.constant dense<0.000000e+00> : vector<232x49xf32>
    %6 = tpu.matmul %5, %4, %cst {dimension_numbers = #tpu.dot_dimension_numbers<[1], [0], [0], [1], [0, 0, 1, 1], [], []>} : vector<232x1392xbf16>, vector<1392x49xbf16>, vector<232x49xf32> -> vector<232x49xf32>
    %c0_5 = arith.constant 0 : index
    %c0_6 = arith.constant 0 : index
    %7 = vector.load %arg3[%c0_5, %c0_6] : memref<232x49xf32, #tpu.memory_space<vmem>>, vector<232x49xf32>
    tpu.vector_store %arg3[%c0_5, %c0_6], %6 {strides = array<i32>} : memref<232x49xf32, #tpu.memory_space<vmem>>, vector<232x49xf32>,
    return
  }
}

</mosaic_0001>

<bundles_post_ra>
// kernel: tpu_custom_call.1
= control target key start
LH: loop header
LB: loop body
LE: loop exit
PB: predicated region body
PF: predicated region fallthrough
CT: control target
= control target key end

     0   :  { %v4514_v0 = vmov 0   ;;  %vm4516_vm0 = vmmov 0   ;;  %vm2476_vm1 = vcmask 916480   ;;  %vm3434_vm2 = vcmask 400384   ;;  %s6418_s1 = inlined_call_operand.vmem [shape: f32[1392,1], index: 1, kind: input, shape index: {}]   ;;  %s6419_s2 = inlined_call_operand.vmem [shape: bf16[232,1392], index: 2, kind: input, shape index: {}]   ;;  %s6420_s0 = inlined_call_operand.vmem [shape: f32[1392,49], index: 0, kind: input, shape index: {}]   ;;  %s6421_s3 = inlined_call_operand.vmem [shape: f32[232,49], index: 3, kind: output, shape index: {}]  }
   0x1   :  { %4278 = vset.pattern.permute.xlu1 %v4514_v0  ;;  %4277 = vset.pattern.permute.xlu0 %v4514_v0  ;;  %v191_v1 = vld [vmem:[%s6418_s1 + $0x10] sm:$0xff]  ;;  %v189_v2 = vld [vmem:[%s6418_s1] sm:$0xff]  ;;  %v192_v3 = vld [vmem:[%s6418_s1 + $0x18] sm:$0xff] }
   0x2   :  { %375 = vperm.xlu1 %4278, %v191_v1   ;;  %365 = vperm.xlu0 %4277, %v189_v2   ;;  %v190_v4 = vld [vmem:[%s6418_s1 + $0x8] sm:$0xff]  ;;  %v193_v6 = vld [vmem:[%s6418_s1 + $0x20] sm:$0xff]  ;;  %v208_v9 = vld [vmem:[%s6418_s1 + $0x98] sm:$0xff] }
   0x3   :  { %v194_v5 = vld [vmem:[%s6418_s1 + $0x28] sm:$0xff]  ;;  %v205_v8 = vld [vmem:[%s6418_s1 + $0x80] sm:$0xff]  ;;  %v207_v10 = vld [vmem:[%s6418_s1 + $0x90] sm:$0xff] }
   0x4   :  { %v206_v7 = vld [vmem:[%s6418_s1 + $0x88] sm:$0xff]  ;;  %v237_v12 = vld [vmem:[%s6418_s1 + $0x180] sm:$0xff]  ;;  %v240_v17 = vld [vmem:[%s6418_s1 + $0x198] sm:$0xff] }
   0x5   :  { %v238_v11 = vld [vmem:[%s6418_s1 + $0x188] sm:$0xff]  ;;  %v221_v14 = vld [vmem:[%s6418_s1 + $0x100] sm:$0xff]  ;;  %v239_v18 = vld [vmem:[%s6418_s1 + $0x190] sm:$0xff] }
   0x6   :  { %380 = vperm.xlu1 %4278, %v192_v3   ;;  %370 = vperm.xlu0 %4277, %v190_v4   ;;  %v222_v13 = vld [vmem:[%s6418_s1 + $0x108] sm:$0xff]  ;;  %v209_v16 = vld [vmem:[%s6418_s1 + $0xa0] sm:$0xff]  ;;  %v224_v19 = vld [vmem:[%s6418_s1 + $0x118] sm:$0xff] }
   0x7   :  { %v210_v15 = vld [vmem:[%s6418_s1 + $0xa8] sm:$0xff]  ;;  %v223_v20 = vld [vmem:[%s6418_s1 + $0x110] sm:$0xff]  ;;  %v212_v21 = vld [vmem:[%s6418_s1 + $0xb8] sm:$0xff] }
   0x8   :  { %v211_v22 = vld [vmem:[%s6418_s1 + $0xb0] sm:$0xff]  ;;  %v196_v23 = vld [vmem:[%s6418_s1 + $0x38] sm:$0xff]  ;;  %v242_v25 = vld [vmem:[%s6418_s1 + $0x1a8] sm:$0xff] }
   0x9   :  { %v195_v24 = vld [vmem:[%s6418_s1 + $0x30] sm:$0xff]  ;;  %v241_v26 = vld [vmem:[%s6418_s1 + $0x1a0] sm:$0xff]  ;;  %v226_v27 = vld [vmem:[%s6418_s1 + $0x128] sm:$0xff] }
   0xa   :  { %390 = vperm.xlu1 %4278, %v194_v5   ;;  %385 = vperm.xlu0 %4277, %v193_v6   ;;  %v225_v28 = vld [vmem:[%s6418_s1 + $0x120] sm:$0xff]  ;;  %v214_v29 = vld [vmem:[%s6418_s1 + $0xc8] sm:$0xff]  ;;  %v244_v33 = vld [vmem:[%s6418_s1 + $0x1b8] sm:$0xff] }
   0xb   :  { %v213_v30 = vld [vmem:[%s6418_s1 + $0xc0] sm:$0xff]  ;;  %v198_v31 = vld [vmem:[%s6418_s1 + $0x48] sm:$0xff]  ;;  %v243_v34 = vld [vmem:[%s6418_s1 + $0x1b0] sm:$0xff] }
   0xc   :  { %v197_v32 = vld [vmem:[%s6418_s1 + $0x40] sm:$0xff]  ;;  %v228_v35 = vld [vmem:[%s6418_s1 + $0x138] sm:$0xff]  ;;  %v227_v36 = vld [vmem:[%s6418_s1 + $0x130] sm:$0xff] }
   0xd   :  { %v216_v37 = vld [vmem:[%s6418_s1 + $0xd8] sm:$0xff]  ;;  %v215_v38 = vld [vmem:[%s6418_s1 + $0xd0] sm:$0xff]  ;;  %v246_v41 = vld [vmem:[%s6418_s1 + $0x1c8] sm:$0xff] }
   0xe   :  { %450 = vperm.xlu1 %4278, %v206_v7   ;;  %445 = vperm.xlu0 %4277, %v205_v8   ;;  %v200_v39 = vld [vmem:[%s6418_s1 + $0x58] sm:$0xff]  ;;  %v199_v40 = vld [vmem:[%s6418_s1 + $0x50] sm:$0xff]  ;;  %v245_v42 = vld [vmem:[%s6418_s1 + $0x1c0] sm:$0xff] }
   0xf   :  { %v230_v43 = vld [vmem:[%s6418_s1 + $0x148] sm:$0xff]  ;;  %v229_v44 = vld [vmem:[%s6418_s1 + $0x140] sm:$0xff]  ;;  %v248_v49 = vld [vmem:[%s6418_s1 + $0x1d8] sm:$0xff] }
  0x10   :  { %v218_v45 = vld [vmem:[%s6418_s1 + $0xe8] sm:$0xff]  ;;  %v217_v46 = vld [vmem:[%s6418_s1 + $0xe0] sm:$0xff]  ;;  %v247_v50 = vld [vmem:[%s6418_s1 + $0x1d0] sm:$0xff] }
  0x11   :  { %v202_v47 = vld [vmem:[%s6418_s1 + $0x68] sm:$0xff]  ;;  %v201_v48 = vld [vmem:[%s6418_s1 + $0x60] sm:$0xff]  ;;  %v232_v51 = vld [vmem:[%s6418_s1 + $0x158] sm:$0xff] }
  0x12   :  { %460 = vperm.xlu1 %4278, %v208_v9   ;;  %455 = vperm.xlu0 %4277, %v207_v10   ;;  %v231_v52 = vld [vmem:[%s6418_s1 + $0x150] sm:$0xff]  ;;  %v220_v53 = vld [vmem:[%s6418_s1 + $0xf8] sm:$0xff]  ;;  %v250_v57 = vld [vmem:[%s6418_s1 + $0x1e8] sm:$0xff] }
  0x13   :  { %v219_v54 = vld [vmem:[%s6418_s1 + $0xf0] sm:$0xff]  ;;  %v204_v55 = vld [vmem:[%s6418_s1 + $0x78] sm:$0xff]  ;;  %v249_v58 = vld [vmem:[%s6418_s1 + $0x1e0] sm:$0xff] }
  0x14   :  { %v203_v56 = vld [vmem:[%s6418_s1 + $0x70] sm:$0xff]  ;;  %v234_v59 = vld [vmem:[%s6418_s1 + $0x168] sm:$0xff]  ;;  %v233_v60 = vld [vmem:[%s6418_s1 + $0x160] sm:$0xff] }
  0x15   :  { %v252_v61 = vld [vmem:[%s6418_s1 + $0x1f8] sm:$0xff]  ;;  %v251_v62 = vld [vmem:[%s6418_s1 + $0x1f0] sm:$0xff]  ;;  %v270_v2 = vld [vmem:[%s6418_s1 + $0x288] sm:$0xff] }
  0x16   :  { %610 = vperm.xlu1 %4278, %v238_v11   ;;  %605 = vperm.xlu0 %4277, %v237_v12   ;;  %v236_v63 = vld [vmem:[%s6418_s1 + $0x178] sm:$0xff]  ;;  %v235_v0 = vld [vmem:[%s6418_s1 + $0x170] sm:$0xff]  ;;  %v269_v3 = vld [vmem:[%s6418_s1 + $0x280] sm:$0xff] }
  0x17   :  { %v4281_v1 = vld [vmem:[%s6419_s2 + $0x4] ss:$44 sps:$4 sm:$0xff]   ;;  %v254_v6 = vld [vmem:[%s6418_s1 + $0x208] sm:$0xff]  ;;  %v272_v11 = vld [vmem:[%s6418_s1 + $0x298] sm:$0xff] }
  0x18   :  { %2554 = vmatprep.mubr.bf16.mxu0 %v4281_v1  ;;  %v253_v7 = vld [vmem:[%s6418_s1 + $0x200] sm:$0xff]  ;;  %v4289_v8 = vld [vmem:[%s6419_s2 + $0xc] ss:$44 sps:$4 sm:$0xff]   ;;  %v271_v12 = vld [vmem:[%s6418_s1 + $0x290] sm:$0xff] }
  0x19   :  { %2706 = vmatprep.mubr.bf16.mxu1 %v4289_v8  ;;  %v257_v1 = vld [vmem:[%s6418_s1 + $0x220] sm:$0xff] }
  0x1a   :  { %530 = vperm.xlu1 %4278, %v222_v13   ;;  %525 = vperm.xlu0 %4277, %v221_v14   ;;  %v16_v13 = vld [vmem:[%s6420_s0 + $0x8] sm:$0xff] }
  0x1e   :  { %470 = vperm.xlu1 %4278, %v210_v15   ;;  %465 = vperm.xlu0 %4277, %v209_v16   ;;  %v32_v16 = vld [vmem:[%s6420_s0 + $0x88] sm:$0xff] }
  0x22   :  { %620 = vperm.xlu1 %4278, %v240_v17   ;;  %615 = vperm.xlu0 %4277, %v239_v18   ;;  %v31_v17 = vld [vmem:[%s6420_s0 + $0x80] sm:$0xff]  ;;  %v256_v18 = vld [vmem:[%s6418_s1 + $0x218] sm:$0xff] }
  0x26   :  { %540 = vperm.xlu1 %4278, %v224_v19   ;;  %535 = vperm.xlu0 %4277, %v223_v20   ;;  %v15_v19 = vld [vmem:[%s6420_s0] sm:$0xff]  ;;  %v255_v20 = vld [vmem:[%s6418_s1 + $0x210] sm:$0xff] }
  0x2a   :  { %480 = vperm.xlu1 %4278, %v212_v21   ;;  %475 = vperm.xlu0 %4277, %v211_v22   ;;  %v18_v21 = vld [vmem:[%s6420_s0 + $0x18] sm:$0xff] }
  0x2e   :  { %400 = vperm.xlu1 %4278, %v196_v23   ;;  %395 = vperm.xlu0 %4277, %v195_v24   ;;  %v34_v24 = vld [vmem:[%s6420_s0 + $0x98] sm:$0xff] }
  0x32   :  { %630 = vperm.xlu1 %4278, %v242_v25   ;;  %625 = vperm.xlu0 %4277, %v241_v26   ;;  %v33_v25 = vld [vmem:[%s6420_s0 + $0x90] sm:$0xff] }
  0x36   :  { %550 = vperm.xlu1 %4278, %v226_v27   ;;  %545 = vperm.xlu0 %4277, %v225_v28  }
  0x3a   :  { %490 = vperm.xlu1 %4278, %v214_v29   ;;  %485 = vperm.xlu0 %4277, %v213_v30   ;;  %v302_v29 = vld [vmem:[%s6418_s1 + $0x388] sm:$0xff]  ;;  %v301_v30 = vld [vmem:[%s6418_s1 + $0x380] sm:$0xff] }
  0x3e   :  { %410 = vperm.xlu1 %4278, %v198_v31   ;;  %405 = vperm.xlu0 %4277, %v197_v32   ;;  %v17_v31 = vld [vmem:[%s6420_s0 + $0x10] sm:$0xff] }
  0x42   :  { %640 = vperm.xlu1 %4278, %v244_v33   ;;  %635 = vperm.xlu0 %4277, %v243_v34  }
  0x46   :  { %560 = vperm.xlu1 %4278, %v228_v35   ;;  %555 = vperm.xlu0 %4277, %v227_v36  }
  0x4a   :  { %500 = vperm.xlu1 %4278, %v216_v37   ;;  %495 = vperm.xlu0 %4277, %v215_v38   ;;  %v64_v37 = vld [vmem:[%s6420_s0 + $0x188] sm:$0xff]  ;;  %v63_v38 = vld [vmem:[%s6420_s0 + $0x180] sm:$0xff] }
  0x4e   :  { %420 = vperm.xlu1 %4278, %v200_v39   ;;  %415 = vperm.xlu0 %4277, %v199_v40   ;;  %v286_v39 = vld [vmem:[%s6418_s1 + $0x308] sm:$0xff] }
  0x52   :  { %650 = vperm.xlu1 %4278, %v246_v41   ;;  %645 = vperm.xlu0 %4277, %v245_v42  }
  0x56   :  { %570 = vperm.xlu1 %4278, %v230_v43   ;;  %565 = vperm.xlu0 %4277, %v229_v44   ;;  %v285_v43 = vld [vmem:[%s6418_s1 + $0x300] sm:$0xff] }
  0x5a   :  { %510 = vperm.xlu1 %4278, %v218_v45   ;;  %505 = vperm.xlu0 %4277, %v217_v46  }
  0x5e   :  { %430 = vperm.xlu1 %4278, %v202_v47   ;;  %425 = vperm.xlu0 %4277, %v201_v48   ;;  %v48_v48 = vld [vmem:[%s6420_s0 + $0x108] sm:$0xff] }
  0x62   :  { %660 = vperm.xlu1 %4278, %v248_v49   ;;  %655 = vperm.xlu0 %4277, %v247_v50  }
  0x66   :  { %580 = vperm.xlu1 %4278, %v232_v51   ;;  %575 = vperm.xlu0 %4277, %v231_v52   ;;  %v47_v52 = vld [vmem:[%s6420_s0 + $0x100] sm:$0xff] }
  0x6a   :  { %520 = vperm.xlu1 %4278, %v220_v53   ;;  %515 = vperm.xlu0 %4277, %v219_v54   ;;  %v274_v53 = vld [vmem:[%s6418_s1 + $0x2a8] sm:$0xff]  ;;  %v273_v54 = vld [vmem:[%s6418_s1 + $0x2a0] sm:$0xff] }
  0x6e   :  { %440 = vperm.xlu1 %4278, %v204_v55   ;;  %435 = vperm.xlu0 %4277, %v203_v56   ;;  %v20_v55 = vld [vmem:[%s6420_s0 + $0x28] sm:$0xff] }
  0x72   :  { %670 = vperm.xlu1 %4278, %v250_v57   ;;  %665 = vperm.xlu0 %4277, %v249_v58   ;;  %v19_v57 = vld [vmem:[%s6420_s0 + $0x20] sm:$0xff] }
  0x76   :  { %590 = vperm.xlu1 %4278, %v234_v59   ;;  %585 = vperm.xlu0 %4277, %v233_v60   ;;  %v36_v60 = vld [vmem:[%s6420_s0 + $0xa8] sm:$0xff] }
  0x7a   :  { %680 = vperm.xlu1 %4278, %v252_v61   ;;  %675 = vperm.xlu0 %4277, %v251_v62   ;;  %v35_v61 = vld [vmem:[%s6420_s0 + $0xa0] sm:$0xff]  ;;  %v258_v62 = vld [vmem:[%s6418_s1 + $0x228] sm:$0xff] }
  0x7e   :  { %600 = vperm.xlu1 %4278, %v236_v63   ;;  %595 = vperm.xlu0 %4277, %v235_v0  }
  0x81   :  { %v376_v4 = vpop.permute.xlu1 %375  ;;  %v366_v5 = vpop.permute.xlu0 %365 }
  0x82   :  { %770 = vperm.xlu1 %4278, %v270_v2   ;;  %765 = vperm.xlu0 %4277, %v269_v3   ;;  %v1233_v32 = vmul.f32 %v366_v5, %v15_v19  ;;  %v1235_v44 = vmul.f32 %v376_v4, %v17_v31  ;;  %v275_v31 = vld [vmem:[%s6418_s1 + $0x2b0] sm:$0xff] }
  0x85   :  { %v381_v9 = vpop.permute.xlu1 %380  ;;  %v371_v10 = vpop.permute.xlu0 %370 }
  0x86   :  { %690 = vperm.xlu1 %4278, %v254_v6   ;;  %685 = vperm.xlu0 %4277, %v253_v7   ;;  %v1234_v26 = vmul.f32 %v371_v10, %v16_v13  ;;  %v1236_v34 = vmul.f32 %v381_v9, %v18_v21  ;;  %v66_v6 = vld [vmem:[%s6420_s0 + $0x198] sm:$0xff]  ;;  %v65_v10 = vld [vmem:[%s6420_s0 + $0x190] sm:$0xff] }
  0x88   :  { %v1407_v42 = vpack.c.bf16 %v1234_v26, %v1233_v32  ;;  %v1408_v49 = vpack.c.bf16 %v1236_v34, %v1235_v44  ;;  %v38_v26 = vld [vmem:[%s6420_s0 + $0xb8] sm:$0xff]  ;;  %v68_v44 = vld [vmem:[%s6420_s0 + $0x1a8] sm:$0xff] }
  0x89   :  { %v4756_v14 = vpop.permute.xlu1 %390  ;;  %v4758_v15 = vpop.permute.xlu0 %385 }
  0x8a   :  { %780 = vperm.xlu1 %4278, %v272_v11   ;;  %775 = vperm.xlu0 %4277, %v271_v12   ;;  %v1238_v3 = vmul.f32 %v4756_v14, %v20_v55  ;;  %v1237_v7 = vmul.f32 %v4758_v15, %v19_v57  ;;  %v304_v11 = vld [vmem:[%s6418_s1 + $0x398] sm:$0xff]  ;;  %v303_v12 = vld [vmem:[%s6418_s1 + $0x390] sm:$0xff]  ;;  %v290_v55 = vld [vmem:[%s6418_s1 + $0x328] sm:$0xff] }
  0x8c   :  { %v1409_v19 = vpack.c.bf16 %v1238_v3, %v1237_v7  ;;  %v277_v3 = vld [vmem:[%s6418_s1 + $0x2c0] sm:$0xff]  ;;  %v24_v7 = vld [vmem:[%s6420_s0 + $0x48] sm:$0xff] }
  0x8d   :  { %v451_v22 = vpop.permute.xlu1 %450  ;;  %v446_v23 = vpop.permute.xlu0 %445 }
  0x8e   :  { %v1250_v27 = vmul.f32 %v451_v22, %v32_v16  ;;  %v1249_v28 = vmul.f32 %v446_v23, %v31_v17  ;;  %700 = vperm.xlu1 %4278, %v256_v18   ;;  %695 = vperm.xlu0 %4277, %v255_v20   ;;  %v50_v16 = vld [vmem:[%s6420_s0 + $0x118] sm:$0xff]  ;;  %v49_v17 = vld [vmem:[%s6420_s0 + $0x110] sm:$0xff] }
  0x8f   :  { %v288_v18 = vld [vmem:[%s6418_s1 + $0x318] sm:$0xff]  ;;  %v287_v22 = vld [vmem:[%s6418_s1 + $0x310] sm:$0xff] }
  0x90   :  { %v1415_v33 = vpack.c.bf16 %v1250_v27, %v1249_v28 }
  0x91   :  { %v461_v35 = vpop.permute.xlu1 %460  ;;  %v456_v36 = vpop.permute.xlu0 %455 }
  0x92   :  { %v1252_v40 = vmul.f32 %v461_v35, %v34_v24  ;;  %v1251_v41 = vmul.f32 %v456_v36, %v33_v25  ;;  %930 = vperm.xlu1 %4278, %v302_v29   ;;  %925 = vperm.xlu0 %4277, %v301_v30   ;;  %v37_v29 = vld [vmem:[%s6420_s0 + $0xb0] sm:$0xff]  ;;  %v276_v30 = vld [vmem:[%s6418_s1 + $0x2b8] sm:$0xff] }
  0x93   :  { %3648 = vmatprep.subr.bf16.mxu0 %v1415_v33  ;;  %v22_v35 = vld [vmem:[%s6420_s0 + $0x38] sm:$0xff]  ;;  %v21_v36 = vld [vmem:[%s6420_s0 + $0x30] sm:$0xff] }
  0x94   :  { %v1416_v45 = vpack.c.bf16 %v1252_v40, %v1251_v41  ;;  %3649 = vmatpush3.bf16.msra.mxu0 %v1407_v42  ;;  %v259_v40 = vld [vmem:[%s6418_s1 + $0x230] sm:$0xff] }
  0x95   :  { %v611_v46 = vpop.permute.xlu1 %610  ;;  %v606_v47 = vpop.permute.xlu0 %605 }
  0x96   :  { %v1282_v50 = vmul.f32 %v611_v46, %v64_v37  ;;  %v1281_v51 = vmul.f32 %v606_v47, %v63_v38  ;;  %850 = vperm.xlu1 %4278, %v286_v39   ;;  %845 = vperm.xlu0 %4277, %v285_v43   ;;  %v260_v37 = vld [vmem:[%s6418_s1 + $0x238] sm:$0xff]  ;;  %v67_v47 = vld [vmem:[%s6420_s0 + $0x1a0] sm:$0xff] }
  0x97   :  { %3650 = vmatprep.subr.bf16.mxu0 %v1416_v45 }
  0x98   :  { %3651 = vmatpush3.bf16.msra.mxu0 %v1408_v49  ;;  %v1431_v56 = vpack.c.bf16 %v1282_v50, %v1281_v51  ;;  %v305_v49 = vld [vmem:[%s6418_s1 + $0x3a0] sm:$0xff] }
  0x99   :  { %v531_v58 = vpop.permute.xlu1 %530  ;;  %v526_v59 = vpop.permute.xlu0 %525 }
  0x9a   :  { %v1266_v63 = vmul.f32 %v531_v58, %v48_v48  ;;  %v1265_v0 = vmul.f32 %v526_v59, %v47_v52  ;;  %790 = vperm.xlu1 %4278, %v274_v53   ;;  %785 = vperm.xlu0 %4277, %v273_v54   ;;  %v306_v48 = vld [vmem:[%s6418_s1 + $0x3a8] sm:$0xff]  ;;  %v51_v54 = vld [vmem:[%s6420_s0 + $0x120] sm:$0xff] }
  0x9b   :  { %3754 = vmatprep.subr.bf16.mxu1 %v1431_v56  ;;  %v52_v53 = vld [vmem:[%s6420_s0 + $0x128] sm:$0xff]  ;;  %v289_v58 = vld [vmem:[%s6418_s1 + $0x320] sm:$0xff] }
  0x9c   :  { %v1423_v2 = vpack.c.bf16 %v1266_v63, %v1265_v0 }
  0x9d   :  { %v471_v4 = vpop.permute.xlu1 %470  ;;  %v466_v5 = vpop.permute.xlu0 %465 }
  0x9e   :  { %v1254_v8 = vmul.f32 %v471_v4, %v36_v60  ;;  %v1253_v9 = vmul.f32 %v466_v5, %v35_v61  ;;  %710 = vperm.xlu1 %4278, %v258_v62   ;;  %705 = vperm.xlu0 %4277, %v257_v1   ;;  %v40_v62 = vld [vmem:[%s6420_s0 + $0xc8] sm:$0xff]  ;;  %v39_v1 = vld [vmem:[%s6420_s0 + $0xc0] sm:$0xff] }
  0x9f   :  { %3755 = vmatpush3.bf16.msra.mxu1 %v1423_v2  ;;  %v278_v2 = vld [vmem:[%s6418_s1 + $0x2c8] sm:$0xff] }
  0xa0   :  { %v1417_v13 = vpack.c.bf16 %v1254_v8, %v1253_v9  ;;  %v23_v8 = vld [vmem:[%s6420_s0 + $0x40] sm:$0xff]  ;;  %v262_v9 = vld [vmem:[%s6418_s1 + $0x248] sm:$0xff] }
  0xa1   :  { %v621_v14 = vpop.permute.xlu1 %620  ;;  %v616_v15 = vpop.permute.xlu0 %615 }
  0xa2   :  { %v1284_v20 = vmul.f32 %v621_v14, %v66_v6  ;;  %v1283_v21 = vmul.f32 %v616_v15, %v65_v10  ;;  %940 = vperm.xlu1 %4278, %v304_v11   ;;  %935 = vperm.xlu0 %4277, %v303_v12   ;;  %v261_v12 = vld [vmem:[%s6418_s1 + $0x240] sm:$0xff] }
  0xa3   :  { %3652 = vmatprep.subr.bf16.mxu0 %v1417_v13 }
  0xa4   :  { %v1432_v23 = vpack.c.bf16 %v1284_v20, %v1283_v21  ;;  %3653 = vmatpush3.bf16.msra.mxu0 %v1409_v19  ;;  %v69_v19 = vld [vmem:[%s6420_s0 + $0x1b0] sm:$0xff]  ;;  %v308_v20 = vld [vmem:[%s6418_s1 + $0x3b8] sm:$0xff] }
  0xa5   :  { %v541_v24 = vpop.permute.xlu1 %540  ;;  %v536_v25 = vpop.permute.xlu0 %535  ;;  %v307_v21 = vld [vmem:[%s6418_s1 + $0x3b0] sm:$0xff] }
  0xa6   :  { %v1268_v27 = vmul.f32 %v541_v24, %v50_v16  ;;  %v1267_v28 = vmul.f32 %v536_v25, %v49_v17  ;;  %860 = vperm.xlu1 %4278, %v288_v18   ;;  %855 = vperm.xlu0 %4277, %v287_v22   ;;  %v70_v16 = vld [vmem:[%s6420_s0 + $0x1b8] sm:$0xff] }
  0xa7   :  { %3756 = vmatprep.subr.bf16.mxu1 %v1432_v23  ;;  %v54_v25 = vld [vmem:[%s6420_s0 + $0x138] sm:$0xff] }
  0xa8   :  { %v1424_v32 = vpack.c.bf16 %v1268_v27, %v1267_v28  ;;  %v292_v27 = vld [vmem:[%s6418_s1 + $0x338] sm:$0xff] }
  0xa9   :  { %v481_v33 = vpop.permute.xlu1 %480  ;;  %v476_v34 = vpop.permute.xlu0 %475 }
  0xaa   :  { %v1256_v38 = vmul.f32 %v481_v33, %v38_v26  ;;  %v1255_v39 = vmul.f32 %v476_v34, %v37_v29  ;;  %800 = vperm.xlu1 %4278, %v276_v30   ;;  %795 = vperm.xlu0 %4277, %v275_v31   ;;  %v53_v26 = vld [vmem:[%s6420_s0 + $0x130] sm:$0xff]  ;;  %v42_v34 = vld [vmem:[%s6420_s0 + $0xd8] sm:$0xff] }
  0xab   :  { %3757 = vmatpush3.bf16.msra.mxu1 %v1424_v32  ;;  %v291_v30 = vld [vmem:[%s6418_s1 + $0x330] sm:$0xff] }
  0xac   :  { %v1418_v41 = vpack.c.bf16 %v1256_v38, %v1255_v39  ;;  %v280_v38 = vld [vmem:[%s6418_s1 + $0x2d8] sm:$0xff]  ;;  %v279_v39 = vld [vmem:[%s6418_s1 + $0x2d0] sm:$0xff] }
  0xad   :  { %v401_v42 = vpop.permute.xlu1 %400  ;;  %v396_v43 = vpop.permute.xlu0 %395 }
  0xae   :  { %v1240_v45 = vmul.f32 %v401_v42, %v22_v35  ;;  %v1239_v46 = vmul.f32 %v396_v43, %v21_v36  ;;  %720 = vperm.xlu1 %4278, %v260_v37   ;;  %715 = vperm.xlu0 %4277, %v259_v40   ;;  %v41_v37 = vld [vmem:[%s6420_s0 + $0xd0] sm:$0xff]  ;;  %v26_v43 = vld [vmem:[%s6420_s0 + $0x58] sm:$0xff] }
  0xaf   :  { %3654 = vmatprep.subr.bf16.mxu0 %v1418_v41 }
  0xb0   :  { %v1410_v50 = vpack.c.bf16 %v1240_v45, %v1239_v46  ;;  %v264_v45 = vld [vmem:[%s6418_s1 + $0x258] sm:$0xff] }
  0xb1   :  { %v631_v51 = vpop.permute.xlu1 %630  ;;  %v626_v52 = vpop.permute.xlu0 %625 }
  0xb2   :  { %v1286_v56 = vmul.f32 %v631_v51, %v68_v44  ;;  %v1285_v57 = vmul.f32 %v626_v52, %v67_v47  ;;  %950 = vperm.xlu1 %4278, %v306_v48   ;;  %945 = vperm.xlu0 %4277, %v305_v49   ;;  %v25_v44 = vld [vmem:[%s6420_s0 + $0x50] sm:$0xff]  ;;  %v72_v52 = vld [vmem:[%s6420_s0 + $0x1c8] sm:$0xff] }
  0xb3   :  { %3655 = vmatpush3.bf16.msra.mxu0 %v1410_v50  ;;  %v263_v48 = vld [vmem:[%s6418_s1 + $0x250] sm:$0xff] }
  0xb4   :  { %v1433_v59 = vpack.c.bf16 %v1286_v56, %v1285_v57  ;;  %v310_v56 = vld [vmem:[%s6418_s1 + $0x3c8] sm:$0xff]  ;;  %v309_v57 = vld [vmem:[%s6418_s1 + $0x3c0] sm:$0xff] }
  0xb5   :  { %v551_v60 = vpop.permute.xlu1 %550  ;;  %v546_v61 = vpop.permute.xlu0 %545 }
  0xb6   :  { %v1270_v63 = vmul.f32 %v551_v60, %v52_v53  ;;  %v1269_v0 = vmul.f32 %v546_v61, %v51_v54  ;;  %870 = vperm.xlu1 %4278, %v290_v55   ;;  %865 = vperm.xlu0 %4277, %v289_v58   ;;  %v71_v55 = vld [vmem:[%s6420_s0 + $0x1c0] sm:$0xff]  ;;  %v56_v61 = vld [vmem:[%s6420_s0 + $0x148] sm:$0xff] }
  0xb7   :  { %3758 = vmatprep.subr.bf16.mxu1 %v1433_v59 }
  0xb8   :  { %v1425_v4 = vpack.c.bf16 %v1270_v63, %v1269_v0  ;;  %v294_v63 = vld [vmem:[%s6418_s1 + $0x348] sm:$0xff] }
  0xb9   :  { %v491_v5 = vpop.permute.xlu1 %490  ;;  %v486_v6 = vpop.permute.xlu0 %485 }
  0xba   :  { %v1258_v10 = vmul.f32 %v491_v5, %v40_v62  ;;  %v1257_v11 = vmul.f32 %v486_v6, %v39_v1  ;;  %810 = vperm.xlu1 %4278, %v278_v2   ;;  %805 = vperm.xlu0 %4277, %v277_v3   ;;  %v55_v62 = vld [vmem:[%s6420_s0 + $0x140] sm:$0xff]  ;;  %v44_v6 = vld [vmem:[%s6420_s0 + $0xe8] sm:$0xff] }
  0xbb   :  { %3759 = vmatpush3.bf16.msra.mxu1 %v1425_v4  ;;  %v293_v2 = vld [vmem:[%s6418_s1 + $0x340] sm:$0xff] }
  0xbc   :  { %v1419_v13 = vpack.c.bf16 %v1258_v10, %v1257_v11  ;;  %v282_v10 = vld [vmem:[%s6418_s1 + $0x2e8] sm:$0xff]  ;;  %v281_v11 = vld [vmem:[%s6418_s1 + $0x2e0] sm:$0xff] }
  0xbd   :  { %v411_v14 = vpop.permute.xlu1 %410  ;;  %v406_v15 = vpop.permute.xlu0 %405 }
  0xbe   :  { %v1242_v17 = vmul.f32 %v411_v14, %v24_v7  ;;  %v1241_v18 = vmul.f32 %v406_v15, %v23_v8  ;;  %730 = vperm.xlu1 %4278, %v262_v9   ;;  %725 = vperm.xlu0 %4277, %v261_v12   ;;  %v43_v9 = vld [vmem:[%s6420_s0 + $0xe0] sm:$0xff]  ;;  %v28_v15 = vld [vmem:[%s6420_s0 + $0x68] sm:$0xff] }
  0xbf   :  { %3656 = vmatprep.subr.bf16.mxu0 %v1419_v13 }
  0xc0   :  { %v1411_v22 = vpack.c.bf16 %v1242_v17, %v1241_v18  ;;  %v266_v17 = vld [vmem:[%s6418_s1 + $0x268] sm:$0xff] }
  0xc1   :  { %v641_v23 = vpop.permute.xlu1 %640  ;;  %v636_v24 = vpop.permute.xlu0 %635 }
  0xc2   :  { %v1288_v28 = vmul.f32 %v641_v23, %v70_v16  ;;  %v1287_v29 = vmul.f32 %v636_v24, %v69_v19  ;;  %960 = vperm.xlu1 %4278, %v308_v20   ;;  %955 = vperm.xlu0 %4277, %v307_v21   ;;  %v27_v16 = vld [vmem:[%s6420_s0 + $0x60] sm:$0xff]  ;;  %v74_v24 = vld [vmem:[%s6420_s0 + $0x1d8] sm:$0xff] }
  0xc3   :  { %3657 = vmatpush3.bf16.msra.mxu0 %v1411_v22  ;;  %v265_v20 = vld [vmem:[%s6418_s1 + $0x260] sm:$0xff] }
  0xc4   :  { %v1434_v31 = vpack.c.bf16 %v1288_v28, %v1287_v29  ;;  %v312_v28 = vld [vmem:[%s6418_s1 + $0x3d8] sm:$0xff]  ;;  %v311_v29 = vld [vmem:[%s6418_s1 + $0x3d0] sm:$0xff] }
  0xc5   :  { %v561_v32 = vpop.permute.xlu1 %560  ;;  %v556_v33 = vpop.permute.xlu0 %555 }
  0xc6   :  { %v1272_v35 = vmul.f32 %v561_v32, %v54_v25  ;;  %v1271_v36 = vmul.f32 %v556_v33, %v53_v26  ;;  %880 = vperm.xlu1 %4278, %v292_v27   ;;  %875 = vperm.xlu0 %4277, %v291_v30   ;;  %v73_v27 = vld [vmem:[%s6420_s0 + $0x1d0] sm:$0xff]  ;;  %v58_v33 = vld [vmem:[%s6420_s0 + $0x158] sm:$0xff] }
  0xc7   :  { %3760 = vmatprep.subr.bf16.mxu1 %v1434_v31 }
  0xc8   :  { %v1426_v40 = vpack.c.bf16 %v1272_v35, %v1271_v36  ;;  %v296_v35 = vld [vmem:[%s6418_s1 + $0x358] sm:$0xff] }
  0xc9   :  { %v501_v41 = vpop.permute.xlu1 %500  ;;  %v496_v42 = vpop.permute.xlu0 %495 }
  0xca   :  { %v1260_v46 = vmul.f32 %v501_v41, %v42_v34  ;;  %v1259_v47 = vmul.f32 %v496_v42, %v41_v37  ;;  %820 = vperm.xlu1 %4278, %v280_v38   ;;  %815 = vperm.xlu0 %4277, %v279_v39   ;;  %v57_v34 = vld [vmem:[%s6420_s0 + $0x150] sm:$0xff] }
  0xcb   :  { %3761 = vmatpush3.bf16.msra.mxu1 %v1426_v40  ;;  %v295_v38 = vld [vmem:[%s6418_s1 + $0x350] sm:$0xff] }
  0xcc   :  { %v1420_v49 = vpack.c.bf16 %v1260_v46, %v1259_v47  ;;  %v284_v46 = vld [vmem:[%s6418_s1 + $0x2f8] sm:$0xff]  ;;  %v283_v47 = vld [vmem:[%s6418_s1 + $0x2f0] sm:$0xff] }
  0xcd   :  { %v421_v50 = vpop.permute.xlu1 %420  ;;  %v416_v51 = vpop.permute.xlu0 %415 }
  0xce   :  { %v1244_v53 = vmul.f32 %v421_v50, %v26_v43  ;;  %v1243_v54 = vmul.f32 %v416_v51, %v25_v44  ;;  %740 = vperm.xlu1 %4278, %v264_v45   ;;  %735 = vperm.xlu0 %4277, %v263_v48   ;;  %v46_v44 = vld [vmem:[%s6420_s0 + $0xf8] sm:$0xff]  ;;  %v45_v45 = vld [vmem:[%s6420_s0 + $0xf0] sm:$0xff] }
  0xcf   :  { %3658 = vmatprep.subr.bf16.mxu0 %v1420_v49 }
  0xd0   :  { %v1412_v58 = vpack.c.bf16 %v1244_v53, %v1243_v54  ;;  %v30_v53 = vld [vmem:[%s6420_s0 + $0x78] sm:$0xff]  ;;  %v29_v54 = vld [vmem:[%s6420_s0 + $0x70] sm:$0xff] }
  0xd1   :  { %v651_v59 = vpop.permute.xlu1 %650  ;;  %v646_v60 = vpop.permute.xlu0 %645 }
  0xd2   :  { %v1290_v0 = vmul.f32 %v651_v59, %v72_v52  ;;  %v1289_v1 = vmul.f32 %v646_v60, %v71_v55  ;;  %970 = vperm.xlu1 %4278, %v310_v56   ;;  %965 = vperm.xlu0 %4277, %v309_v57   ;;  %v268_v55 = vld [vmem:[%s6418_s1 + $0x278] sm:$0xff]  ;;  %v267_v56 = vld [vmem:[%s6418_s1 + $0x270] sm:$0xff] }
  0xd3   :  { %3659 = vmatpush3.bf16.msra.mxu0 %v1412_v58 }
  0xd4   :  { %v1435_v3 = vpack.c.bf16 %v1290_v0, %v1289_v1  ;;  %v314_v0 = vld [vmem:[%s6418_s1 + $0x3e8] sm:$0xff]  ;;  %v313_v1 = vld [vmem:[%s6418_s1 + $0x3e0] sm:$0xff] }
  0xd5   :  { %v571_v4 = vpop.permute.xlu1 %570  ;;  %v566_v5 = vpop.permute.xlu0 %565 }
  0xd6   :  { %v1274_v7 = vmul.f32 %v571_v4, %v56_v61  ;;  %v1273_v8 = vmul.f32 %v566_v5, %v55_v62  ;;  %890 = vperm.xlu1 %4278, %v294_v63   ;;  %885 = vperm.xlu0 %4277, %v293_v2   ;;  %v76_v62 = vld [vmem:[%s6420_s0 + $0x1e8] sm:$0xff]  ;;  %v75_v63 = vld [vmem:[%s6420_s0 + $0x1e0] sm:$0xff] }
  0xd7   :  { %3762 = vmatprep.subr.bf16.mxu1 %v1435_v3 }
  0xd8   :  { %v1427_v12 = vpack.c.bf16 %v1274_v7, %v1273_v8  ;;  %v60_v7 = vld [vmem:[%s6420_s0 + $0x168] sm:$0xff]  ;;  %v59_v8 = vld [vmem:[%s6420_s0 + $0x160] sm:$0xff] }
  0xd9   :  { %v511_v13 = vpop.permute.xlu1 %510  ;;  %v506_v14 = vpop.permute.xlu0 %505 }
  0xda   :  { %v1262_v18 = vmul.f32 %v511_v13, %v44_v6  ;;  %v1261_v19 = vmul.f32 %v506_v14, %v43_v9  ;;  %830 = vperm.xlu1 %4278, %v282_v10   ;;  %825 = vperm.xlu0 %4277, %v281_v11   ;;  %v298_v9 = vld [vmem:[%s6418_s1 + $0x368] sm:$0xff]  ;;  %v297_v10 = vld [vmem:[%s6418_s1 + $0x360] sm:$0xff] }
  0xdb   :  { %3763 = vmatpush3.bf16.msra.mxu1 %v1427_v12  ;;  %v4279_v11 = vld [vmem:[%s6419_s2] ss:$44 sps:$4 sm:$0xff]   ;;  %v4282_v13 = vld [vmem:[%s6419_s2 + $0x5c] ss:$44 sps:$4 sm:$0xff]  }
  0xdc   :  { %v1421_v21 = vpack.c.bf16 %v1262_v18, %v1261_v19  ;;  %v78_v18 = vld [vmem:[%s6420_s0 + $0x1f8] sm:$0xff]  ;;  %v77_v19 = vld [vmem:[%s6420_s0 + $0x1f0] sm:$0xff] }
  0xdd   :  { %v431_v22 = vpop.permute.xlu1 %430  ;;  %v426_v23 = vpop.permute.xlu0 %425 }
  0xde   :  { %v1246_v25 = vmul.f32 %v431_v22, %v28_v15  ;;  %v1245_v26 = vmul.f32 %v426_v23, %v27_v16  ;;  %750 = vperm.xlu1 %4278, %v266_v17   ;;  %745 = vperm.xlu0 %4277, %v265_v20   ;;  %v316_v20 = vld [vmem:[%s6418_s1 + $0x3f8] sm:$0xff] }
  0xdf   :  { %3660 = vmatprep.subr.bf16.mxu0 %v1421_v21  ;;  %v315_v21 = vld [vmem:[%s6418_s1 + $0x3f0] sm:$0xff] }
  0xe0   :  { %v1413_v30 = vpack.c.bf16 %v1246_v25, %v1245_v26 }
  0xe1   :  { %v661_v31 = vpop.permute.xlu1 %660  ;;  %v656_v32 = vpop.permute.xlu0 %655 }
  0xe2   :  { %v1292_v36 = vmul.f32 %v661_v31, %v74_v24  ;;  %v1291_v37 = vmul.f32 %v656_v32, %v73_v27  ;;  %980 = vperm.xlu1 %4278, %v312_v28   ;;  %975 = vperm.xlu0 %4277, %v311_v29   ;;  %v62_v27 = vld [vmem:[%s6420_s0 + $0x178] sm:$0xff]  ;;  %v61_v28 = vld [vmem:[%s6420_s0 + $0x170] sm:$0xff] }
  0xe3   :  { %3661 = vmatpush3.bf16.msra.mxu0 %v1413_v30  ;;  %v300_v29 = vld [vmem:[%s6418_s1 + $0x378] sm:$0xff]  ;;  %v299_v30 = vld [vmem:[%s6418_s1 + $0x370] sm:$0xff] }
  0xe4   :  { %v1436_v39 = vpack.c.bf16 %v1292_v36, %v1291_v37  ;;  %v4284_v31 = vld [vmem:[%s6419_s2 + $0x58] ss:$44 sps:$4 sm:$0xff]  }
  0xe5   :  { %v581_v40 = vpop.permute.xlu1 %580  ;;  %v576_v41 = vpop.permute.xlu0 %575 }
  0xe6   :  { %v1276_v42 = vmul.f32 %v581_v40, %v58_v33  ;;  %v1275_v43 = vmul.f32 %v576_v41, %v57_v34  ;;  %900 = vperm.xlu1 %4278, %v296_v35   ;;  %895 = vperm.xlu0 %4277, %v295_v38   ;;  %v4285_v33 = vld [vmem:[%s6419_s2 + $0xb4] ss:$44 sps:$4 sm:$0xff]   ;;  %v96_v38 = vld [vmem:[%s6420_s0 + $0x288] sm:$0xff] }
  0xe7   :  { %3764 = vmatprep.subr.bf16.mxu1 %v1436_v39  ;;  %v95_v39 = vld [vmem:[%s6420_s0 + $0x280] sm:$0xff]  ;;  %v334_v40 = vld [vmem:[%s6418_s1 + $0x488] sm:$0xff] }
  0xe8   :  { %v1428_v48 = vpack.c.bf16 %v1276_v42, %v1275_v43  ;;  %v333_v41 = vld [vmem:[%s6418_s1 + $0x480] sm:$0xff] }
  0xe9   :  { %v521_v49 = vpop.permute.xlu1 %520  ;;  %v516_v50 = vpop.permute.xlu0 %515 }
  0xea   :  { %v1264_v51 = vmul.f32 %v521_v49, %v46_v44  ;;  %v1263_v52 = vmul.f32 %v516_v50, %v45_v45  ;;  %840 = vperm.xlu1 %4278, %v284_v46   ;;  %835 = vperm.xlu0 %4277, %v283_v47   ;;  %v80_v47 = vld [vmem:[%s6420_s0 + $0x208] sm:$0xff]  ;;  %v317_v50 = vld [vmem:[%s6418_s1 + $0x400] sm:$0xff] }
  0xeb   :  { %3765 = vmatpush3.bf16.msra.mxu1 %v1428_v48  ;;  %v79_v48 = vld [vmem:[%s6420_s0 + $0x200] sm:$0xff]  ;;  %v318_v49 = vld [vmem:[%s6418_s1 + $0x408] sm:$0xff] }
  0xec   :  { %v1422_v57 = vpack.c.bf16 %v1264_v51, %v1263_v52  ;;  %v4290_v51 = vld [vmem:[%s6419_s2 + $0xb0] ss:$44 sps:$4 sm:$0xff]  }
  0xed   :  { %v441_v58 = vpop.permute.xlu1 %440  ;;  %v436_v59 = vpop.permute.xlu0 %435 }
  0xee   :  { %v1248_v60 = vmul.f32 %v441_v58, %v30_v53  ;;  %v1247_v61 = vmul.f32 %v436_v59, %v29_v54  ;;  %760 = vperm.xlu1 %4278, %v268_v55   ;;  %755 = vperm.xlu0 %4277, %v267_v56   ;;  %v4287_v53 = vld [vmem:[%s6419_s2 + $0x8] ss:$44 sps:$4 sm:$0xff]   ;;  %v4291_v54 = vld [vmem:[%s6419_s2 + $0x10c] ss:$44 sps:$4 sm:$0xff]  }
  0xef   :  { %3662 = vmatprep.subr.bf16.mxu0 %v1422_v57  ;;  %v4293_v57 = vld [vmem:[%s6419_s2 + $0x64] ss:$44 sps:$4 sm:$0xff]  }
  0xf0   :  { %v1414_v2 = vpack.c.bf16 %v1248_v60, %v1247_v61  ;;  %v98_v60 = vld [vmem:[%s6420_s0 + $0x298] sm:$0xff]  ;;  %v97_v61 = vld [vmem:[%s6420_s0 + $0x290] sm:$0xff] }
  0xf1   :  { %v671_v3 = vpop.permute.xlu1 %670  ;;  %v666_v4 = vpop.permute.xlu0 %665 }
  0xf2   :  { %v1294_v5 = vmul.f32 %v671_v3, %v76_v62  ;;  %v1293_v6 = vmul.f32 %v666_v4, %v75_v63  ;;  %990 = vperm.xlu1 %4278, %v314_v0   ;;  %985 = vperm.xlu0 %4277, %v313_v1   ;;  %v336_v62 = vld [vmem:[%s6418_s1 + $0x498] sm:$0xff]  ;;  %v335_v63 = vld [vmem:[%s6418_s1 + $0x490] sm:$0xff] }
  0xf3   :  { %3663 = vmatpush3.bf16.msra.mxu0 %v1414_v2 }
  0xf4   :  { %v1437_v12 = vpack.c.bf16 %v1294_v5, %v1293_v6  ;;  %v82_v5 = vld [vmem:[%s6420_s0 + $0x218] sm:$0xff]  ;;  %v81_v6 = vld [vmem:[%s6420_s0 + $0x210] sm:$0xff] }
  0xf5   :  { %v591_v14 = vpop.permute.xlu1 %590  ;;  %v586_v15 = vpop.permute.xlu0 %585 }
  0xf6   :  { %v1278_v16 = vmul.f32 %v591_v14, %v60_v7  ;;  %v1277_v17 = vmul.f32 %v586_v15, %v59_v8  ;;  %910 = vperm.xlu1 %4278, %v298_v9   ;;  %905 = vperm.xlu0 %4277, %v297_v10   ;;  %v320_v7 = vld [vmem:[%s6418_s1 + $0x418] sm:$0xff]  ;;  %v319_v8 = vld [vmem:[%s6418_s1 + $0x410] sm:$0xff] }
  0xf7   :  { %3766 = vmatprep.subr.bf16.mxu1 %v1437_v12  ;;  %2555 = vmatmul.mubr.bf16.vlgmr.msra.gmra.mrb[0].mxu0 %v4279_v11  ;;  %v4295_v9 = vld [vmem:[%s6419_s2 + $0x108] ss:$44 sps:$4 sm:$0xff]   ;;  %v4296_v11 = vld [vmem:[%s6419_s2 + $0x60] ss:$44 sps:$4 sm:$0xff]   ;;  %v4297_v12 = vld [vmem:[%s6419_s2 + $0x164] ss:$44 sps:$4 sm:$0xff]  }
  0xf8   :  { %v1429_v22 = vpack.c.bf16 %v1278_v16, %v1277_v17  ;;  %2562 = vmatprep.mubr.bf16.mxu0 %v4282_v13  ;;  %v4299_v15 = vld [vmem:[%s6419_s2 + $0xbc] ss:$44 sps:$4 sm:$0xff]  }
  0xf9   :  { %v681_v23 = vpop.permute.xlu1 %680  ;;  %v676_v24 = vpop.permute.xlu0 %675 }
  0xfa   :  { %v1296_v25 = vmul.f32 %v681_v23, %v78_v18  ;;  %v1295_v26 = vmul.f32 %v676_v24, %v77_v19  ;;  %1000 = vperm.xlu1 %4278, %v316_v20   ;;  %995 = vperm.xlu0 %4277, %v315_v21   ;;  %v128_v18 = vld [vmem:[%s6420_s0 + $0x388] sm:$0xff]  ;;  %v127_v19 = vld [vmem:[%s6420_s0 + $0x380] sm:$0xff] }
  0xfb   :  { %3767 = vmatpush3.bf16.msra.mxu1 %v1429_v22  ;;  %v338_v20 = vld [vmem:[%s6418_s1 + $0x4a8] sm:$0xff]  ;;  %v337_v21 = vld [vmem:[%s6418_s1 + $0x4a0] sm:$0xff] }
  0xfc   :  { %v1438_v32 = vpack.c.bf16 %v1296_v25, %v1295_v26 }
  0xfd   :  { %v601_v34 = vpop.permute.xlu1 %600  ;;  %v596_v35 = vpop.permute.xlu0 %595 }
  0xfe   :  { %v1280_v36 = vmul.f32 %v601_v34, %v62_v27  ;;  %v1279_v37 = vmul.f32 %v596_v35, %v61_v28  ;;  %920 = vperm.xlu1 %4278, %v300_v29   ;;  %915 = vperm.xlu0 %4277, %v299_v30   ;;  %v112_v27 = vld [vmem:[%s6420_s0 + $0x308] sm:$0xff]  ;;  %v111_v28 = vld [vmem:[%s6420_s0 + $0x300] sm:$0xff] }
  0xff   :  { %3768 = vmatprep.subr.bf16.mxu1 %v1438_v32  ;;  %2563 = vmatmul.mubr.bf16.gmra.mrb[4].mxu0 %v4284_v31  ;;  %v322_v29 = vld [vmem:[%s6418_s1 + $0x428] sm:$0xff]  ;;  %v321_v30 = vld [vmem:[%s6418_s1 + $0x420] sm:$0xff] }
 0x100   :  { %v1430_v42 = vpack.c.bf16 %v1280_v36, %v1279_v37  ;;  %2570 = vmatprep.mubr.bf16.mxu0 %v4285_v33  ;;  %v4301_v31 = vld [vmem:[%s6419_s2 + $0x160] ss:$44 sps:$4 sm:$0xff]   ;;  %v4302_v33 = vld [vmem:[%s6419_s2 + $0xb8] ss:$44 sps:$4 sm:$0xff]   ;;  %v4303_v34 = vld [vmem:[%s6419_s2 + $0x1bc] ss:$44 sps:$4 sm:$0xff]  }
 0x101   :  { %v771_v43 = vpop.permute.xlu1 %770  ;;  %v766_v44 = vpop.permute.xlu0 %765  ;;  %v4305_v37 = vld [vmem:[%s6419_s2 + $0x114] ss:$44 sps:$4 sm:$0xff]  }
 0x102   :  { %v1314_v45 = vmul.f32 %v771_v43, %v96_v38  ;;  %v1313_v46 = vmul.f32 %v766_v44, %v95_v39  ;;  %1090 = vperm.xlu1 %4278, %v334_v40   ;;  %1085 = vperm.xlu0 %4277, %v333_v41   ;;  %v100_v40 = vld [vmem:[%s6420_s0 + $0x2a8] sm:$0xff]  ;;  %v99_v41 = vld [vmem:[%s6420_s0 + $0x2a0] sm:$0xff] }
 0x103   :  { %3769 = vmatpush3.bf16.msra.mxu1 %v1430_v42  ;;  %v350_v42 = vld [vmem:[%s6418_s1 + $0x508] sm:$0xff]  ;;  %v349_v43 = vld [vmem:[%s6418_s1 + $0x500] sm:$0xff] }
 0x104   :  { %v1447_v52 = vpack.c.bf16 %v1314_v45, %v1313_v46 }
 0x105   :  { %v691_v55 = vpop.permute.xlu1 %690  ;;  %v686_v56 = vpop.permute.xlu0 %685 }
 0x106   :  { %v1298_v58 = vmul.f32 %v691_v55, %v80_v47  ;;  %v1297_v59 = vmul.f32 %v686_v56, %v79_v48  ;;  %1010 = vperm.xlu1 %4278, %v318_v49   ;;  %1005 = vperm.xlu0 %4277, %v317_v50   ;;  %v84_v49 = vld [vmem:[%s6420_s0 + $0x228] sm:$0xff]  ;;  %v83_v50 = vld [vmem:[%s6420_s0 + $0x220] sm:$0xff]  ;;  %v4308_v55 = vld [vmem:[%s6419_s2 + $0x110] ss:$44 sps:$4 sm:$0xff]  }
 0x107   :  { %3860 = vmatprep.subr.bf16.mxu0 %v1447_v52  ;;  %2571 = vmatmul.mubr.bf16.gmra.mrb[8].mxu0 %v4290_v51  ;;  %v340_v51 = vld [vmem:[%s6418_s1 + $0x4b8] sm:$0xff]  ;;  %v339_v52 = vld [vmem:[%s6418_s1 + $0x4b0] sm:$0xff] }
 0x108   :  { %v1439_v0 = vpack.c.bf16 %v1298_v58, %v1297_v59  ;;  %2707 = vmatmul.mubr.bf16.vlgmr.msra.gmra.mrb[0].mxu1 %v4287_v53  ;;  %2578 = vmatprep.mubr.bf16.mxu0 %v4291_v54  ;;  %v4307_v53 = vld [vmem:[%s6419_s2 + $0x1b8] ss:$44 sps:$4 sm:$0xff]   ;;  %v4309_v56 = vld [vmem:[%s6419_s2 + $0x214] ss:$44 sps:$4 sm:$0xff]  }
 0x109   :  { %v781_v1 = vpop.permute.xlu1 %780  ;;  %v776_v2 = vpop.permute.xlu0 %775  ;;  %2714 = vmatprep.mubr.bf16.mxu1 %v4293_v57  ;;  %v4311_v59 = vld [vmem:[%s6419_s2 + $0x16c] ss:$44 sps:$4 sm:$0xff]  }
 0x10a   :  { %v1316_v3 = vmul.f32 %v781_v1, %v98_v60  ;;  %v1315_v4 = vmul.f32 %v776_v2, %v97_v61  ;;  %1100 = vperm.xlu1 %4278, %v336_v62   ;;  %1095 = vperm.xlu0 %4277, %v335_v63   ;;  %v130_v62 = vld [vmem:[%s6420_s0 + $0x398] sm:$0xff]  ;;  %v129_v63 = vld [vmem:[%s6420_s0 + $0x390] sm:$0xff] }
 0x10b   :  { %3861 = vmatpush3.bf16.msra.mxu0 %v1439_v0  ;;  %v324_v0 = vld [vmem:[%s6418_s1 + $0x438] sm:$0xff]  ;;  %v323_v1 = vld [vmem:[%s6418_s1 + $0x430] sm:$0xff] }
 0x10c   :  { %v1448_v10 = vpack.c.bf16 %v1316_v3, %v1315_v4 }
 0x10d   :  { %v701_v13 = vpop.permute.xlu1 %700  ;;  %v696_v14 = vpop.permute.xlu0 %695 }
 0x10e   :  { %v1300_v16 = vmul.f32 %v701_v13, %v82_v5  ;;  %v1299_v17 = vmul.f32 %v696_v14, %v81_v6  ;;  %1020 = vperm.xlu1 %4278, %v320_v7   ;;  %1015 = vperm.xlu0 %4277, %v319_v8   ;;  %v114_v7 = vld [vmem:[%s6420_s0 + $0x318] sm:$0xff]  ;;  %v113_v8 = vld [vmem:[%s6420_s0 + $0x310] sm:$0xff] }
 0x10f   :  { %3862 = vmatprep.subr.bf16.mxu0 %v1448_v10  ;;  %2579 = vmatmul.mubr.bf16.gmra.mrb[12].mxu0 %v4295_v9  ;;  %v352_v9 = vld [vmem:[%s6418_s1 + $0x518] sm:$0xff]  ;;  %v351_v10 = vld [vmem:[%s6418_s1 + $0x510] sm:$0xff] }
 0x110   :  { %v1440_v22 = vpack.c.bf16 %v1300_v16, %v1299_v17  ;;  %2715 = vmatmul.mubr.bf16.gmra.mrb[4].mxu1 %v4296_v11  ;;  %2586 = vmatprep.mubr.bf16.mxu0 %v4297_v12  ;;  %v4313_v11 = vld [vmem:[%s6419_s2 + $0x210] ss:$44 sps:$4 sm:$0xff]   ;;  %v4314_v13 = vld [vmem:[%s6419_s2 + $0x168] ss:$44 sps:$4 sm:$0xff]   ;;  %v4315_v14 = vld [vmem:[%s6419_s2 + $0x26c] ss:$44 sps:$4 sm:$0xff]  }
 0x111   :  { %v931_v23 = vpop.permute.xlu1 %930  ;;  %v926_v24 = vpop.permute.xlu0 %925  ;;  %2722 = vmatprep.mubr.bf16.mxu1 %v4299_v15  ;;  %v4317_v17 = vld [vmem:[%s6419_s2 + $0x1c4] ss:$44 sps:$4 sm:$0xff]  }
 0x112   :  { %v1346_v25 = vmul.f32 %v931_v23, %v128_v18  ;;  %v1345_v26 = vmul.f32 %v926_v24, %v127_v19  ;;  %1110 = vperm.xlu1 %4278, %v338_v20   ;;  %1105 = vperm.xlu0 %4277, %v337_v21   ;;  %v102_v20 = vld [vmem:[%s6420_s0 + $0x2b8] sm:$0xff]  ;;  %v101_v21 = vld [vmem:[%s6420_s0 + $0x2b0] sm:$0xff]  ;;  %v341_v23 = vld [vmem:[%s6418_s1 + $0x4c0] sm:$0xff] }
 0x113   :  { %3863 = vmatpush3.bf16.msra.mxu0 %v1440_v22  ;;  %v342_v22 = vld [vmem:[%s6418_s1 + $0x4c8] sm:$0xff] }
 0x114   :  { %v1463_v32 = vpack.c.bf16 %v1346_v25, %v1345_v26 }
 0x115   :  { %v851_v35 = vpop.permute.xlu1 %850  ;;  %v846_v36 = vpop.permute.xlu0 %845 }
 0x116   :  { %v1330_v38 = vmul.f32 %v851_v35, %v112_v27  ;;  %v1329_v39 = vmul.f32 %v846_v36, %v111_v28  ;;  %1030 = vperm.xlu1 %4278, %v322_v29   ;;  %1025 = vperm.xlu0 %4277, %v321_v30   ;;  %v86_v29 = vld [vmem:[%s6420_s0 + $0x238] sm:$0xff]  ;;  %v85_v30 = vld [vmem:[%s6420_s0 + $0x230] sm:$0xff]  ;;  %v4320_v35 = vld [vmem:[%s6419_s2 + $0x1c0] ss:$44 sps:$4 sm:$0xff]  }
 0x117   :  { %3966 = vmatprep.subr.bf16.mxu1 %v1463_v32  ;;  %2587 = vmatmul.mubr.bf16.gmra.mrb[16].mxu0 %v4301_v31  ;;  %v326_v31 = vld [vmem:[%s6418_s1 + $0x448] sm:$0xff]  ;;  %v325_v32 = vld [vmem:[%s6418_s1 + $0x440] sm:$0xff] }
 0x118   :  { %v1455_v44 = vpack.c.bf16 %v1330_v38, %v1329_v39  ;;  %2723 = vmatmul.mubr.bf16.gmra.mrb[8].mxu1 %v4302_v33  ;;  %2594 = vmatprep.mubr.bf16.mxu0 %v4303_v34  ;;  %v4319_v33 = vld [vmem:[%s6419_s2 + $0x268] ss:$44 sps:$4 sm:$0xff]   ;;  %v4321_v36 = vld [vmem:[%s6419_s2 + $0x2c4] ss:$44 sps:$4 sm:$0xff]  }
 0x119   :  { %v791_v45 = vpop.permute.xlu1 %790  ;;  %v786_v46 = vpop.permute.xlu0 %785  ;;  %2730 = vmatprep.mubr.bf16.mxu1 %v4305_v37  ;;  %v4323_v39 = vld [vmem:[%s6419_s2 + $0x21c] ss:$44 sps:$4 sm:$0xff]  }
 0x11a   :  { %v1318_v47 = vmul.f32 %v791_v45, %v100_v40  ;;  %v1317_v48 = vmul.f32 %v786_v46, %v99_v41  ;;  %1170 = vperm.xlu1 %4278, %v350_v42   ;;  %1165 = vperm.xlu0 %4277, %v349_v43   ;;  %v132_v42 = vld [vmem:[%s6420_s0 + $0x3a8] sm:$0xff]  ;;  %v131_v43 = vld [vmem:[%s6420_s0 + $0x3a0] sm:$0xff] }
 0x11b   :  { %3967 = vmatpush3.bf16.msra.mxu1 %v1455_v44  ;;  %v354_v44 = vld [vmem:[%s6418_s1 + $0x528] sm:$0xff]  ;;  %v353_v45 = vld [vmem:[%s6418_s1 + $0x520] sm:$0xff] }
 0x11c   :  { %v1449_v54 = vpack.c.bf16 %v1318_v47, %v1317_v48 }
 0x11d   :  { %v711_v57 = vpop.permute.xlu1 %710  ;;  %v706_v58 = vpop.permute.xlu0 %705 }
 0x11e   :  { %v1302_v60 = vmul.f32 %v711_v57, %v84_v49  ;;  %v1301_v61 = vmul.f32 %v706_v58, %v83_v50  ;;  %1120 = vperm.xlu1 %4278, %v340_v51   ;;  %1115 = vperm.xlu0 %4277, %v339_v52   ;;  %v116_v51 = vld [vmem:[%s6420_s0 + $0x328] sm:$0xff]  ;;  %v115_v52 = vld [vmem:[%s6420_s0 + $0x320] sm:$0xff] }
 0x11f   :  { %3864 = vmatprep.subr.bf16.mxu0 %v1449_v54  ;;  %2595 = vmatmul.mubr.bf16.gmra.mrb[20].mxu0 %v4307_v53  ;;  %v344_v53 = vld [vmem:[%s6418_s1 + $0x4d8] sm:$0xff]  ;;  %v343_v54 = vld [vmem:[%s6418_s1 + $0x4d0] sm:$0xff] }
 0x120   :  { %v1441_v2 = vpack.c.bf16 %v1302_v60, %v1301_v61  ;;  %2731 = vmatmul.mubr.bf16.gmra.mrb[12].mxu1 %v4308_v55  ;;  %2602 = vmatprep.mubr.bf16.mxu0 %v4309_v56  ;;  %v4325_v55 = vld [vmem:[%s6419_s2 + $0x2c0] ss:$44 sps:$4 sm:$0xff]   ;;  %v4326_v57 = vld [vmem:[%s6419_s2 + $0x218] ss:$44 sps:$4 sm:$0xff]   ;;  %v4327_v58 = vld [vmem:[%s6419_s2 + $0x31c] ss:$44 sps:$4 sm:$0xff]  }
 0x121   :  { %v941_v3 = vpop.permute.xlu1 %940  ;;  %v936_v4 = vpop.permute.xlu0 %935  ;;  %2738 = vmatprep.mubr.bf16.mxu1 %v4311_v59  ;;  %v4329_v61 = vld [vmem:[%s6419_s2 + $0x274] ss:$44 sps:$4 sm:$0xff]  }
 0x122   :  { %v1348_v5 = vmul.f32 %v941_v3, %v130_v62  ;;  %v1347_v6 = vmul.f32 %v936_v4, %v129_v63  ;;  %1040 = vperm.xlu1 %4278, %v324_v0   ;;  %1035 = vperm.xlu0 %4277, %v323_v1   ;;  %v104_v0 = vld [vmem:[%s6420_s0 + $0x2c8] sm:$0xff]  ;;  %v103_v1 = vld [vmem:[%s6420_s0 + $0x2c0] sm:$0xff]  ;;  %v327_v3 = vld [vmem:[%s6418_s1 + $0x450] sm:$0xff] }
 0x123   :  { %3865 = vmatpush3.bf16.msra.mxu0 %v1441_v2  ;;  %v328_v2 = vld [vmem:[%s6418_s1 + $0x458] sm:$0xff] }
 0x124   :  { %v1464_v12 = vpack.c.bf16 %v1348_v5, %v1347_v6 }
 0x125   :  { %v861_v15 = vpop.permute.xlu1 %860  ;;  %v856_v16 = vpop.permute.xlu0 %855 }
 0x126   :  { %v1332_v18 = vmul.f32 %v861_v15, %v114_v7  ;;  %v1331_v19 = vmul.f32 %v856_v16, %v113_v8  ;;  %1180 = vperm.xlu1 %4278, %v352_v9   ;;  %1175 = vperm.xlu0 %4277, %v351_v10   ;;  %v88_v9 = vld [vmem:[%s6420_s0 + $0x248] sm:$0xff]  ;;  %v87_v10 = vld [vmem:[%s6420_s0 + $0x240] sm:$0xff]  ;;  %v4332_v15 = vld [vmem:[%s6419_s2 + $0x270] ss:$44 sps:$4 sm:$0xff]  }
 0x127   :  { %3968 = vmatprep.subr.bf16.mxu1 %v1464_v12  ;;  %2603 = vmatmul.mubr.bf16.gmra.mrb[24].mxu0 %v4313_v11  ;;  %v356_v11 = vld [vmem:[%s6418_s1 + $0x538] sm:$0xff]  ;;  %v355_v12 = vld [vmem:[%s6418_s1 + $0x530] sm:$0xff] }
 0x128   :  { %v1456_v24 = vpack.c.bf16 %v1332_v18, %v1331_v19  ;;  %2739 = vmatmul.mubr.bf16.gmra.mrb[16].mxu1 %v4314_v13  ;;  %2610 = vmatprep.mubr.bf16.mxu0 %v4315_v14  ;;  %v4331_v13 = vld [vmem:[%s6419_s2 + $0x318] ss:$44 sps:$4 sm:$0xff]   ;;  %v4333_v16 = vld [vmem:[%s6419_s2 + $0x374] ss:$44 sps:$4 sm:$0xff]  }
 0x129   :  { %v801_v25 = vpop.permute.xlu1 %800  ;;  %v796_v26 = vpop.permute.xlu0 %795  ;;  %2746 = vmatprep.mubr.bf16.mxu1 %v4317_v17  ;;  %v4335_v19 = vld [vmem:[%s6419_s2 + $0x2cc] ss:$44 sps:$4 sm:$0xff]  }
 0x12a   :  { %v1320_v27 = vmul.f32 %v801_v25, %v102_v20  ;;  %v1319_v28 = vmul.f32 %v796_v26, %v101_v21  ;;  %1130 = vperm.xlu1 %4278, %v342_v22   ;;  %1125 = vperm.xlu0 %4277, %v341_v23   ;;  %v134_v22 = vld [vmem:[%s6420_s0 + $0x3b8] sm:$0xff]  ;;  %v133_v23 = vld [vmem:[%s6420_s0 + $0x3b0] sm:$0xff]  ;;  %v345_v25 = vld [vmem:[%s6418_s1 + $0x4e0] sm:$0xff] }
 0x12b   :  { %3969 = vmatpush3.bf16.msra.mxu1 %v1456_v24  ;;  %v346_v24 = vld [vmem:[%s6418_s1 + $0x4e8] sm:$0xff] }
 0x12c   :  { %v1450_v34 = vpack.c.bf16 %v1320_v27, %v1319_v28 }
 0x12d   :  { %v721_v37 = vpop.permute.xlu1 %720  ;;  %v716_v38 = vpop.permute.xlu0 %715 }
 0x12e   :  { %v1304_v40 = vmul.f32 %v721_v37, %v86_v29  ;;  %v1303_v41 = vmul.f32 %v716_v38, %v85_v30  ;;  %1050 = vperm.xlu1 %4278, %v326_v31   ;;  %1045 = vperm.xlu0 %4277, %v325_v32   ;;  %v118_v31 = vld [vmem:[%s6420_s0 + $0x338] sm:$0xff]  ;;  %v117_v32 = vld [vmem:[%s6420_s0 + $0x330] sm:$0xff] }
 0x12f   :  { %3866 = vmatprep.subr.bf16.mxu0 %v1450_v34  ;;  %2611 = vmatmul.mubr.bf16.gmra.mrb[28].mxu0 %v4319_v33  ;;  %v330_v33 = vld [vmem:[%s6418_s1 + $0x468] sm:$0xff]  ;;  %v329_v34 = vld [vmem:[%s6418_s1 + $0x460] sm:$0xff] }
 0x130   :  { %v1442_v46 = vpack.c.bf16 %v1304_v40, %v1303_v41  ;;  %2747 = vmatmul.mubr.bf16.gmra.mrb[20].mxu1 %v4320_v35  ;;  %2618 = vmatprep.mubr.bf16.mxu0 %v4321_v36  ;;  %v4337_v35 = vld [vmem:[%s6419_s2 + $0x370] ss:$44 sps:$4 sm:$0xff]   ;;  %v4338_v37 = vld [vmem:[%s6419_s2 + $0x2c8] ss:$44 sps:$4 sm:$0xff]   ;;  %v4339_v38 = vld [vmem:[%s6419_s2 + $0x3cc] ss:$44 sps:$4 sm:$0xff]  }
 0x131   :  { %v951_v47 = vpop.permute.xlu1 %950  ;;  %v946_v48 = vpop.permute.xlu0 %945  ;;  %2754 = vmatprep.mubr.bf16.mxu1 %v4323_v39  ;;  %v4341_v41 = vld [vmem:[%s6419_s2 + $0x324] ss:$44 sps:$4 sm:$0xff]  }
 0x132   :  { %v1350_v49 = vmul.f32 %v951_v47, %v132_v42  ;;  %v1349_v50 = vmul.f32 %v946_v48, %v131_v43  ;;  %1190 = vperm.xlu1 %4278, %v354_v44   ;;  %1185 = vperm.xlu0 %4277, %v353_v45   ;;  %v106_v44 = vld [vmem:[%s6420_s0 + $0x2d8] sm:$0xff]  ;;  %v105_v45 = vld [vmem:[%s6420_s0 + $0x2d0] sm:$0xff]  ;;  %v357_v47 = vld [vmem:[%s6418_s1 + $0x540] sm:$0xff] }
 0x133   :  { %3867 = vmatpush3.bf16.msra.mxu0 %v1442_v46  ;;  %v358_v46 = vld [vmem:[%s6418_s1 + $0x548] sm:$0xff] }
 0x134   :  { %v1465_v56 = vpack.c.bf16 %v1350_v49, %v1349_v50 }
 0x135   :  { %v871_v59 = vpop.permute.xlu1 %870  ;;  %v866_v60 = vpop.permute.xlu0 %865 }
 0x136   :  { %v1334_v62 = vmul.f32 %v871_v59, %v116_v51  ;;  %v1333_v63 = vmul.f32 %v866_v60, %v115_v52  ;;  %1140 = vperm.xlu1 %4278, %v344_v53   ;;  %1135 = vperm.xlu0 %4277, %v343_v54   ;;  %v90_v53 = vld [vmem:[%s6420_s0 + $0x258] sm:$0xff]  ;;  %v89_v54 = vld [vmem:[%s6420_s0 + $0x250] sm:$0xff]  ;;  %v4344_v59 = vld [vmem:[%s6419_s2 + $0x320] ss:$44 sps:$4 sm:$0xff]  }
 0x137   :  { %3970 = vmatprep.subr.bf16.mxu1 %v1465_v56  ;;  %2619 = vmatmul.mubr.bf16.gmra.mrb[32].mxu0 %v4325_v55  ;;  %v348_v55 = vld [vmem:[%s6418_s1 + $0x4f8] sm:$0xff]  ;;  %v347_v56 = vld [vmem:[%s6418_s1 + $0x4f0] sm:$0xff] }
 0x138   :  { %v1457_v4 = vpack.c.bf16 %v1334_v62, %v1333_v63  ;;  %2755 = vmatmul.mubr.bf16.gmra.mrb[24].mxu1 %v4326_v57  ;;  %2626 = vmatprep.mubr.bf16.mxu0 %v4327_v58  ;;  %v4343_v57 = vld [vmem:[%s6419_s2 + $0x3c8] ss:$44 sps:$4 sm:$0xff]   ;;  %v4345_v60 = vld [vmem:[%s6419_s2 + $0x424] ss:$44 sps:$4 sm:$0xff]  }
 0x139   :  { %v811_v5 = vpop.permute.xlu1 %810  ;;  %v806_v6 = vpop.permute.xlu0 %805  ;;  %2762 = vmatprep.mubr.bf16.mxu1 %v4329_v61  ;;  %v4347_v63 = vld [vmem:[%s6419_s2 + $0x37c] ss:$44 sps:$4 sm:$0xff]  }
 0x13a   :  { %v1322_v7 = vmul.f32 %v811_v5, %v104_v0  ;;  %v1321_v8 = vmul.f32 %v806_v6, %v103_v1  ;;  %1060 = vperm.xlu1 %4278, %v328_v2   ;;  %1055 = vperm.xlu0 %4277, %v327_v3   ;;  %v136_v2 = vld [vmem:[%s6420_s0 + $0x3c8] sm:$0xff]  ;;  %v135_v3 = vld [vmem:[%s6420_s0 + $0x3c0] sm:$0xff]  ;;  %v331_v5 = vld [vmem:[%s6418_s1 + $0x470] sm:$0xff] }
 0x13b   :  { %3971 = vmatpush3.bf16.msra.mxu1 %v1457_v4  ;;  %v332_v4 = vld [vmem:[%s6418_s1 + $0x478] sm:$0xff] }
 0x13c   :  { %v1451_v14 = vpack.c.bf16 %v1322_v7, %v1321_v8 }
 0x13d   :  { %v731_v17 = vpop.permute.xlu1 %730  ;;  %v726_v18 = vpop.permute.xlu0 %725 }
 0x13e   :  { %v1306_v20 = vmul.f32 %v731_v17, %v88_v9  ;;  %v1305_v21 = vmul.f32 %v726_v18, %v87_v10  ;;  %1200 = vperm.xlu1 %4278, %v356_v11   ;;  %1195 = vperm.xlu0 %4277, %v355_v12   ;;  %v120_v11 = vld [vmem:[%s6420_s0 + $0x348] sm:$0xff]  ;;  %v119_v12 = vld [vmem:[%s6420_s0 + $0x340] sm:$0xff] }
 0x13f   :  { %3868 = vmatprep.subr.bf16.mxu0 %v1451_v14  ;;  %2627 = vmatmul.mubr.bf16.gmra.mrb[36].mxu0 %v4331_v13  ;;  %v360_v13 = vld [vmem:[%s6418_s1 + $0x558] sm:$0xff]  ;;  %v359_v14 = vld [vmem:[%s6418_s1 + $0x550] sm:$0xff] }
 0x140   :  { %v1443_v26 = vpack.c.bf16 %v1306_v20, %v1305_v21  ;;  %2763 = vmatmul.mubr.bf16.gmra.mrb[28].mxu1 %v4332_v15  ;;  %2634 = vmatprep.mubr.bf16.mxu0 %v4333_v16  ;;  %v4349_v15 = vld [vmem:[%s6419_s2 + $0x420] ss:$44 sps:$4 sm:$0xff]   ;;  %v4350_v17 = vld [vmem:[%s6419_s2 + $0x378] ss:$44 sps:$4 sm:$0xff]   ;;  %v4351_v18 = vld [vmem:[%s6419_s2 + $0x47c] ss:$44 sps:$4 sm:$0xff]  }
 0x141   :  { %v961_v27 = vpop.permute.xlu1 %960  ;;  %v956_v28 = vpop.permute.xlu0 %955  ;;  %2770 = vmatprep.mubr.bf16.mxu1 %v4335_v19  ;;  %v4353_v21 = vld [vmem:[%s6419_s2 + $0x3d4] ss:$44 sps:$4 sm:$0xff]  }
 0x142   :  { %v1352_v29 = vmul.f32 %v961_v27, %v134_v22  ;;  %v1351_v30 = vmul.f32 %v956_v28, %v133_v23  ;;  %1150 = vperm.xlu1 %4278, %v346_v24   ;;  %1145 = vperm.xlu0 %4277, %v345_v25   ;;  %v108_v24 = vld [vmem:[%s6420_s0 + $0x2e8] sm:$0xff]  ;;  %v107_v25 = vld [vmem:[%s6420_s0 + $0x2e0] sm:$0xff] }
 0x143   :  { %3869 = vmatpush3.bf16.msra.mxu0 %v1443_v26  ;;  %v362_v26 = vld [vmem:[%s6418_s1 + $0x568] sm:$0xff]  ;;  %v361_v27 = vld [vmem:[%s6418_s1 + $0x560] sm:$0xff] }
 0x144   :  { %v1466_v36 = vpack.c.bf16 %v1352_v29, %v1351_v30 }
 0x145   :  { %v881_v39 = vpop.permute.xlu1 %880  ;;  %v876_v40 = vpop.permute.xlu0 %875 }
 0x146   :  { %v1336_v42 = vmul.f32 %v881_v39, %v118_v31  ;;  %v1335_v43 = vmul.f32 %v876_v40, %v117_v32  ;;  %1070 = vperm.xlu1 %4278, %v330_v33   ;;  %1065 = vperm.xlu0 %4277, %v329_v34   ;;  %v1662_v31 = vld [vmem:[%s6419_s2 + $0x4d0] sm:$0xff]  ;;  %v92_v34 = vld [vmem:[%s6420_s0 + $0x268] sm:$0xff] }
 0x147   :  { %3972 = vmatprep.subr.bf16.mxu1 %v1466_v36  ;;  %2635 = vmatmul.mubr.bf16.gmra.mrb[40].mxu0 %v4337_v35  ;;  %v91_v35 = vld [vmem:[%s6420_s0 + $0x260] sm:$0xff]  ;;  %v3623_v39 = vcombine.high %v1662_v31, %v1662_v31 }
 0x148   :  { %v1458_v48 = vpack.c.bf16 %v1336_v42, %v1335_v43  ;;  %2771 = vmatmul.mubr.bf16.gmra.mrb[32].mxu1 %v4338_v37  ;;  %2642 = vmatprep.mubr.bf16.mxu0 %v4339_v38  ;;  %v4355_v36 = vld [vmem:[%s6419_s2 + $0x478] ss:$44 sps:$4 sm:$0xff]   ;;  %v4356_v38 = vld [vmem:[%s6419_s2 + $0x3d0] ss:$44 sps:$4 sm:$0xff]  }
 0x149   :  { %v821_v49 = vpop.permute.xlu1 %820  ;;  %v816_v50 = vpop.permute.xlu0 %815  ;;  %2778 = vmatprep.mubr.bf16.mxu1 %v4341_v41  ;;  %v4358_v42 = vld [vmem:[%s6419_s2 + $0x42c] ss:$44 sps:$4 sm:$0xff]  }
 0x14a   :  { %v1324_v51 = vmul.f32 %v821_v49, %v106_v44  ;;  %v1323_v52 = vmul.f32 %v816_v50, %v105_v45  ;;  %1210 = vperm.xlu1 %4278, %v358_v46   ;;  %1205 = vperm.xlu0 %4277, %v357_v47   ;;  %v138_v45 = vld [vmem:[%s6420_s0 + $0x3d8] sm:$0xff]  ;;  %v137_v46 = vld [vmem:[%s6420_s0 + $0x3d0] sm:$0xff] }
 0x14b   :  { %3973 = vmatpush3.bf16.msra.mxu1 %v1458_v48 }
 0x14c   :  { %v1452_v58 = vpack.c.bf16 %v1324_v51, %v1323_v52  ;;  %v122_v52 = vld [vmem:[%s6420_s0 + $0x358] sm:$0xff] }
 0x14d   :  { %v741_v61 = vpop.permute.xlu1 %740  ;;  %v736_v62 = vpop.permute.xlu0 %735 }
 0x14e   :  { %v1308_v0 = vmul.f32 %v741_v61, %v90_v53  ;;  %v1307_v1 = vmul.f32 %v736_v62, %v89_v54  ;;  %1160 = vperm.xlu1 %4278, %v348_v55   ;;  %1155 = vperm.xlu0 %4277, %v347_v56   ;;  %v121_v53 = vld [vmem:[%s6420_s0 + $0x350] sm:$0xff]  ;;  %v3622_v54 = vcombine.low %v1662_v31, %v1662_v31  ;;  %v4377_v31 = vld [vmem:[%s6419_s2 + $0x1c] ss:$44 sps:$4 sm:$0xff]  }
 0x14f   :  { %3870 = vmatprep.subr.bf16.mxu0 %v1452_v58  ;;  %2643 = vmatmul.mubr.bf16.gmra.mrb[44].mxu0 %v4343_v57  ;;  %v4361_v56 = vld [vmem:[%s6419_s2 + $0x428] ss:$44 sps:$4 sm:$0xff]  }
 0x150   :  { %v1444_v6 = vpack.c.bf16 %v1308_v0, %v1307_v1  ;;  %2779 = vmatmul.mubr.bf16.gmra.mrb[36].mxu1 %v4344_v59  ;;  %2650 = vmatprep.mubr.bf16.mxu0 %v4345_v60  ;;  %v4366_v57 = vld [vmem:[%s6419_s2 + $0x14] ss:$44 sps:$4 sm:$0xff]   ;;  %v4362_v60 = vld [vmem:[%s6419_s2 + $0x484] ss:$44 sps:$4 sm:$0xff]  }
 0x151   :  { %v971_v7 = vpop.permute.xlu1 %970  ;;  %v966_v8 = vpop.permute.xlu0 %965  ;;  %2786 = vmatprep.mubr.bf16.mxu1 %v4347_v63  ;;  %v110_v63 = vld [vmem:[%s6420_s0 + $0x2f8] sm:$0xff]  ;;  %v109_v0 = vld [vmem:[%s6420_s0 + $0x2f0] sm:$0xff] }
 0x152   :  { %v1354_v9 = vmul.f32 %v971_v7, %v136_v2  ;;  %v1353_v10 = vmul.f32 %v966_v8, %v135_v3  ;;  %1080 = vperm.xlu1 %4278, %v332_v4   ;;  %1075 = vperm.xlu0 %4277, %v331_v5   ;;  %v94_v7 = vld [vmem:[%s6420_s0 + $0x278] sm:$0xff]  ;;  %v93_v8 = vld [vmem:[%s6420_s0 + $0x270] sm:$0xff] }
 0x153   :  { %3871 = vmatpush3.bf16.msra.mxu0 %v1444_v6  ;;  %v1663_v6 = vld [vmem:[%s6419_s2 + $0x4d8] sm:$0xff] }
 0x154   :  { %v1467_v16 = vpack.c.bf16 %v1354_v9, %v1353_v10  ;;  %v4367_v10 = vld [vmem:[%s6419_s2 + $0x480] ss:$44 sps:$4 sm:$0xff]  }
 0x155   :  { %v891_v19 = vpop.permute.xlu1 %890  ;;  %v886_v20 = vpop.permute.xlu0 %885 }
 0x156   :  { %v1338_v22 = vmul.f32 %v891_v19, %v120_v11  ;;  %v1337_v23 = vmul.f32 %v886_v20, %v119_v12  ;;  %1220 = vperm.xlu1 %4278, %v360_v13   ;;  %1215 = vperm.xlu0 %4277, %v359_v14   ;;  %v3625_v13 = vcombine.high %v1663_v6, %v1663_v6 }
 0x157   :  { %3974 = vmatprep.subr.bf16.mxu1 %v1467_v16  ;;  %2651 = vmatmul.mubr.bf16.gmra.mrb[48].mxu0 %v4349_v15  ;;  %v140_v16 = vld [vmem:[%s6420_s0 + $0x3e8] sm:$0xff] }
 0x158   :  { %v1459_v28 = vpack.c.bf16 %v1338_v22, %v1337_v23  ;;  %2787 = vmatmul.mubr.bf16.gmra.mrb[40].mxu1 %v4350_v17  ;;  %2658 = vmatprep.mubr.bf16.mxu0 %v4351_v18  ;;  %v139_v17 = vld [vmem:[%s6420_s0 + $0x3e0] sm:$0xff] }
 0x159   :  { %v831_v29 = vpop.permute.xlu1 %830  ;;  %v826_v30 = vpop.permute.xlu0 %825  ;;  %2794 = vmatprep.mubr.bf16.mxu1 %v4353_v21  ;;  %v4364_v21 = vld [vmem:[%s6419_s2 + $0x10] ss:$44 sps:$4 sm:$0xff]  }
 0x15a   :  { %v1326_v32 = vmul.f32 %v831_v29, %v108_v24  ;;  %v1325_v33 = vmul.f32 %v826_v30, %v107_v25  ;;  %1230 = vperm.xlu1 %4278, %v362_v26   ;;  %1225 = vperm.xlu0 %4277, %v361_v27   ;;  %v4369_v24 = vld [vmem:[%s6419_s2 + $0x6c] ss:$44 sps:$4 sm:$0xff]   ;;  %v123_v26 = vld [vmem:[%s6420_s0 + $0x360] sm:$0xff] }
 0x15b   :  { %3975 = vmatpush3.bf16.msra.mxu1 %v1459_v28  ;;  %v124_v25 = vld [vmem:[%s6420_s0 + $0x368] sm:$0xff]  ;;  %v3624_v28 = vcombine.low %v1663_v6, %v1663_v6  ;;  %v161_v6 = vld [vmem:[%s6420_s0 + $0x490] sm:$0xff] }
 0x15c   :  { %v1453_v37 = vpack.c.bf16 %v1326_v32, %v1325_v33 }
 0x15d   :  { %v751_v40 = vpop.permute.xlu1 %750  ;;  %v746_v41 = vpop.permute.xlu0 %745 }
 0x15e   :  { %v1310_v43 = vmul.f32 %v751_v40, %v92_v34  ;;  %v1309_v44 = vmul.f32 %v746_v41, %v91_v35  ;;  %3872 = vmatprep.subr.bf16.mxu0 %v1453_v37  ;;  %v142_v34 = vld [vmem:[%s6420_s0 + $0x3f8] sm:$0xff]  ;;  %v141_v35 = vld [vmem:[%s6420_s0 + $0x3f0] sm:$0xff] }
 0x15f   :  { %2659 = vmatmul.mubr.bf16.gmra.mrb[52].mxu0 %v4355_v36 }
 0x160   :  { %v1445_v47 = vpack.c.bf16 %v1310_v43, %v1309_v44  ;;  %2795 = vmatmul.mubr.bf16.gmra.mrb[44].mxu1 %v4356_v38  ;;  %2666 = vmatprep.mubr.bf16.mxu0 %v3623_v39  ;;  %v4372_v39 = vld [vmem:[%s6419_s2 + $0x68] ss:$44 sps:$4 sm:$0xff]   ;;  %v126_v43 = vld [vmem:[%s6420_s0 + $0x378] sm:$0xff] }
 0x161   :  { %v981_v48 = vpop.permute.xlu1 %980  ;;  %v976_v49 = vpop.permute.xlu0 %975  ;;  %2802 = vmatprep.mubr.bf16.mxu1 %v4358_v42  ;;  %v4373_v42 = vld [vmem:[%s6419_s2 + $0xc4] ss:$44 sps:$4 sm:$0xff]  }
 0x162   :  { %v1356_v50 = vmul.f32 %v981_v48, %v138_v45  ;;  %v1355_v51 = vmul.f32 %v976_v49, %v137_v46  ;;  %3873 = vmatpush3.bf16.msra.mxu0 %v1445_v47  ;;  %v125_v44 = vld [vmem:[%s6420_s0 + $0x370] sm:$0xff] }
 0x164   :  { %v1468_v55 = vpack.c.bf16 %v1356_v50, %v1355_v51  ;;  %v160_v50 = vld [vmem:[%s6420_s0 + $0x488] sm:$0xff]  ;;  %v159_v51 = vld [vmem:[%s6420_s0 + $0x480] sm:$0xff] }
 0x165   :  { %v901_v58 = vpop.permute.xlu1 %900  ;;  %v896_v59 = vpop.permute.xlu0 %895 }
 0x166   :  { %v1340_v61 = vmul.f32 %v901_v58, %v122_v52  ;;  %v1339_v62 = vmul.f32 %v896_v59, %v121_v53  ;;  %3976 = vmatprep.subr.bf16.mxu1 %v1468_v55  ;;  %v4375_v55 = vld [vmem:[%s6419_s2 + $0x18] ss:$44 sps:$4 sm:$0xff]   ;;  %v4379_v59 = vld [vmem:[%s6419_s2 + $0x11c] ss:$44 sps:$4 sm:$0xff]  }
 0x167   :  { %2667 = vmatmul.mubr.bf16.gmra.mrb[56].mxu0 %v3622_v54 }
 0x168   :  { %v1460_v1 = vpack.c.bf16 %v1340_v61, %v1339_v62  ;;  %2803 = vmatmul.mubr.bf16.gmra.mrb[48].mxu1 %v4361_v56  ;;  %2858 = vmatprep.mubr.bf16.mxu0 %v4366_v57  ;;  %v4378_v56 = vld [vmem:[%s6419_s2 + $0xc0] ss:$44 sps:$4 sm:$0xff]  }
 0x169   :  { %v841_v2 = vpop.permute.xlu1 %840  ;;  %v836_v3 = vpop.permute.xlu0 %835  ;;  %2810 = vmatprep.mubr.bf16.mxu1 %v4362_v60  ;;  %v144_v60 = vld [vmem:[%s6420_s0 + $0x408] sm:$0xff]  ;;  %v143_v61 = vld [vmem:[%s6420_s0 + $0x400] sm:$0xff] }
 0x16a   :  { %v1328_v4 = vmul.f32 %v841_v2, %v110_v63  ;;  %v1327_v5 = vmul.f32 %v836_v3, %v109_v0  ;;  %3977 = vmatpush3.bf16.msra.mxu1 %v1460_v1  ;;  %v4381_v62 = vld [vmem:[%s6419_s2 + $0x74] ss:$44 sps:$4 sm:$0xff]   ;;  %v4515_v63 = vmov 0.0  }
 0x16c   :  { %v1454_v9 = vpack.c.bf16 %v1328_v4, %v1327_v5  ;;  %v162_v5 = vld [vmem:[%s6420_s0 + $0x498] sm:$0xff] }
 0x16d   :  { %v761_v11 = vpop.permute.xlu1 %760  ;;  %v756_v12 = vpop.permute.xlu0 %755 }
 0x16e   :  { %v1312_v14 = vmul.f32 %v761_v11, %v94_v7  ;;  %v1311_v15 = vmul.f32 %v756_v12, %v93_v8  ;;  %3874 = vmatprep.subr.bf16.mxu0 %v1454_v9  ;;  %v4384_v11 = vld [vmem:[%s6419_s2 + $0x70] ss:$44 sps:$4 sm:$0xff]  }
 0x170   :  { %v1446_v18 = vpack.c.bf16 %v1312_v14, %v1311_v15  ;;  %2811 = vmatmul.mubr.bf16.gmra.mrb[52].mxu1 %v4367_v10  ;;  %v4383_v10 = vld [vmem:[%s6419_s2 + $0x118] ss:$44 sps:$4 sm:$0xff]   ;;  %v4385_v14 = vld [vmem:[%s6419_s2 + $0x174] ss:$44 sps:$4 sm:$0xff]  }
 0x171   :  { %v991_v19 = vpop.permute.xlu1 %990  ;;  %v986_v20 = vpop.permute.xlu0 %985  ;;  %2818 = vmatprep.mubr.bf16.mxu1 %v3625_v13  ;;  %v146_v15 = vld [vmem:[%s6420_s0 + $0x418] sm:$0xff] }
 0x172   :  { %v1358_v22 = vmul.f32 %v991_v19, %v140_v16  ;;  %v1357_v23 = vmul.f32 %v986_v20, %v139_v17  ;;  %3875 = vmatpush3.bf16.msra.mxu0 %v1446_v18  ;;  %v145_v16 = vld [vmem:[%s6420_s0 + $0x410] sm:$0xff]  ;;  %v4387_v17 = vld [vmem:[%s6419_s2 + $0xcc] ss:$44 sps:$4 sm:$0xff]  }
 0x174   :  { %v1469_v27 = vpack.c.bf16 %v1358_v22, %v1357_v23  ;;  %v164_v23 = vld [vmem:[%s6420_s0 + $0x4a8] sm:$0xff] }
 0x175   :  { %v911_v29 = vpop.permute.xlu1 %910  ;;  %v906_v30 = vpop.permute.xlu0 %905  ;;  %2859 = vmatmul.mubr.bf16.vlgmr.msra.gmra.mrb[60].mxu0 %v4364_v21 }
 0x176   :  { %v1342_v32 = vmul.f32 %v911_v29, %v124_v25  ;;  %v1341_v33 = vmul.f32 %v906_v30, %v123_v26  ;;  %3978 = vmatprep.subr.bf16.mxu1 %v1469_v27  ;;  %2866 = vmatprep.mubr.bf16.mxu0 %v4369_v24  ;;  %v163_v24 = vld [vmem:[%s6420_s0 + $0x4a0] sm:$0xff]  ;;  %v4390_v29 = vld [vmem:[%s6419_s2 + $0xc8] ss:$44 sps:$4 sm:$0xff]  }
 0x178   :  { %v1461_v36 = vpack.c.bf16 %v1342_v32, %v1341_v33  ;;  %2819 = vmatmul.mubr.bf16.gmra.mrb[56].mxu1 %v3624_v28  ;;  %v4389_v28 = vld [vmem:[%s6419_s2 + $0x170] ss:$44 sps:$4 sm:$0xff]   ;;  %v4391_v32 = vld [vmem:[%s6419_s2 + $0x1cc] ss:$44 sps:$4 sm:$0xff]  }
 0x179   :  { %v1001_v37 = vpop.permute.xlu1 %1000  ;;  %v996_v38 = vpop.permute.xlu0 %995  ;;  %3010 = vmatprep.mubr.bf16.mxu1 %v4377_v31  ;;  %v148_v33 = vld [vmem:[%s6420_s0 + $0x428] sm:$0xff] }
 0x17a   :  { %v1360_v40 = vmul.f32 %v1001_v37, %v142_v34  ;;  %v1359_v41 = vmul.f32 %v996_v38, %v141_v35  ;;  %3979 = vmatpush3.bf16.msra.mxu1 %v1461_v36  ;;  %v147_v34 = vld [vmem:[%s6420_s0 + $0x420] sm:$0xff] }
 0x17b   :  { %v4393_v35 = vld [vmem:[%s6419_s2 + $0x124] ss:$44 sps:$4 sm:$0xff]  }
 0x17c   :  { %v1470_v45 = vpack.c.bf16 %v1360_v40, %v1359_v41  ;;  %v176_v41 = vld [vmem:[%s6420_s0 + $0x508] sm:$0xff] }
 0x17d   :  { %v921_v46 = vpop.permute.xlu1 %920  ;;  %v916_v47 = vpop.permute.xlu0 %915  ;;  %2867 = vmatmul.mubr.bf16.gmra.mrb[64].mxu0 %v4372_v39 }
 0x17e   :  { %v1344_v48 = vmul.f32 %v921_v46, %v126_v43  ;;  %v1343_v49 = vmul.f32 %v916_v47, %v125_v44  ;;  %3980 = vmatprep.subr.bf16.mxu1 %v1470_v45  ;;  %2874 = vmatprep.mubr.bf16.mxu0 %v4373_v42  ;;  %v175_v42 = vld [vmem:[%s6420_s0 + $0x500] sm:$0xff]  ;;  %v4395_v46 = vld [vmem:[%s6419_s2 + $0x1c8] ss:$44 sps:$4 sm:$0xff]  }
 0x17f   :  { %v4396_v47 = vld [vmem:[%s6419_s2 + $0x120] ss:$44 sps:$4 sm:$0xff]  }
 0x180   :  { %v1462_v52 = vpack.c.bf16 %v1344_v48, %v1343_v49 }
 0x181   :  { %v1091_v53 = vpop.permute.xlu1 %1090  ;;  %v1086_v54 = vpop.permute.xlu0 %1085 }
 0x182   :  { %v1378_v57 = vmul.f32 %v1091_v53, %v160_v50  ;;  %v1377_v58 = vmul.f32 %v1086_v54, %v159_v51  ;;  %3981 = vmatpush3.bf16.msra.mxu1 %v1462_v52  ;;  %v4397_v50 = vld [vmem:[%s6419_s2 + $0x224] ss:$44 sps:$4 sm:$0xff]   ;;  %v166_v51 = vld [vmem:[%s6420_s0 + $0x4b8] sm:$0xff] }
 0x183   :  { %4200 = vmatprep.subr.bf16.mxu1 %v4515_v63  ;;  %v165_v52 = vld [vmem:[%s6420_s0 + $0x4b0] sm:$0xff]  ;;  %v4399_v53 = vld [vmem:[%s6419_s2 + $0x17c] ss:$44 sps:$4 sm:$0xff]  }
 0x184   :  { %v1479_v0 = vpack.c.bf16 %v1378_v57, %v1377_v58 }
 0x185   :  { %v1011_v1 = vpop.permute.xlu1 %1010  ;;  %v1006_v2 = vpop.permute.xlu0 %1005  ;;  %2875 = vmatmul.mubr.bf16.gmra.mrb[68].mxu0 %v4378_v56  ;;  %3011 = vmatmul.mubr.bf16.vlgmr.msra.gmra.mrb[60].mxu1 %v4375_v55 }
 0x186   :  { %v1362_v3 = vmul.f32 %v1011_v1, %v144_v60  ;;  %v1361_v4 = vmul.f32 %v1006_v2, %v143_v61  ;;  %4072 = vmatprep.subr.bf16.mxu0 %v1479_v0  ;;  %2882 = vmatprep.mubr.bf16.mxu0 %v4379_v59  ;;  %v150_v59 = vld [vmem:[%s6420_s0 + $0x438] sm:$0xff]  ;;  %v149_v60 = vld [vmem:[%s6420_s0 + $0x430] sm:$0xff]  ;;  %v4401_v1 = vld [vmem:[%s6419_s2 + $0x220] ss:$44 sps:$4 sm:$0xff]  }
 0x187   :  { %3018 = vmatprep.mubr.bf16.mxu1 %v4381_v62  ;;  %v4402_v2 = vld [vmem:[%s6419_s2 + $0x178] ss:$44 sps:$4 sm:$0xff]  }
 0x188   :  { %v1471_v7 = vpack.c.bf16 %v1362_v3, %v1361_v4 }
 0x189   :  { %v1101_v8 = vpop.permute.xlu1 %1100  ;;  %v1096_v9 = vpop.permute.xlu0 %1095 }
 0x18a   :  { %v1380_v12 = vmul.f32 %v1101_v8, %v162_v5  ;;  %v1379_v13 = vmul.f32 %v1096_v9, %v161_v6  ;;  %4073 = vmatpush3.bf16.msra.mxu0 %v1471_v7  ;;  %v4403_v5 = vld [vmem:[%s6419_s2 + $0x27c] ss:$44 sps:$4 sm:$0xff]   ;;  %v177_v7 = vld [vmem:[%s6420_s0 + $0x510] sm:$0xff] }
 0x18b   :  { %v178_v6 = vld [vmem:[%s6420_s0 + $0x518] sm:$0xff]  ;;  %v4405_v8 = vld [vmem:[%s6419_s2 + $0x1d4] ss:$44 sps:$4 sm:$0xff]  }
 0x18c   :  { %v1480_v18 = vpack.c.bf16 %v1380_v12, %v1379_v13 }
 0x18d   :  { %v1021_v19 = vpop.permute.xlu1 %1020  ;;  %v1016_v20 = vpop.permute.xlu0 %1015  ;;  %2883 = vmatmul.mubr.bf16.gmra.mrb[72].mxu0 %v4383_v10  ;;  %3019 = vmatmul.mubr.bf16.gmra.mrb[64].mxu1 %v4384_v11 }
 0x18e   :  { %v1364_v21 = vmul.f32 %v1021_v19, %v146_v15  ;;  %v1363_v22 = vmul.f32 %v1016_v20, %v145_v16  ;;  %4074 = vmatprep.subr.bf16.mxu0 %v1480_v18  ;;  %2890 = vmatprep.mubr.bf16.mxu0 %v4385_v14  ;;  %v168_v14 = vld [vmem:[%s6420_s0 + $0x4c8] sm:$0xff]  ;;  %v167_v15 = vld [vmem:[%s6420_s0 + $0x4c0] sm:$0xff]  ;;  %v4408_v20 = vld [vmem:[%s6419_s2 + $0x1d0] ss:$44 sps:$4 sm:$0xff]  }
 0x18f   :  { %3026 = vmatprep.mubr.bf16.mxu1 %v4387_v17  ;;  %v4407_v19 = vld [vmem:[%s6419_s2 + $0x278] ss:$44 sps:$4 sm:$0xff]  }
 0x190   :  { %v1472_v25 = vpack.c.bf16 %v1364_v21, %v1363_v22 }
 0x191   :  { %v1111_v26 = vpop.permute.xlu1 %1110  ;;  %v1106_v27 = vpop.permute.xlu0 %1105 }
 0x192   :  { %v1382_v30 = vmul.f32 %v1111_v26, %v164_v23  ;;  %v1381_v31 = vmul.f32 %v1106_v27, %v163_v24  ;;  %4075 = vmatpush3.bf16.msra.mxu0 %v1472_v25  ;;  %v4409_v23 = vld [vmem:[%s6419_s2 + $0x2d4] ss:$44 sps:$4 sm:$0xff]   ;;  %v152_v24 = vld [vmem:[%s6420_s0 + $0x448] sm:$0xff] }
 0x193   :  { %v151_v25 = vld [vmem:[%s6420_s0 + $0x440] sm:$0xff]  ;;  %v4411_v26 = vld [vmem:[%s6419_s2 + $0x22c] ss:$44 sps:$4 sm:$0xff]  }
 0x194   :  { %v1481_v36 = vpack.c.bf16 %v1382_v30, %v1381_v31 }
 0x195   :  { %v1031_v37 = vpop.permute.xlu1 %1030  ;;  %v1026_v38 = vpop.permute.xlu0 %1025  ;;  %2891 = vmatmul.mubr.bf16.gmra.mrb[76].mxu0 %v4389_v28  ;;  %3027 = vmatmul.mubr.bf16.gmra.mrb[68].mxu1 %v4390_v29 }
 0x196   :  { %v1366_v39 = vmul.f32 %v1031_v37, %v148_v33  ;;  %v1365_v40 = vmul.f32 %v1026_v38, %v147_v34  ;;  %4076 = vmatprep.subr.bf16.mxu0 %v1481_v36  ;;  %2898 = vmatprep.mubr.bf16.mxu0 %v4391_v32  ;;  %v180_v32 = vld [vmem:[%s6420_s0 + $0x528] sm:$0xff]  ;;  %v179_v33 = vld [vmem:[%s6420_s0 + $0x520] sm:$0xff]  ;;  %v4413_v37 = vld [vmem:[%s6419_s2 + $0x2d0] ss:$44 sps:$4 sm:$0xff]  }
 0x197   :  { %3034 = vmatprep.mubr.bf16.mxu1 %v4393_v35  ;;  %v4414_v38 = vld [vmem:[%s6419_s2 + $0x228] ss:$44 sps:$4 sm:$0xff]  }
 0x198   :  { %v1473_v43 = vpack.c.bf16 %v1366_v39, %v1365_v40 }
 0x199   :  { %v1171_v44 = vpop.permute.xlu1 %1170  ;;  %v1166_v45 = vpop.permute.xlu0 %1165 }
 0x19a   :  { %v1394_v48 = vmul.f32 %v1171_v44, %v176_v41  ;;  %v1393_v49 = vmul.f32 %v1166_v45, %v175_v42  ;;  %4077 = vmatpush3.bf16.msra.mxu0 %v1473_v43  ;;  %v4415_v41 = vld [vmem:[%s6419_s2 + $0x32c] ss:$44 sps:$4 sm:$0xff]   ;;  %v169_v43 = vld [vmem:[%s6420_s0 + $0x4d0] sm:$0xff] }
 0x19b   :  { %v170_v42 = vld [vmem:[%s6420_s0 + $0x4d8] sm:$0xff]  ;;  %v4417_v44 = vld [vmem:[%s6419_s2 + $0x284] ss:$44 sps:$4 sm:$0xff]  }
 0x19c   :  { %v1487_v54 = vpack.c.bf16 %v1394_v48, %v1393_v49 }
 0x19d   :  { %v1121_v55 = vpop.permute.xlu1 %1120  ;;  %v1116_v56 = vpop.permute.xlu0 %1115  ;;  %2899 = vmatmul.mubr.bf16.gmra.mrb[80].mxu0 %v4395_v46  ;;  %3035 = vmatmul.mubr.bf16.gmra.mrb[72].mxu1 %v4396_v47 }
 0x19e   :  { %v1384_v57 = vmul.f32 %v1121_v55, %v166_v51  ;;  %v1383_v58 = vmul.f32 %v1116_v56, %v165_v52  ;;  %4201 = vmatpush3.bf16.msra.mxu1 %v1487_v54  ;;  %2906 = vmatprep.mubr.bf16.mxu0 %v4397_v50  ;;  %v154_v50 = vld [vmem:[%s6420_s0 + $0x458] sm:$0xff]  ;;  %v153_v51 = vld [vmem:[%s6420_s0 + $0x450] sm:$0xff]  ;;  %v4420_v56 = vld [vmem:[%s6419_s2 + $0x280] ss:$44 sps:$4 sm:$0xff]  }
 0x19f   :  { %3042 = vmatprep.mubr.bf16.mxu1 %v4399_v53  ;;  %4202 = vmatprep.subr.bf16.mxu1 %v4515_v63  ;;  %v4419_v55 = vld [vmem:[%s6419_s2 + $0x328] ss:$44 sps:$4 sm:$0xff]  }
 0x1a0   :  { %v1482_v61 = vpack.c.bf16 %v1384_v57, %v1383_v58 }
 0x1a1   :  { %v1041_v62 = vpop.permute.xlu1 %1040  ;;  %v1036_v0 = vpop.permute.xlu0 %1035 }
 0x1a2   :  { %v1368_v3 = vmul.f32 %v1041_v62, %v150_v59  ;;  %v1367_v4 = vmul.f32 %v1036_v0, %v149_v60  ;;  %4078 = vmatprep.subr.bf16.mxu0 %v1482_v61  ;;  %v4421_v59 = vld [vmem:[%s6419_s2 + $0x384] ss:$44 sps:$4 sm:$0xff]   ;;  %v182_v60 = vld [vmem:[%s6420_s0 + $0x538] sm:$0xff] }
 0x1a3   :  { %v181_v61 = vld [vmem:[%s6420_s0 + $0x530] sm:$0xff]  ;;  %v4423_v62 = vld [vmem:[%s6419_s2 + $0x2dc] ss:$44 sps:$4 sm:$0xff]  }
 0x1a4   :  { %v1474_v9 = vpack.c.bf16 %v1368_v3, %v1367_v4 }
 0x1a5   :  { %v1181_v10 = vpop.permute.xlu1 %1180  ;;  %v1176_v11 = vpop.permute.xlu0 %1175  ;;  %2907 = vmatmul.mubr.bf16.gmra.mrb[84].mxu0 %v4401_v1  ;;  %3043 = vmatmul.mubr.bf16.gmra.mrb[76].mxu1 %v4402_v2 }
 0x1a6   :  { %v1396_v12 = vmul.f32 %v1181_v10, %v178_v6  ;;  %v1395_v13 = vmul.f32 %v1176_v11, %v177_v7  ;;  %4079 = vmatpush3.bf16.msra.mxu0 %v1474_v9  ;;  %2914 = vmatprep.mubr.bf16.mxu0 %v4403_v5  ;;  %v172_v5 = vld [vmem:[%s6420_s0 + $0x4e8] sm:$0xff]  ;;  %v171_v6 = vld [vmem:[%s6420_s0 + $0x4e0] sm:$0xff] }
 0x1a7   :  { %3050 = vmatprep.mubr.bf16.mxu1 %v4405_v8  ;;  %v4425_v10 = vld [vmem:[%s6419_s2 + $0x380] ss:$44 sps:$4 sm:$0xff]   ;;  %v4426_v11 = vld [vmem:[%s6419_s2 + $0x2d8] ss:$44 sps:$4 sm:$0xff]  }
 0x1a8   :  { %v1488_v16 = vpack.c.bf16 %v1396_v12, %v1395_v13 }
 0x1a9   :  { %v1131_v17 = vpop.permute.xlu1 %1130  ;;  %v1126_v18 = vpop.permute.xlu0 %1125 }
 0x1aa   :  { %v1386_v21 = vmul.f32 %v1131_v17, %v168_v14  ;;  %v1385_v22 = vmul.f32 %v1126_v18, %v167_v15  ;;  %4203 = vmatpush3.bf16.msra.mxu1 %v1488_v16  ;;  %v4427_v14 = vld [vmem:[%s6419_s2 + $0x3dc] ss:$44 sps:$4 sm:$0xff]   ;;  %v155_v16 = vld [vmem:[%s6420_s0 + $0x460] sm:$0xff] }
 0x1ab   :  { %4204 = vmatprep.subr.bf16.mxu1 %v4515_v63  ;;  %v156_v15 = vld [vmem:[%s6420_s0 + $0x468] sm:$0xff]  ;;  %v4429_v17 = vld [vmem:[%s6419_s2 + $0x334] ss:$44 sps:$4 sm:$0xff]  }
 0x1ac   :  { %v1483_v27 = vpack.c.bf16 %v1386_v21, %v1385_v22 }
 0x1ad   :  { %v1051_v28 = vpop.permute.xlu1 %1050  ;;  %v1046_v29 = vpop.permute.xlu0 %1045  ;;  %2915 = vmatmul.mubr.bf16.gmra.mrb[88].mxu0 %v4407_v19  ;;  %3051 = vmatmul.mubr.bf16.gmra.mrb[80].mxu1 %v4408_v20 }
 0x1ae   :  { %v1370_v30 = vmul.f32 %v1051_v28, %v152_v24  ;;  %v1369_v31 = vmul.f32 %v1046_v29, %v151_v25  ;;  %4080 = vmatprep.subr.bf16.mxu0 %v1483_v27  ;;  %2922 = vmatprep.mubr.bf16.mxu0 %v4409_v23  ;;  %v184_v23 = vld [vmem:[%s6420_s0 + $0x548] sm:$0xff]  ;;  %v183_v24 = vld [vmem:[%s6420_s0 + $0x540] sm:$0xff]  ;;  %v4432_v29 = vld [vmem:[%s6419_s2 + $0x330] ss:$44 sps:$4 sm:$0xff]  }
 0x1af   :  { %3058 = vmatprep.mubr.bf16.mxu1 %v4411_v26  ;;  %v4431_v28 = vld [vmem:[%s6419_s2 + $0x3d8] ss:$44 sps:$4 sm:$0xff]  }
 0x1b0   :  { %v1475_v34 = vpack.c.bf16 %v1370_v30, %v1369_v31 }
 0x1b1   :  { %v1191_v35 = vpop.permute.xlu1 %1190  ;;  %v1186_v36 = vpop.permute.xlu0 %1185 }
 0x1b2   :  { %v1398_v39 = vmul.f32 %v1191_v35, %v180_v32  ;;  %v1397_v40 = vmul.f32 %v1186_v36, %v179_v33  ;;  %4081 = vmatpush3.bf16.msra.mxu0 %v1475_v34  ;;  %v4433_v32 = vld [vmem:[%s6419_s2 + $0x434] ss:$44 sps:$4 sm:$0xff]   ;;  %v174_v34 = vld [vmem:[%s6420_s0 + $0x4f8] sm:$0xff] }
 0x1b3   :  { %v173_v35 = vld [vmem:[%s6420_s0 + $0x4f0] sm:$0xff]  ;;  %v4435_v36 = vld [vmem:[%s6419_s2 + $0x38c] ss:$44 sps:$4 sm:$0xff]  }
 0x1b4   :  { %v1489_v45 = vpack.c.bf16 %v1398_v39, %v1397_v40 }
 0x1b5   :  { %v1141_v46 = vpop.permute.xlu1 %1140  ;;  %v1136_v47 = vpop.permute.xlu0 %1135  ;;  %2923 = vmatmul.mubr.bf16.gmra.mrb[92].mxu0 %v4413_v37  ;;  %3059 = vmatmul.mubr.bf16.gmra.mrb[84].mxu1 %v4414_v38 }
 0x1b6   :  { %v1388_v48 = vmul.f32 %v1141_v46, %v170_v42  ;;  %v1387_v49 = vmul.f32 %v1136_v47, %v169_v43  ;;  %4205 = vmatpush3.bf16.msra.mxu1 %v1489_v45  ;;  %2930 = vmatprep.mubr.bf16.mxu0 %v4415_v41  ;;  %v158_v46 = vld [vmem:[%s6420_s0 + $0x478] sm:$0xff]  ;;  %v157_v47 = vld [vmem:[%s6420_s0 + $0x470] sm:$0xff] }
 0x1b7   :  { %3066 = vmatprep.mubr.bf16.mxu1 %v4417_v44  ;;  %4206 = vmatprep.subr.bf16.mxu1 %v4515_v63 }
 0x1b8   :  { %v1484_v52 = vpack.c.bf16 %v1388_v48, %v1387_v49 }
 0x1b9   :  { %v1061_v53 = vpop.permute.xlu1 %1060  ;;  %v1056_v54 = vpop.permute.xlu0 %1055 }
 0x1ba   :  { %v1372_v57 = vmul.f32 %v1061_v53, %v154_v50  ;;  %v1371_v58 = vmul.f32 %v1056_v54, %v153_v51  ;;  %4082 = vmatprep.subr.bf16.mxu0 %v1484_v52  ;;  %v4437_v52 = vld [vmem:[%s6419_s2 + $0x430] ss:$44 sps:$4 sm:$0xff]   ;;  %v4438_v53 = vld [vmem:[%s6419_s2 + $0x388] ss:$44 sps:$4 sm:$0xff]  }
 0x1bc   :  { %v1476_v0 = vpack.c.bf16 %v1372_v57, %v1371_v58  ;;  %v186_v58 = vld [vmem:[%s6420_s0 + $0x558] sm:$0xff] }
 0x1bd   :  { %v1201_v1 = vpop.permute.xlu1 %1200  ;;  %v1196_v2 = vpop.permute.xlu0 %1195  ;;  %2931 = vmatmul.mubr.bf16.gmra.mrb[96].mxu0 %v4419_v55  ;;  %3067 = vmatmul.mubr.bf16.gmra.mrb[88].mxu1 %v4420_v56  ;;  %v4439_v56 = vld [vmem:[%s6419_s2 + $0x48c] ss:$44 sps:$4 sm:$0xff]  }
 0x1be   :  { %v1400_v3 = vmul.f32 %v1201_v1, %v182_v60  ;;  %v1399_v4 = vmul.f32 %v1196_v2, %v181_v61  ;;  %4083 = vmatpush3.bf16.msra.mxu0 %v1476_v0  ;;  %2938 = vmatprep.mubr.bf16.mxu0 %v4421_v59  ;;  %v185_v59 = vld [vmem:[%s6420_s0 + $0x550] sm:$0xff] }
 0x1bf   :  { %3074 = vmatprep.mubr.bf16.mxu1 %v4423_v62  ;;  %v4441_v60 = vld [vmem:[%s6419_s2 + $0x3e4] ss:$44 sps:$4 sm:$0xff]  }
 0x1c0   :  { %v1490_v7 = vpack.c.bf16 %v1400_v3, %v1399_v4 }
 0x1c1   :  { %v1151_v8 = vpop.permute.xlu1 %1150  ;;  %v1146_v9 = vpop.permute.xlu0 %1145 }
 0x1c2   :  { %v1390_v12 = vmul.f32 %v1151_v8, %v172_v5  ;;  %v1389_v13 = vmul.f32 %v1146_v9, %v171_v6  ;;  %4207 = vmatpush3.bf16.msra.mxu1 %v1490_v7  ;;  %v188_v7 = vld [vmem:[%s6420_s0 + $0x568] sm:$0xff]  ;;  %v187_v8 = vld [vmem:[%s6420_s0 + $0x560] sm:$0xff] }
 0x1c3   :  { %4208 = vmatprep.subr.bf16.mxu1 %v4515_v63  ;;  %v1664_v9 = vld [vmem:[%s6419_s2 + $0x4e0] sm:$0xff] }
 0x1c4   :  { %v1485_v18 = vpack.c.bf16 %v1390_v12, %v1389_v13 }
 0x1c5   :  { %v1071_v19 = vpop.permute.xlu1 %1070  ;;  %v1066_v20 = vpop.permute.xlu0 %1065  ;;  %2939 = vmatmul.mubr.bf16.gmra.mrb[100].mxu0 %v4425_v10  ;;  %3075 = vmatmul.mubr.bf16.gmra.mrb[92].mxu1 %v4426_v11 }
 0x1c6   :  { %v1374_v21 = vmul.f32 %v1071_v19, %v156_v15  ;;  %v1373_v22 = vmul.f32 %v1066_v20, %v155_v16  ;;  %4084 = vmatprep.subr.bf16.mxu0 %v1485_v18  ;;  %2946 = vmatprep.mubr.bf16.mxu0 %v4427_v14  ;;  %v4443_v14 = vld [vmem:[%s6419_s2 + $0x488] ss:$44 sps:$4 sm:$0xff]   ;;  %v4444_v15 = vld [vmem:[%s6419_s2 + $0x3e0] ss:$44 sps:$4 sm:$0xff]   ;;  %v3627_v18 = vcombine.high %v1664_v9, %v1664_v9 }
 0x1c7   :  { %3082 = vmatprep.mubr.bf16.mxu1 %v4429_v17  ;;  %v4446_v20 = vld [vmem:[%s6419_s2 + $0x43c] ss:$44 sps:$4 sm:$0xff]  }
 0x1c8   :  { %v1477_v25 = vpack.c.bf16 %v1374_v21, %v1373_v22 }
 0x1c9   :  { %v1211_v26 = vpop.permute.xlu1 %1210  ;;  %v1206_v27 = vpop.permute.xlu0 %1205 }
 0x1ca   :  { %v1402_v30 = vmul.f32 %v1211_v26, %v184_v23  ;;  %v1401_v31 = vmul.f32 %v1206_v27, %v183_v24  ;;  %4085 = vmatpush3.bf16.msra.mxu0 %v1477_v25  ;;  %v3664_v33 = vpop.f32.mrb[0].mxu0 }
 0x1cb   :  { %v3665_v37 = vpop.f32.mrb[1].mxu0 }
 0x1cc   :  { %v1491_v38 = vpack.c.bf16 %v1402_v30, %v1401_v31  ;;  %v5886_v39 = vadd.f32 %v3665_v37, %v3664_v33  ;;  %v3667_v40 = vpop.f32.mrb[2].mxu0  ;;  %v4450_v37 = vld [vmem:[%s6419_s2 + $0x494] ss:$44 sps:$4 sm:$0xff]  }
 0x1cd   :  { %v1161_v41 = vpop.permute.xlu1 %1160  ;;  %v1156_v42 = vpop.permute.xlu0 %1155  ;;  %2947 = vmatmul.mubr.bf16.gmra.mrb[104].mxu0 %v4431_v28  ;;  %3083 = vmatmul.mubr.bf16.gmra.mrb[96].mxu1 %v4432_v29 }
 0x1ce   :  { %v1392_v43 = vmul.f32 %v1161_v41, %v174_v34  ;;  %v1391_v44 = vmul.f32 %v1156_v42, %v173_v35  ;;  %4209 = vmatpush3.bf16.msra.mxu1 %v1491_v38  ;;  %2954 = vmatprep.mubr.bf16.mxu0 %v4433_v32  ;;  %v3668_v45 = vpop.f32.mrb[3].mxu0  ;;  %v3626_v34 = vcombine.low %v1664_v9, %v1664_v9  ;;  %v4449_v35 = vld [vmem:[%s6419_s2 + $0x438] ss:$44 sps:$4 sm:$0xff]  }
 0x1cf   :  { %3090 = vmatprep.mubr.bf16.mxu1 %v4435_v36  ;;  %4210 = vmatprep.subr.bf16.mxu1 %v4515_v63  ;;  %v5895_v48 = vadd.f32 %v3668_v45, %v3667_v40  ;;  %v4454_v38 = vld [vmem:[%s6419_s2 + $0x24] ss:$44 sps:$4 sm:$0xff]  }
 0x1d0   :  { %v1486_v49 = vpack.c.bf16 %v1392_v43, %v1391_v44  ;;  %v4460_v9 = vld [vmem:[%s6419_s2 + $0x78] ss:$44 sps:$4 sm:$0xff]  }
 0x1d1   :  { %v1081_v50 = vpop.permute.xlu1 %1080  ;;  %v1076_v51 = vpop.permute.xlu0 %1075 }
 0x1d2   :  { %v1376_v54 = vmul.f32 %v1081_v50, %v158_v46  ;;  %v1375_v55 = vmul.f32 %v1076_v51, %v157_v47  ;;  %4086 = vmatprep.subr.bf16.mxu0 %v1486_v49  ;;  %v3670_v57 = vpop.f32.mrb[4].mxu0  ;;  %v1665_v50 = vld [vmem:[%s6419_s2 + $0x4e8] sm:$0xff] }
 0x1d3   :  { %v3671_v61 = vpop.f32.mrb[5].mxu0 }
 0x1d4   :  { %v1478_v62 = vpack.c.bf16 %v1376_v54, %v1375_v55  ;;  %v5915_v0 = vadd.f32 %v3671_v61, %v3670_v57  ;;  %v3673_v1 = vpop.f32.mrb[6].mxu0  ;;  %v4455_v54 = vld [vmem:[%s6419_s2 + $0x490] ss:$44 sps:$4 sm:$0xff]  }
 0x1d5   :  { %v1221_v2 = vpop.permute.xlu1 %1220  ;;  %v1216_v3 = vpop.permute.xlu0 %1215  ;;  %2955 = vmatmul.mubr.bf16.gmra.mrb[108].mxu0 %v4437_v52  ;;  %3091 = vmatmul.mubr.bf16.gmra.mrb[100].mxu1 %v4438_v53  ;;  %v4452_v53 = vld [vmem:[%s6419_s2 + $0x20] ss:$44 sps:$4 sm:$0xff]   ;;  %v4457_v57 = vld [vmem:[%s6419_s2 + $0x7c] ss:$44 sps:$4 sm:$0xff]  }
 0x1d6   :  { %v1404_v4 = vmul.f32 %v1221_v2, %v186_v58  ;;  %v1403_v5 = vmul.f32 %v1216_v3, %v185_v59  ;;  %4087 = vmatpush3.bf16.msra.mxu0 %v1478_v62  ;;  %2962 = vmatprep.mubr.bf16.mxu0 %v4439_v56  ;;  %v3674_v6 = vpop.f32.mrb[7].mxu0  ;;  %v3629_v56 = vcombine.high %v1665_v50, %v1665_v50 }
 0x1d7   :  { %3098 = vmatprep.mubr.bf16.mxu1 %v4441_v60  ;;  %v3675_v10 = vadd.f32 %v3674_v6, %v3673_v1 }
 0x1d8   :  { %v1492_v11 = vpack.c.bf16 %v1404_v4, %v1403_v5 }
 0x1d9   :  { %v1231_v12 = vpop.permute.xlu1 %1230  ;;  %v1226_v13 = vpop.permute.xlu0 %1225 }
 0x1da   :  { %v1406_v16 = vmul.f32 %v1231_v12, %v188_v7  ;;  %v1405_v17 = vmul.f32 %v1226_v13, %v187_v8  ;;  %4211 = vmatpush3.bf16.msra.mxu1 %v1492_v11  ;;  %v3676_v19 = vpop.f32.mrb[8].mxu0  ;;  %v3628_v8 = vcombine.low %v1665_v50, %v1665_v50  ;;  %v4461_v11 = vld [vmem:[%s6419_s2 + $0xd4] ss:$44 sps:$4 sm:$0xff]  }
 0x1db   :  { %4212 = vmatprep.subr.bf16.mxu1 %v4515_v63  ;;  %v3770_v21 = vpop.f32.mrb[0].mxu1  ;;  %v3677_v22 = vpop.f32.mrb[9].mxu0 }
 0x1dc   :  { %v1493_v23 = vpack.c.bf16 %v1406_v16, %v1405_v17  ;;  %v3771_v24 = vpop.f32.mrb[1].mxu1  ;;  %v3678_v25 = vadd.f32 %v3677_v22, %v3676_v19  ;;  %v3679_v26 = vpop.f32.mrb[10].mxu0 }
 0x1dd   :  { %2963 = vmatmul.mubr.bf16.gmra.mrb[112].mxu0 %v4443_v14  ;;  %3099 = vmatmul.mubr.bf16.gmra.mrb[104].mxu1 %v4444_v15  ;;  %v3772_v27 = vadd.f32 %v3771_v24, %v3770_v21  ;;  %v3773_v28 = vpop.f32.mrb[2].mxu1  ;;  %v3680_v29 = vpop.f32.mrb[11].mxu0 }
 0x1de   :  { %4213 = vmatpush3.bf16.msra.mxu1 %v1493_v23  ;;  %2970 = vmatprep.mubr.bf16.mxu0 %v3627_v18  ;;  %v3774_v30 = vpop.f32.mrb[3].mxu1  ;;  %v3681_v31 = vadd.f32 %v3680_v29, %v3679_v26  ;;  %v4464_v26 = vld [vmem:[%s6419_s2 + $0x28] ss:$44 sps:$4 sm:$0xff]  }
 0x1df   :  { %3106 = vmatprep.mubr.bf16.mxu1 %v4446_v20  ;;  %v5937_v32 = vadd.f32 %v3772_v27, %v5886_v39  ;;  %v3775_v33 = vadd.f32 %v3774_v30, %v3773_v28  ;;  %v4465_v28 = vld [vmem:[%s6419_s2 + $0x12c] ss:$44 sps:$4 sm:$0xff]  }
 0x1e1   :  { %v5943_v36 = vadd.f32 %v3775_v33, %v5895_v48 }
 0x1e2   :  { %v3682_v40 = vpop.f32.mrb[12].mxu0 }
 0x1e3   :  { %v3776_v39 = vpop.f32.mrb[4].mxu1  ;;  %v3683_v41 = vpop.f32.mrb[13].mxu0 }
 0x1e4   :  { %v3777_v42 = vpop.f32.mrb[5].mxu1  ;;  %v3684_v43 = vadd.f32 %v3683_v41, %v3682_v40  ;;  %v3685_v44 = vpop.f32.mrb[14].mxu0 }
 0x1e5   :  { %2971 = vmatmul.mubr.bf16.gmra.mrb[116].mxu0 %v3626_v34  ;;  %3107 = vmatmul.mubr.bf16.gmra.mrb[108].mxu1 %v4449_v35  ;;  %v3778_v45 = vadd.f32 %v3777_v42, %v3776_v39  ;;  %v3779_v46 = vpop.f32.mrb[6].mxu1  ;;  %v3686_v47 = vpop.f32.mrb[15].mxu0 }
 0x1e6   :  { %3114 = vmatprep.mubr.bf16.mxu1 %v4450_v37  ;;  %3162 = vmatprep.mubr.bf16.mxu0 %v4454_v38  ;;  %v3780_v48 = vpop.f32.mrb[7].mxu1  ;;  %v3687_v49 = vadd.f32 %v3686_v47, %v3685_v44  ;;  %v4467_v44 = vld [vmem:[%s6419_s2 + $0x128] ss:$44 sps:$4 sm:$0xff]   ;;  %v4469_v47 = vld [vmem:[%s6419_s2 + $0x184] ss:$44 sps:$4 sm:$0xff]  }
 0x1e7   :  { %v5955_v51 = vadd.f32 %v3778_v45, %v5915_v0  ;;  %v3781_v52 = vadd.f32 %v3780_v48, %v3779_v46  ;;  %v4468_v45 = vld [vmem:[%s6419_s2 + $0x80] ss:$44 sps:$4 sm:$0xff]  }
 0x1e9   :  { %v5963_v55 = vadd.f32 %v3781_v52, %v3675_v10 }
 0x1ea   :  { %v3688_v58 = vpop.f32.mrb[16].mxu0 }
 0x1eb   :  { %v3782_v59 = vpop.f32.mrb[8].mxu1  ;;  %v3689_v60 = vpop.f32.mrb[17].mxu0 }
 0x1ec   :  { %v3783_v61 = vpop.f32.mrb[9].mxu1  ;;  %v3690_v62 = vadd.f32 %v3689_v60, %v3688_v58  ;;  %v3691_v0 = vpop.f32.mrb[18].mxu0 }
 0x1ed   :  { %3115 = vmatmul.mubr.bf16.gmra.mrb[112].mxu1 %v4455_v54  ;;  %3163 = vmatmul.mubr.bf16.vlgmr.msra.gmra.mrb[120].mxu0 %v4452_v53  ;;  %v3784_v1 = vadd.f32 %v3783_v61, %v3782_v59  ;;  %v3785_v2 = vpop.f32.mrb[10].mxu1  ;;  %v3692_v3 = vpop.f32.mrb[19].mxu0 }
 0x1ee   :  { %3122 = vmatprep.mubr.bf16.mxu1 %v3629_v56  ;;  %3170 = vmatprep.mubr.bf16.mxu0 %v4457_v57  ;;  %v3786_v4 = vpop.f32.mrb[11].mxu1  ;;  %v3693_v5 = vadd.f32 %v3692_v3, %v3691_v0  ;;  %v4471_v0 = vld [vmem:[%s6419_s2 + $0x180] ss:$44 sps:$4 sm:$0xff]   ;;  %v4473_v3 = vld [vmem:[%s6419_s2 + $0x1dc] ss:$44 sps:$4 sm:$0xff]  }
 0x1ef   :  { %v5968_v6 = vadd.f32 %v3784_v1, %v3678_v25  ;;  %v3787_v7 = vadd.f32 %v3786_v4, %v3785_v2  ;;  %v4463_v25 = vld [vmem:[%s6419_s2 + $0xd0] ss:$44 sps:$4 sm:$0xff]   ;;  %v4472_v1 = vld [vmem:[%s6419_s2 + $0xd8] ss:$44 sps:$4 sm:$0xff]  }
 0x1f1   :  { %v5973_v10 = vadd.f32 %v3787_v7, %v3681_v31 }
 0x1f2   :  { %v3694_v12 = vpop.f32.mrb[20].mxu0 }
 0x1f3   :  { %v3788_v13 = vpop.f32.mrb[12].mxu1  ;;  %v3695_v14 = vpop.f32.mrb[21].mxu0 }
 0x1f4   :  { %v3789_v15 = vpop.f32.mrb[13].mxu1  ;;  %v3696_v16 = vadd.f32 %v3695_v14, %v3694_v12  ;;  %v3697_v17 = vpop.f32.mrb[22].mxu0 }
 0x1f5   :  { %3123 = vmatmul.mubr.bf16.gmra.mrb[116].mxu1 %v3628_v8  ;;  %3171 = vmatmul.mubr.bf16.gmra.mrb[124].mxu0 %v4460_v9  ;;  %v3790_v18 = vadd.f32 %v3789_v15, %v3788_v13  ;;  %v3791_v19 = vpop.f32.mrb[14].mxu1  ;;  %v3698_v20 = vpop.f32.mrb[23].mxu0 }
 0x1f6   :  { %3178 = vmatprep.mubr.bf16.mxu0 %v4461_v11  ;;  %4214 = vmatprep.mubr.msk.bf16.mxu1 %vm4516_vm0, %v4515_v63  ;;  %v3792_v21 = vpop.f32.mrb[15].mxu1  ;;  %v3699_v22 = vadd.f32 %v3698_v20, %v3697_v17  ;;  %v4476_v20 = vld [vmem:[%s6419_s2 + $0x130] ss:$44 sps:$4 sm:$0xff]  }
 0x1f7   :  { %v5980_v23 = vadd.f32 %v3790_v18, %v3684_v43  ;;  %v3793_v24 = vadd.f32 %v3792_v21, %v3791_v19  ;;  %v4475_v19 = vld [vmem:[%s6419_s2 + $0x1d8] ss:$44 sps:$4 sm:$0xff]  }
 0x1f9   :  { %v5988_v27 = vadd.f32 %v3793_v24, %v3687_v49 }
 0x1fa   :  { %v3700_v29 = vpop.f32.mrb[24].mxu0 }
 0x1fb   :  { %v3794_v30 = vpop.f32.mrb[16].mxu1  ;;  %v3701_v31 = vpop.f32.mrb[25].mxu0 }
 0x1fc   :  { %v3795_v33 = vpop.f32.mrb[17].mxu1  ;;  %v3702_v34 = vadd.f32 %v3701_v31, %v3700_v29  ;;  %v3703_v35 = vpop.f32.mrb[26].mxu0 }
 0x1fd   :  { %3179 = vmatmul.mubr.bf16.gmra.mrb[128].mxu0 %v4463_v25  ;;  %4215 = vmatmul.mubr.msk.bf16.vlgmr.msra.gmra.mrb[120].mxu1 %vm2476_vm1, %v4464_v26  ;;  %v3796_v37 = vadd.f32 %v3795_v33, %v3794_v30  ;;  %v3797_v38 = vpop.f32.mrb[18].mxu1  ;;  %v3704_v40 = vpop.f32.mrb[27].mxu0 }
 0x1fe   :  { %3186 = vmatprep.mubr.bf16.mxu0 %v4465_v28  ;;  %4218 = vmatprep.mubr.msk.bf16.mxu1 %vm4516_vm0, %v4515_v63  ;;  %v3798_v39 = vpop.f32.mrb[19].mxu1  ;;  %v3705_v41 = vadd.f32 %v3704_v40, %v3703_v35 }
 0x1ff   :  { %v5996_v42 = vadd.f32 %v3796_v37, %v3690_v62  ;;  %v3799_v43 = vadd.f32 %v3798_v39, %v3797_v38  ;;  %v4479_v39 = vld [vmem:[%s6419_s2 + $0x230] ss:$44 sps:$4 sm:$0xff]  }
 0x201   :  { %v6004_v46 = vadd.f32 %v3799_v43, %v3693_v5 }
 0x202   :  { %v3706_v48 = vpop.f32.mrb[28].mxu0 }
 0x203   :  { %v3800_v49 = vpop.f32.mrb[20].mxu1  ;;  %v3707_v50 = vpop.f32.mrb[29].mxu0 }
 0x204   :  { %v3801_v52 = vpop.f32.mrb[21].mxu1  ;;  %v3708_v53 = vadd.f32 %v3707_v50, %v3706_v48  ;;  %v3709_v54 = vpop.f32.mrb[30].mxu0 }
 0x205   :  { %3187 = vmatmul.mubr.bf16.gmra.mrb[132].mxu0 %v4467_v44  ;;  %4219 = vmatmul.mubr.msk.bf16.gmra.mrb[124].mxu1 %vm2476_vm1, %v4468_v45  ;;  %v3802_v56 = vadd.f32 %v3801_v52, %v3800_v49  ;;  %v3803_v57 = vpop.f32.mrb[22].mxu1  ;;  %v3710_v58 = vpop.f32.mrb[31].mxu0  ;;  %v4481_v44 = vld [vmem:[%s6419_s2 + $0x28c] ss:$44 sps:$4 sm:$0xff]  }
 0x206   :  { %3194 = vmatprep.mubr.bf16.mxu0 %v4469_v47  ;;  %4222 = vmatprep.mubr.msk.bf16.mxu1 %vm4516_vm0, %v4515_v63  ;;  %v3804_v59 = vpop.f32.mrb[23].mxu1  ;;  %v3711_v60 = vadd.f32 %v3710_v58, %v3709_v54 }
 0x207   :  { %v6012_v61 = vadd.f32 %v3802_v56, %v3696_v16  ;;  %v3805_v62 = vadd.f32 %v3804_v59, %v3803_v57 }
 0x209   :  { %v6020_v2 = vadd.f32 %v3805_v62, %v3699_v22  ;;  %v4477_v22 = vld [vmem:[%s6419_s2 + $0x234] ss:$44 sps:$4 sm:$0xff]  }
 0x20a   :  { %v3712_v4 = vpop.f32.mrb[32].mxu0  ;;  %v4483_v62 = vld [vmem:[%s6419_s2 + $0x288] ss:$44 sps:$4 sm:$0xff]  }
 0x20b   :  { %v3806_v5 = vpop.f32.mrb[24].mxu1  ;;  %v3713_v7 = vpop.f32.mrb[33].mxu0 }
 0x20c   :  { %v3807_v8 = vpop.f32.mrb[25].mxu1  ;;  %v3714_v9 = vadd.f32 %v3713_v7, %v3712_v4  ;;  %v3715_v11 = vpop.f32.mrb[34].mxu0 }
 0x20d   :  { %3195 = vmatmul.mubr.bf16.gmra.mrb[136].mxu0 %v4471_v0  ;;  %4223 = vmatmul.mubr.msk.bf16.gmra.mrb[128].mxu1 %vm2476_vm1, %v4472_v1  ;;  %v3808_v12 = vadd.f32 %v3807_v8, %v3806_v5  ;;  %v3809_v13 = vpop.f32.mrb[26].mxu1  ;;  %v3716_v14 = vpop.f32.mrb[35].mxu0  ;;  %v4484_v0 = vld [vmem:[%s6419_s2 + $0x1e0] ss:$44 sps:$4 sm:$0xff]  }
 0x20e   :  { %3202 = vmatprep.mubr.bf16.mxu0 %v4473_v3  ;;  %4226 = vmatprep.mubr.msk.bf16.mxu1 %vm4516_vm0, %v4515_v63  ;;  %v3810_v15 = vpop.f32.mrb[27].mxu1  ;;  %v3717_v16 = vadd.f32 %v3716_v14, %v3715_v11  ;;  %v4485_v3 = vld [vmem:[%s6419_s2 + $0x2e4] ss:$44 sps:$4 sm:$0xff]  }
 0x20f   :  { %v6028_v17 = vadd.f32 %v3808_v12, %v3702_v34  ;;  %v3811_v18 = vadd.f32 %v3810_v15, %v3809_v13 }
 0x211   :  { %v6036_v21 = vadd.f32 %v3811_v18, %v3705_v41  ;;  %v4480_v41 = vld [vmem:[%s6419_s2 + $0x188] ss:$44 sps:$4 sm:$0xff]  }
 0x212   :  { %v3718_v24 = vpop.f32.mrb[36].mxu0 }
 0x213   :  { %v3812_v25 = vpop.f32.mrb[28].mxu1  ;;  %v3719_v26 = vpop.f32.mrb[37].mxu0 }
 0x214   :  { %v3813_v28 = vpop.f32.mrb[29].mxu1  ;;  %v3720_v29 = vadd.f32 %v3719_v26, %v3718_v24  ;;  %v3721_v30 = vpop.f32.mrb[38].mxu0 }
 0x215   :  { %3203 = vmatmul.mubr.bf16.gmra.mrb[140].mxu0 %v4475_v19  ;;  %4227 = vmatmul.mubr.msk.bf16.gmra.mrb[132].mxu1 %vm2476_vm1, %v4476_v20  ;;  %v3814_v31 = vadd.f32 %v3813_v28, %v3812_v25  ;;  %v3815_v33 = vpop.f32.mrb[30].mxu1  ;;  %v3722_v34 = vpop.f32.mrb[39].mxu0  ;;  %v4487_v20 = vld [vmem:[%s6419_s2 + $0x2e0] ss:$44 sps:$4 sm:$0xff]   ;;  %v4489_v25 = vld [vmem:[%s6419_s2 + $0x33c] ss:$44 sps:$4 sm:$0xff]  }
 0x216   :  { %3210 = vmatprep.mubr.bf16.mxu0 %v4477_v22  ;;  %4230 = vmatprep.mubr.msk.bf16.mxu1 %vm4516_vm0, %v4515_v63  ;;  %v3816_v35 = vpop.f32.mrb[31].mxu1  ;;  %v3723_v37 = vadd.f32 %v3722_v34, %v3721_v30  ;;  %v4488_v22 = vld [vmem:[%s6419_s2 + $0x238] ss:$44 sps:$4 sm:$0xff]  }
 0x217   :  { %v6044_v38 = vadd.f32 %v3814_v31, %v3708_v53  ;;  %v3817_v40 = vadd.f32 %v3816_v35, %v3815_v33 }
 0x219   :  { %v6052_v43 = vadd.f32 %v3817_v40, %v3711_v60 }
 0x21a   :  { %v3724_v45 = vpop.f32.mrb[40].mxu0 }
 0x21b   :  { %v3818_v47 = vpop.f32.mrb[32].mxu1  ;;  %v3725_v48 = vpop.f32.mrb[41].mxu0 }
 0x21c   :  { %v3819_v49 = vpop.f32.mrb[33].mxu1  ;;  %v3726_v50 = vadd.f32 %v3725_v48, %v3724_v45  ;;  %v3727_v52 = vpop.f32.mrb[42].mxu0  ;;  %v4491_v45 = vld [vmem:[%s6419_s2 + $0x338] ss:$44 sps:$4 sm:$0xff]  }
 0x21d   :  { %3211 = vmatmul.mubr.bf16.gmra.mrb[144].mxu0 %v4479_v39  ;;  %4231 = vmatmul.mubr.msk.bf16.gmra.mrb[136].mxu1 %vm2476_vm1, %v4480_v41  ;;  %v3820_v53 = vadd.f32 %v3819_v49, %v3818_v47  ;;  %v3821_v54 = vpop.f32.mrb[34].mxu1  ;;  %v3728_v56 = vpop.f32.mrb[43].mxu0  ;;  %v4492_v47 = vld [vmem:[%s6419_s2 + $0x290] ss:$44 sps:$4 sm:$0xff]   ;;  %v4493_v49 = vld [vmem:[%s6419_s2 + $0x394] ss:$44 sps:$4 sm:$0xff]  }
 0x21e   :  { %3218 = vmatprep.mubr.bf16.mxu0 %v4481_v44  ;;  %4234 = vmatprep.mubr.msk.bf16.mxu1 %vm4516_vm0, %v4515_v63  ;;  %v3822_v57 = vpop.f32.mrb[35].mxu1  ;;  %v3729_v58 = vadd.f32 %v3728_v56, %v3727_v52 }
 0x21f   :  { %v6060_v59 = vadd.f32 %v3820_v53, %v3714_v9  ;;  %v3823_v60 = vadd.f32 %v3822_v57, %v3821_v54 }
 0x221   :  { %v6068_v1 = vadd.f32 %v3823_v60, %v3717_v16 }
 0x222   :  { %v3730_v4 = vpop.f32.mrb[44].mxu0 }
 0x223   :  { %v3731_v5 = vpop.f32.mrb[45].mxu0  ;;  %v3824_v7 = vpop.f32.mrb[36].mxu1 }
 0x224   :  { %v3732_v8 = vadd.f32 %v3731_v5, %v3730_v4  ;;  %v3733_v9 = vpop.f32.mrb[46].mxu0  ;;  %v3825_v11 = vpop.f32.mrb[37].mxu1 }
 0x225   :  { %3219 = vmatmul.mubr.bf16.gmra.mrb[148].mxu0 %v4483_v62  ;;  %4235 = vmatmul.mubr.msk.bf16.gmra.mrb[140].mxu1 %vm2476_vm1, %v4484_v0  ;;  %v3826_v12 = vadd.f32 %v3825_v11, %v3824_v7  ;;  %v3734_v13 = vpop.f32.mrb[47].mxu0  ;;  %v3827_v14 = vpop.f32.mrb[38].mxu1  ;;  %v4495_v7 = vld [vmem:[%s6419_s2 + $0x390] ss:$44 sps:$4 sm:$0xff]  }
 0x226   :  { %3226 = vmatprep.mubr.bf16.mxu0 %v4485_v3  ;;  %4238 = vmatprep.mubr.msk.bf16.mxu1 %vm4516_vm0, %v4515_v63  ;;  %v3735_v15 = vadd.f32 %v3734_v13, %v3733_v9  ;;  %v3828_v16 = vpop.f32.mrb[39].mxu1  ;;  %v4496_v9 = vld [vmem:[%s6419_s2 + $0x2e8] ss:$44 sps:$4 sm:$0xff]   ;;  %v4497_v13 = vld [vmem:[%s6419_s2 + $0x3ec] ss:$44 sps:$4 sm:$0xff]  }
 0x227   :  { %v6076_v18 = vadd.f32 %v3826_v12, %v3720_v29  ;;  %v3829_v19 = vadd.f32 %v3828_v16, %v3827_v14 }
 0x229   :  { %v6084_v24 = vadd.f32 %v3829_v19, %v3723_v37 }
 0x22a   :  { %v3736_v26 = vpop.f32.mrb[48].mxu0 }
 0x22b   :  { %v3737_v28 = vpop.f32.mrb[49].mxu0  ;;  %v3830_v30 = vpop.f32.mrb[40].mxu1 }
 0x22c   :  { %v3738_v29 = vadd.f32 %v3737_v28, %v3736_v26  ;;  %v3739_v31 = vpop.f32.mrb[50].mxu0  ;;  %v3831_v33 = vpop.f32.mrb[41].mxu1 }
 0x22d   :  { %3227 = vmatmul.mubr.bf16.gmra.mrb[152].mxu0 %v4487_v20  ;;  %4239 = vmatmul.mubr.msk.bf16.gmra.mrb[144].mxu1 %vm2476_vm1, %v4488_v22  ;;  %v3740_v34 = vpop.f32.mrb[51].mxu0  ;;  %v3832_v35 = vadd.f32 %v3831_v33, %v3830_v30  ;;  %v3833_v40 = vpop.f32.mrb[42].mxu1  ;;  %v4500_v33 = vld [vmem:[%s6419_s2 + $0x340] ss:$44 sps:$4 sm:$0xff]  }
 0x22e   :  { %3234 = vmatprep.mubr.bf16.mxu0 %v4489_v25  ;;  %4242 = vmatprep.mubr.msk.bf16.mxu1 %vm4516_vm0, %v4515_v63  ;;  %v3741_v37 = vadd.f32 %v3740_v34, %v3739_v31  ;;  %v3834_v39 = vpop.f32.mrb[43].mxu1  ;;  %v4499_v31 = vld [vmem:[%s6419_s2 + $0x3e8] ss:$44 sps:$4 sm:$0xff]  }
 0x22f   :  { %v6092_v41 = vadd.f32 %v3832_v35, %v3726_v50  ;;  %v3835_v44 = vadd.f32 %v3834_v39, %v3833_v40  ;;  %v4501_v35 = vld [vmem:[%s6419_s2 + $0x444] ss:$44 sps:$4 sm:$0xff]  }
 0x231   :  { %v6100_v48 = vadd.f32 %v3835_v44, %v3729_v58 }
 0x232   :  { %v3742_v52 = vpop.f32.mrb[52].mxu0 }
 0x233   :  { %v3743_v53 = vpop.f32.mrb[53].mxu0  ;;  %v3836_v54 = vpop.f32.mrb[44].mxu1 }
 0x234   :  { %v3744_v50 = vadd.f32 %v3743_v53, %v3742_v52  ;;  %v3745_v56 = vpop.f32.mrb[54].mxu0  ;;  %v3837_v57 = vpop.f32.mrb[45].mxu1  ;;  %v4503_v53 = vld [vmem:[%s6419_s2 + $0x440] ss:$44 sps:$4 sm:$0xff]  }
 0x235   :  { %3235 = vmatmul.mubr.bf16.gmra.mrb[156].mxu0 %v4491_v45  ;;  %4243 = vmatmul.mubr.msk.bf16.gmra.mrb[148].mxu1 %vm2476_vm1, %v4492_v47  ;;  %v3746_v60 = vpop.f32.mrb[55].mxu0  ;;  %v3838_v62 = vadd.f32 %v3837_v57, %v3836_v54  ;;  %v3839_v0 = vpop.f32.mrb[46].mxu1  ;;  %v4504_v54 = vld [vmem:[%s6419_s2 + $0x398] ss:$44 sps:$4 sm:$0xff]  }
 0x236   :  { %3242 = vmatprep.mubr.bf16.mxu0 %v4493_v49  ;;  %4246 = vmatprep.mubr.msk.bf16.mxu1 %vm4516_vm0, %v4515_v63  ;;  %v3747_v58 = vadd.f32 %v3746_v60, %v3745_v56  ;;  %v3840_v3 = vpop.f32.mrb[47].mxu1 }
 0x237   :  { %v6108_v4 = vadd.f32 %v3838_v62, %v3732_v8  ;;  %v3841_v5 = vadd.f32 %v3840_v3, %v3839_v0 }
 0x239   :  { %v6116_v11 = vadd.f32 %v3841_v5, %v3735_v15 }
 0x23a   :  { %v3748_v12 = vpop.f32.mrb[56].mxu0 }
 0x23b   :  { %v3749_v14 = vpop.f32.mrb[57].mxu0  ;;  %v3842_v16 = vpop.f32.mrb[48].mxu1 }
 0x23c   :  { %v3750_v8 = vadd.f32 %v3749_v14, %v3748_v12  ;;  %v3751_v19 = vpop.f32.mrb[58].mxu0  ;;  %v3843_v20 = vpop.f32.mrb[49].mxu1 }
 0x23d   :  { %3243 = vmatmul.mubr.bf16.gmra.mrb[160].mxu0 %v4495_v7  ;;  %4247 = vmatmul.mubr.msk.bf16.gmra.mrb[152].mxu1 %vm2476_vm1, %v4496_v9  ;;  %v3752_v22 = vpop.f32.mrb[59].mxu0  ;;  %v3844_v25 = vadd.f32 %v3843_v20, %v3842_v16  ;;  %v3845_v26 = vpop.f32.mrb[50].mxu1  ;;  %v4507_v20 = vld [vmem:[%s6419_s2 + $0x498] ss:$44 sps:$4 sm:$0xff]  }
 0x23e   :  { %3250 = vmatprep.mubr.bf16.mxu0 %v4497_v13  ;;  %4250 = vmatprep.mubr.msk.bf16.mxu1 %vm4516_vm0, %v4515_v63  ;;  %v3846_v15 = vpop.f32.mrb[51].mxu1 }
 0x23f   :  { %v6124_v28 = vadd.f32 %v3844_v25, %v3738_v29  ;;  %v3847_v30 = vadd.f32 %v3846_v15, %v3845_v26 }
 0x241   :  { %v6132_v34 = vadd.f32 %v3847_v30, %v3741_v37 }
 0x243   :  { %v3848_v40 = vpop.f32.mrb[52].mxu1 }
 0x244   :  { %v3849_v39 = vpop.f32.mrb[53].mxu1 }
 0x245   :  { %3251 = vmatmul.mubr.bf16.gmra.mrb[164].mxu0 %v4499_v31  ;;  %4251 = vmatmul.mubr.msk.bf16.gmra.mrb[156].mxu1 %vm2476_vm1, %v4500_v33  ;;  %v3850_v29 = vadd.f32 %v3849_v39, %v3848_v40  ;;  %v3851_v44 = vpop.f32.mrb[54].mxu1 }
 0x246   :  { %3258 = vmatprep.mubr.bf16.mxu0 %v4501_v35  ;;  %4254 = vmatprep.mubr.msk.bf16.mxu1 %vm4516_vm0, %v4515_v63  ;;  %v3852_v45 = vpop.f32.mrb[55].mxu1 }
 0x247   :  { %v6140_v47 = vadd.f32 %v3850_v29, %v3744_v50  ;;  %v3853_v37 = vadd.f32 %v3852_v45, %v3851_v44  ;;  %v4505_v50 = vld [vmem:[%s6419_s2 + $0x49c] ss:$44 sps:$4 sm:$0xff]  }
 0x248   :  { %v3876_v49 = vpop.f32.mrb[60].mxu0  ;;  %v4511_v44 = vld [vmem:[%s6419_s2 + $0x448] ss:$44 sps:$4 sm:$0xff]  }
 0x249   :  { %v3877_v52 = vpop.f32.mrb[61].mxu0  ;;  %v6148_v56 = vadd.f32 %v3853_v37, %v3747_v58 }
 0x24a   :  { %v3878_v57 = vadd.f32 %v3877_v52, %v3876_v49  ;;  %v3879_v60 = vpop.f32.mrb[62].mxu0 }
 0x24b   :  { %v3880_v62 = vpop.f32.mrb[63].mxu0  ;;  %v3854_v0 = vpop.f32.mrb[56].mxu1 }
 0x24c   :  { %v2861_v3 = vadd.f32 %v3878_v57, %v5937_v32  ;;  %v3881_v5 = vadd.f32 %v3880_v62, %v3879_v60  ;;  %v3855_v7 = vpop.f32.mrb[57].mxu1  ;;  %v1666_v32 = vld [vmem:[%s6419_s2 + $0x4f0] sm:$0xff] }
 0x24d   :  { %3259 = vmatmul.mubr.bf16.gmra.mrb[168].mxu0 %v4503_v53  ;;  %4255 = vmatmul.mubr.msk.bf16.gmra.mrb[160].mxu1 %vm2476_vm1, %v4504_v54  ;;  %v3856_v9 = vadd.f32 %v3855_v7, %v3854_v0  ;;  %v3857_v12 = vpop.f32.mrb[58].mxu1  ;;  %v3631_v26 = vcombine.high %v1666_v32, %v1666_v32  ;;  %v3630_v29 = vcombine.low %v1666_v32, %v1666_v32 }
 0x24e   :  { %v2864_v58 = vadd.f32 %v3881_v5, %v5943_v36  ;;  %3266 = vmatprep.mubr.bf16.mxu0 %v4505_v50  ;;  %4258 = vmatprep.mubr.msk.bf16.mxu1 %vm4516_vm0, %v4515_v63  ;;  %v3858_v13 = vpop.f32.mrb[59].mxu1  ;;  %v4508_v36 = vld [vmem:[%s6419_s2 + $0x3f0] ss:$44 sps:$4 sm:$0xff]  }
 0x24f   :  { %v6158_v14 = vadd.f32 %v3856_v9, %v3750_v8 }
 0x250   :  { %v3882_v16 = vpop.f32.mrb[64].mxu0 }
 0x251   :  { %v3883_v19 = vpop.f32.mrb[65].mxu0 }
 0x252   :  { %v3884_v22 = vadd.f32 %v3883_v19, %v3882_v16  ;;  %v3885_v25 = vpop.f32.mrb[66].mxu0 }
 0x253   :  { %v3886_v15 = vpop.f32.mrb[67].mxu0 }
 0x254   :  { %v2869_v8 = vadd.f32 %v3884_v22, %v5955_v51  ;;  %v3887_v30 = vadd.f32 %v3886_v15, %v3885_v25 }
 0x255   :  { %3267 = vmatmul.mubr.bf16.gmra.mrb[172].mxu0 %v4507_v20  ;;  %4259 = vmatmul.mubr.msk.bf16.gmra.mrb[164].mxu1 %vm2476_vm1, %v4508_v36 }
 0x256   :  { %v2872_v31 = vadd.f32 %v3887_v30, %v5963_v55  ;;  %3274 = vmatprep.mubr.bf16.mxu0 %v3631_v26  ;;  %4262 = vmatprep.mubr.msk.bf16.mxu1 %vm4516_vm0, %v4515_v63 }
 0x258   :  { %v3888_v33 = vpop.f32.mrb[68].mxu0  ;;  %v3982_v35 = vpop.f32.mrb[60].mxu1 }
 0x259   :  { %v3889_v40 = vpop.f32.mrb[69].mxu0  ;;  %v3983_v39 = vpop.f32.mrb[61].mxu1 }
 0x25a   :  { %v3890_v51 = vadd.f32 %v3889_v40, %v3888_v33  ;;  %v3984_v45 = vadd.f32 %v3983_v39, %v3982_v35  ;;  %v3891_v37 = vpop.f32.mrb[70].mxu0  ;;  %v3985_v49 = vpop.f32.mrb[62].mxu1 }
 0x25b   :  { %v3892_v52 = vpop.f32.mrb[71].mxu0  ;;  %v3986_v53 = vpop.f32.mrb[63].mxu1 }
 0x25c   :  { %v2877_v55 = vadd.f32 %v3890_v51, %v5968_v6  ;;  %v6178_v54 = vadd.f32 %v3984_v45, %v2861_v3  ;;  %v3893_v57 = vadd.f32 %v3892_v52, %v3891_v37  ;;  %v3987_v60 = vadd.f32 %v3986_v53, %v3985_v49  ;;  %v4512_v6 = vld [vmem:[%s6419_s2 + $0x4a0] ss:$44 sps:$4 sm:$0xff]  }
 0x25d   :  { %3275 = vmatmul.mubr.bf16.gmra.mrb[176].mxu0 %v3630_v29  ;;  %4263 = vmatmul.mubr.msk.bf16.gmra.mrb[168].mxu1 %vm2476_vm1, %v4511_v44 }
 0x25e   :  { %v2880_v50 = vadd.f32 %v3893_v57, %v5973_v10  ;;  %v6182_v62 = vadd.f32 %v3987_v60, %v2864_v58  ;;  %4266 = vmatprep.mubr.msk.bf16.mxu1 %vm4516_vm0, %v4515_v63 }
 0x260   :  { %v3894_v0 = vpop.f32.mrb[72].mxu0  ;;  %v3988_v5 = vpop.f32.mrb[64].mxu1 }
 0x261   :  { %v3895_v7 = vpop.f32.mrb[73].mxu0  ;;  %v3989_v9 = vpop.f32.mrb[65].mxu1 }
 0x262   :  { %v3896_v3 = vadd.f32 %v3895_v7, %v3894_v0  ;;  %v3990_v12 = vadd.f32 %v3989_v9, %v3988_v5  ;;  %v3897_v13 = vpop.f32.mrb[74].mxu0  ;;  %v3991_v32 = vpop.f32.mrb[66].mxu1 }
 0x263   :  { %v3898_v16 = vpop.f32.mrb[75].mxu0  ;;  %v3992_v19 = vpop.f32.mrb[67].mxu1 }
 0x264   :  { %v2885_v10 = vadd.f32 %v3896_v3, %v5980_v23  ;;  %v6190_v58 = vadd.f32 %v3990_v12, %v2869_v8  ;;  %v3899_v20 = vadd.f32 %v3898_v16, %v3897_v13  ;;  %v3993_v36 = vadd.f32 %v3992_v19, %v3991_v32  ;;  %v4513_v23 = vld [vmem:[%s6419_s2 + $0x4f8] ss:$0 sps:$4 sm:$0xff]  }
 0x265   :  { %4267 = vmatmul.mubr.msk.bf16.gmra.mrb[172].mxu1 %vm2476_vm1, %v4512_v6 }
 0x266   :  { %v2888_v22 = vadd.f32 %v3899_v20, %v5988_v27  ;;  %v6194_v25 = vadd.f32 %v3993_v36, %v2872_v31  ;;  %4270 = vmatprep.mubr.msk.bf16.mxu1 %vm4516_vm0, %v4515_v63 }
 0x268   :  { %v3900_v26 = vpop.f32.mrb[76].mxu0  ;;  %v3994_v15 = vpop.f32.mrb[68].mxu1 }
 0x269   :  { %v3901_v30 = vpop.f32.mrb[77].mxu0  ;;  %v3995_v33 = vpop.f32.mrb[69].mxu1 }
 0x26a   :  { %v3902_v8 = vadd.f32 %v3901_v30, %v3900_v26  ;;  %v3996_v35 = vadd.f32 %v3995_v33, %v3994_v15  ;;  %v3903_v40 = vpop.f32.mrb[78].mxu0  ;;  %v3997_v39 = vpop.f32.mrb[70].mxu1 }
 0x26b   :  { %v3904_v29 = vpop.f32.mrb[79].mxu0  ;;  %v3998_v44 = vpop.f32.mrb[71].mxu1 }
 0x26c   :  { %v2893_v27 = vadd.f32 %v3902_v8, %v5996_v42  ;;  %v6202_v31 = vadd.f32 %v3996_v35, %v2877_v55  ;;  %v3905_v51 = vadd.f32 %v3904_v29, %v3903_v40  ;;  %v3999_v63 = vadd.f32 %v3998_v44, %v3997_v39 }
 0x26d   :  { %4271 = vmatmul.mubr.msk.bf16.gmra.mrb[176].mxu1 %vm2476_vm1, %v4513_v23 }
 0x26e   :  { %v2896_v45 = vadd.f32 %v3905_v51, %v6004_v46  ;;  %v6206_v37 = vadd.f32 %v3999_v63, %v2880_v50 }
 0x270   :  { %v3906_v49 = vpop.f32.mrb[80].mxu0  ;;  %v4000_v52 = vpop.f32.mrb[72].mxu1 }
 0x271   :  { %v3907_v53 = vpop.f32.mrb[81].mxu0  ;;  %v4001_v57 = vpop.f32.mrb[73].mxu1 }
 0x272   :  { %v3908_v60 = vadd.f32 %v3907_v53, %v3906_v49  ;;  %v4002_v0 = vadd.f32 %v4001_v57, %v4000_v52  ;;  %v3909_v5 = vpop.f32.mrb[82].mxu0  ;;  %v4003_v7 = vpop.f32.mrb[74].mxu1 }
 0x273   :  { %v3910_v9 = vpop.f32.mrb[83].mxu0  ;;  %v4004_v42 = vpop.f32.mrb[75].mxu1 }
 0x274   :  { %v2901_v55 = vadd.f32 %v3908_v60, %v6012_v61  ;;  %v6209_v6 = vadd.f32 %v4002_v0, %v2885_v10  ;;  %v3911_v3 = vadd.f32 %v3910_v9, %v3909_v5  ;;  %v4005_v12 = vadd.f32 %v4004_v42, %v4003_v7 }
 0x276   :  { %v2904_v46 = vadd.f32 %v3911_v3, %v6020_v2  ;;  %v6212_v50 = vadd.f32 %v4005_v12, %v2888_v22 }
 0x278   :  { %v3912_v13 = vpop.f32.mrb[84].mxu0  ;;  %v4006_v32 = vpop.f32.mrb[76].mxu1 }
 0x279   :  { %v3913_v16 = vpop.f32.mrb[85].mxu0  ;;  %v4007_v19 = vpop.f32.mrb[77].mxu1 }
 0x27a   :  { %v3914_v20 = vadd.f32 %v3913_v16, %v3912_v13  ;;  %v4008_v36 = vadd.f32 %v4007_v19, %v4006_v32  ;;  %v3915_v26 = vpop.f32.mrb[86].mxu0  ;;  %v4009_v15 = vpop.f32.mrb[78].mxu1 }
 0x27b   :  { %v3916_v30 = vpop.f32.mrb[87].mxu0  ;;  %v4010_v33 = vpop.f32.mrb[79].mxu1 }
 0x27c   :  { %v2909_v61 = vadd.f32 %v3914_v20, %v6028_v17  ;;  %v6215_v10 = vadd.f32 %v4008_v36, %v2893_v27  ;;  %v3917_v23 = vadd.f32 %v3916_v30, %v3915_v26  ;;  %v4011_v8 = vadd.f32 %v4010_v33, %v4009_v15 }
 0x27e   :  { %v2912_v2 = vadd.f32 %v3917_v23, %v6036_v21  ;;  %v6218_v22 = vadd.f32 %v4011_v8, %v2896_v45 }
 0x280   :  { %v3918_v35 = vpop.f32.mrb[88].mxu0  ;;  %v4012_v40 = vpop.f32.mrb[80].mxu1 }
 0x281   :  { %v3919_v39 = vpop.f32.mrb[89].mxu0  ;;  %v4013_v29 = vpop.f32.mrb[81].mxu1 }
 0x282   :  { %v3920_v44 = vadd.f32 %v3919_v39, %v3918_v35  ;;  %v4014_v51 = vadd.f32 %v4013_v29, %v4012_v40  ;;  %v3921_v63 = vpop.f32.mrb[90].mxu0  ;;  %v4015_v49 = vpop.f32.mrb[82].mxu1 }
 0x283   :  { %v3922_v52 = vpop.f32.mrb[91].mxu0  ;;  %v4016_v53 = vpop.f32.mrb[83].mxu1 }
 0x284   :  { %v2917_v17 = vadd.f32 %v3920_v44, %v6044_v38  ;;  %v6221_v27 = vadd.f32 %v4014_v51, %v2901_v55  ;;  %v3923_v57 = vadd.f32 %v3922_v52, %v3921_v63  ;;  %v4017_v60 = vadd.f32 %v4016_v53, %v4015_v49 }
 0x286   :  { %v2920_v21 = vadd.f32 %v3923_v57, %v6052_v43  ;;  %v6224_v45 = vadd.f32 %v4017_v60, %v2904_v46 }
 0x288   :  { %v3924_v0 = vpop.f32.mrb[92].mxu0  ;;  %v4018_v5 = vpop.f32.mrb[84].mxu1 }
 0x289   :  { %v3925_v7 = vpop.f32.mrb[93].mxu0  ;;  %v4019_v9 = vpop.f32.mrb[85].mxu1 }
 0x28a   :  { %v3926_v42 = vadd.f32 %v3925_v7, %v3924_v0  ;;  %v4020_v3 = vadd.f32 %v4019_v9, %v4018_v5  ;;  %v3927_v12 = vpop.f32.mrb[94].mxu0  ;;  %v4021_v13 = vpop.f32.mrb[86].mxu1 }
 0x28b   :  { %v3928_v32 = vpop.f32.mrb[95].mxu0  ;;  %v4022_v16 = vpop.f32.mrb[87].mxu1 }
 0x28c   :  { %v2925_v38 = vadd.f32 %v3926_v42, %v6060_v59  ;;  %v6227_v55 = vadd.f32 %v4020_v3, %v2909_v61  ;;  %v3929_v19 = vadd.f32 %v3928_v32, %v3927_v12  ;;  %v4023_v20 = vadd.f32 %v4022_v16, %v4021_v13 }
 0x28e   :  { %v2928_v43 = vadd.f32 %v3929_v19, %v6068_v1  ;;  %v6230_v46 = vadd.f32 %v4023_v20, %v2912_v2 }
 0x290   :  { %v3930_v36 = vpop.f32.mrb[96].mxu0  ;;  %v4024_v26 = vpop.f32.mrb[88].mxu1 }
 0x291   :  { %v3931_v15 = vpop.f32.mrb[97].mxu0  ;;  %v4025_v30 = vpop.f32.mrb[89].mxu1 }
 0x292   :  { %v3932_v33 = vadd.f32 %v3931_v15, %v3930_v36  ;;  %v4026_v23 = vadd.f32 %v4025_v30, %v4024_v26  ;;  %v3933_v8 = vpop.f32.mrb[98].mxu0  ;;  %v4027_v35 = vpop.f32.mrb[90].mxu1 }
 0x293   :  { %v3934_v40 = vpop.f32.mrb[99].mxu0  ;;  %v4028_v39 = vpop.f32.mrb[91].mxu1 }
 0x294   :  { %v2933_v59 = vadd.f32 %v3932_v33, %v6076_v18  ;;  %v6233_v61 = vadd.f32 %v4026_v23, %v2917_v17  ;;  %v3935_v29 = vadd.f32 %v3934_v40, %v3933_v8  ;;  %v4029_v44 = vadd.f32 %v4028_v39, %v4027_v35 }
 0x296   :  { %v2936_v1 = vadd.f32 %v3935_v29, %v6084_v24  ;;  %v6236_v2 = vadd.f32 %v4029_v44, %v2920_v21 }
 0x298   :  { %v3936_v51 = vpop.f32.mrb[100].mxu0  ;;  %v4030_v63 = vpop.f32.mrb[92].mxu1 }
 0x299   :  { %v3937_v49 = vpop.f32.mrb[101].mxu0  ;;  %v4031_v52 = vpop.f32.mrb[93].mxu1 }
 0x29a   :  { %v3938_v53 = vadd.f32 %v3937_v49, %v3936_v51  ;;  %v4032_v57 = vadd.f32 %v4031_v52, %v4030_v63  ;;  %v3939_v60 = vpop.f32.mrb[102].mxu0  ;;  %v4033_v0 = vpop.f32.mrb[94].mxu1 }
 0x29b   :  { %v3940_v5 = vpop.f32.mrb[103].mxu0  ;;  %v4034_v7 = vpop.f32.mrb[95].mxu1 }
 0x29c   :  { %v2941_v18 = vadd.f32 %v3938_v53, %v6092_v41  ;;  %v6239_v17 = vadd.f32 %v4032_v57, %v2925_v38  ;;  %v3941_v9 = vadd.f32 %v3940_v5, %v3939_v60  ;;  %v4035_v42 = vadd.f32 %v4034_v7, %v4033_v0 }
 0x29e   :  { %v2944_v24 = vadd.f32 %v3941_v9, %v6100_v48  ;;  %v6242_v21 = vadd.f32 %v4035_v42, %v2928_v43 }
 0x2a0   :  { %v3942_v3 = vpop.f32.mrb[104].mxu0  ;;  %v4036_v12 = vpop.f32.mrb[96].mxu1 }
 0x2a1   :  { %v3943_v13 = vpop.f32.mrb[105].mxu0  ;;  %v4037_v32 = vpop.f32.mrb[97].mxu1 }
 0x2a2   :  { %v3944_v16 = vadd.f32 %v3943_v13, %v3942_v3  ;;  %v4038_v19 = vadd.f32 %v4037_v32, %v4036_v12  ;;  %v3945_v20 = vpop.f32.mrb[106].mxu0  ;;  %v4039_v36 = vpop.f32.mrb[98].mxu1 }
 0x2a3   :  { %v3946_v26 = vpop.f32.mrb[107].mxu0  ;;  %v4040_v15 = vpop.f32.mrb[99].mxu1 }
 0x2a4   :  { %v2949_v41 = vadd.f32 %v3944_v16, %v6108_v4  ;;  %v6245_v38 = vadd.f32 %v4038_v19, %v2933_v59  ;;  %v3947_v30 = vadd.f32 %v3946_v26, %v3945_v20  ;;  %v4041_v33 = vadd.f32 %v4040_v15, %v4039_v36 }
 0x2a6   :  { %v2952_v48 = vadd.f32 %v3947_v30, %v6116_v11  ;;  %v6248_v43 = vadd.f32 %v4041_v33, %v2936_v1 }
 0x2a8   :  { %v3948_v23 = vpop.f32.mrb[108].mxu0  ;;  %v4042_v8 = vpop.f32.mrb[100].mxu1 }
 0x2a9   :  { %v3949_v35 = vpop.f32.mrb[109].mxu0  ;;  %v4043_v40 = vpop.f32.mrb[101].mxu1 }
 0x2aa   :  { %v3950_v39 = vadd.f32 %v3949_v35, %v3948_v23  ;;  %v4044_v29 = vadd.f32 %v4043_v40, %v4042_v8  ;;  %v3951_v44 = vpop.f32.mrb[110].mxu0  ;;  %v4045_v51 = vpop.f32.mrb[102].mxu1 }
 0x2ab   :  { %v3952_v63 = vpop.f32.mrb[111].mxu0  ;;  %v4046_v49 = vpop.f32.mrb[103].mxu1 }
 0x2ac   :  { %v2957_v4 = vadd.f32 %v3950_v39, %v6124_v28  ;;  %v6251_v59 = vadd.f32 %v4044_v29, %v2941_v18  ;;  %v3953_v52 = vadd.f32 %v3952_v63, %v3951_v44  ;;  %v4047_v53 = vadd.f32 %v4046_v49, %v4045_v51 }
 0x2ae   :  { %v2960_v11 = vadd.f32 %v3953_v52, %v6132_v34  ;;  %v6254_v1 = vadd.f32 %v4047_v53, %v2944_v24 }
 0x2b0   :  { %v3954_v57 = vpop.f32.mrb[112].mxu0  ;;  %v4048_v60 = vpop.f32.mrb[104].mxu1 }
 0x2b1   :  { %v3955_v0 = vpop.f32.mrb[113].mxu0  ;;  %v4049_v5 = vpop.f32.mrb[105].mxu1 }
 0x2b2   :  { %v3956_v7 = vadd.f32 %v3955_v0, %v3954_v57  ;;  %v4050_v9 = vadd.f32 %v4049_v5, %v4048_v60  ;;  %v3957_v42 = vpop.f32.mrb[114].mxu0  ;;  %v4051_v3 = vpop.f32.mrb[106].mxu1 }
 0x2b3   :  { %v3958_v12 = vpop.f32.mrb[115].mxu0  ;;  %v4052_v13 = vpop.f32.mrb[107].mxu1 }
 0x2b4   :  { %v2965_v28 = vadd.f32 %v3956_v7, %v6140_v47  ;;  %v6257_v18 = vadd.f32 %v4050_v9, %v2949_v41  ;;  %v3959_v32 = vadd.f32 %v3958_v12, %v3957_v42  ;;  %v4053_v16 = vadd.f32 %v4052_v13, %v4051_v3 }
 0x2b6   :  { %v2968_v34 = vadd.f32 %v3959_v32, %v6148_v56  ;;  %v6260_v24 = vadd.f32 %v4053_v16, %v2952_v48 }
 0x2b8   :  { %v3960_v19 = vpop.f32.mrb[116].mxu0  ;;  %v4054_v20 = vpop.f32.mrb[108].mxu1 }
 0x2b9   :  { %v3961_v36 = vpop.f32.mrb[117].mxu0  ;;  %v4055_v26 = vpop.f32.mrb[109].mxu1 }
 0x2ba   :  { %v3962_v15 = vadd.f32 %v3961_v36, %v3960_v19  ;;  %v4056_v30 = vadd.f32 %v4055_v26, %v4054_v20  ;;  %v4057_v33 = vpop.f32.mrb[110].mxu1  ;;  %v3963_v23 = vpop.f32.mrb[118].mxu0 }
 0x2bb   :  { %v4058_v8 = vpop.f32.mrb[111].mxu1  ;;  %v3964_v35 = vpop.f32.mrb[119].mxu0 }
 0x2bc   :  { %v2973_v47 = vadd.f32 %v3962_v15, %v6158_v14  ;;  %v6263_v41 = vadd.f32 %v4056_v30, %v2957_v4  ;;  %v4059_v40 = vadd.f32 %v4058_v8, %v4057_v33 }
 0x2be   :  { %v6265_v39 = vadd.f32 %v4059_v40, %v2960_v11 }
 0x2c0   :  { %v4060_v56 = vpop.f32.mrb[112].mxu1  ;;  %v4088_v48 = vpop.f32.mrb[120].mxu0 }
 0x2c1   :  { %v4061_v29 = vpop.f32.mrb[113].mxu1  ;;  %v4089_v44 = vpop.f32.mrb[121].mxu0 }
 0x2c2   :  { %v4062_v51 = vadd.f32 %v4061_v29, %v4060_v56  ;;  %v4090_v63 = vadd.f32 %v4089_v44, %v4088_v48  ;;  %v4063_v49 = vpop.f32.mrb[114].mxu1  ;;  %v4091_v52 = vpop.f32.mrb[122].mxu0 }
 0x2c3   :  { %v4064_v53 = vpop.f32.mrb[115].mxu1  ;;  %v4092_v57 = vpop.f32.mrb[123].mxu0 }
 0x2c4   :  { %v6267_v60 = vadd.f32 %v4062_v51, %v2965_v28  ;;  %v4065_v0 = vadd.f32 %v4064_v53, %v4063_v49  ;;  %v4093_v5 = vadd.f32 %v4092_v57, %v4091_v52  ;;  %v3165_v14 = vadd.f32 %v4090_v63, %v6178_v54 }
 0x2c6   :  { %v6270_v4 = vadd.f32 %v4065_v0, %v2968_v34  ;;  %v3168_v11 = vadd.f32 %v4093_v5, %v6182_v62 }
 0x2c8   :  { %v4066_v7 = vpop.f32.mrb[116].mxu1  ;;  %v4094_v9 = vpop.f32.mrb[124].mxu0 }
 0x2c9   :  { %v4067_v42 = vpop.f32.mrb[117].mxu1  ;;  %v4095_v3 = vpop.f32.mrb[125].mxu0 }
 0x2ca   :  { %v4068_v12 = vadd.f32 %v4067_v42, %v4066_v7  ;;  %v4096_v13 = vadd.f32 %v4095_v3, %v4094_v9  ;;  %v4097_v32 = vpop.f32.mrb[126].mxu0  ;;  %v4069_v16 = vpop.f32.mrb[118].mxu1 }
 0x2cb   :  { %v4098_v19 = vpop.f32.mrb[127].mxu0  ;;  %v4070_v20 = vpop.f32.mrb[119].mxu1 }
 0x2cc   :  { %v6273_v28 = vadd.f32 %v4068_v12, %v2973_v47  ;;  %v4099_v36 = vadd.f32 %v4098_v19, %v4097_v32  ;;  %v3173_v26 = vadd.f32 %v4096_v13, %v6190_v58 }
 0x2ce   :  { %v3176_v54 = vadd.f32 %v4099_v36, %v6194_v25 }
 0x2d0   :  { %v4100_v34 = vpop.f32.mrb[128].mxu0  ;;  %v3316_v15 = vpop.f32.mrb[120].mxu1 }
 0x2d1   :  { %v3317_v62 = vadd.f32 %v3316_v15, %v3165_v14  ;;  %v4101_v30 = vpop.f32.mrb[129].mxu0  ;;  %v4216_v33 = vpop.f32.mrb[121].mxu1 }
 0x2d2   :  { %v4102_v23 = vadd.f32 %v4101_v30, %v4100_v34  ;;  %v4103_v8 = vpop.f32.mrb[130].mxu0  ;;  %v3319_v35 = vpop.f32.mrb[122].mxu1 }
 0x2d3   :  { %3435 = vst.msk [vmem:[%s6421_s3] sm:$0xff] %vm3434_vm2, %v3317_v62  ;;  %v3320_v47 = vadd.f32 %v3319_v35, %v3168_v11  ;;  %v4104_v40 = vpop.f32.mrb[131].mxu0  ;;  %v4217_v56 = vpop.f32.mrb[123].mxu1 }
 0x2d4   :  { %v4105_v58 = vadd.f32 %v4104_v40, %v4103_v8  ;;  %v3181_v25 = vadd.f32 %v4102_v23, %v6202_v31 }
 0x2d5   :  { %3436 = vst.msk [vmem:[%s6421_s3 + $0x8] sm:$0xff] %vm3434_vm2, %v3320_v47 }
 0x2d6   :  { %v3184_v48 = vadd.f32 %v4105_v58, %v6206_v37 }
 0x2d8   :  { %v4106_v29 = vpop.f32.mrb[132].mxu0  ;;  %v3324_v44 = vpop.f32.mrb[124].mxu1 }
 0x2d9   :  { %v3325_v51 = vadd.f32 %v3324_v44, %v3173_v26  ;;  %v4107_v63 = vpop.f32.mrb[133].mxu0  ;;  %v4220_v49 = vpop.f32.mrb[125].mxu1 }
 0x2da   :  { %v4108_v52 = vadd.f32 %v4107_v63, %v4106_v29  ;;  %v4109_v53 = vpop.f32.mrb[134].mxu0  ;;  %v3327_v57 = vpop.f32.mrb[126].mxu1 }
 0x2db   :  { %3437 = vst.msk [vmem:[%s6421_s3 + $0x10] sm:$0xff] %vm3434_vm2, %v3325_v51  ;;  %v3328_v31 = vadd.f32 %v3327_v57, %v3176_v54  ;;  %v4110_v0 = vpop.f32.mrb[135].mxu0  ;;  %v4221_v5 = vpop.f32.mrb[127].mxu1 }
 0x2dc   :  { %v4111_v14 = vadd.f32 %v4110_v0, %v4109_v53  ;;  %v3189_v11 = vadd.f32 %v4108_v52, %v6209_v6 }
 0x2dd   :  { %3438 = vst.msk [vmem:[%s6421_s3 + $0x18] sm:$0xff] %vm3434_vm2, %v3328_v31 }
 0x2de   :  { %v3192_v37 = vadd.f32 %v4111_v14, %v6212_v50 }
 0x2e0   :  { %v4112_v7 = vpop.f32.mrb[136].mxu0  ;;  %v3332_v9 = vpop.f32.mrb[128].mxu1 }
 0x2e1   :  { %v3333_v42 = vadd.f32 %v3332_v9, %v3181_v25  ;;  %v4113_v3 = vpop.f32.mrb[137].mxu0  ;;  %v4224_v12 = vpop.f32.mrb[129].mxu1 }
 0x2e2   :  { %v4114_v13 = vadd.f32 %v4113_v3, %v4112_v7  ;;  %v4115_v32 = vpop.f32.mrb[138].mxu0  ;;  %v3335_v16 = vpop.f32.mrb[130].mxu1 }
 0x2e3   :  { %3439 = vst.msk [vmem:[%s6421_s3 + $0x20] sm:$0xff] %vm3434_vm2, %v3333_v42  ;;  %v3336_v6 = vadd.f32 %v3335_v16, %v3184_v48  ;;  %v4116_v19 = vpop.f32.mrb[139].mxu0  ;;  %v4225_v20 = vpop.f32.mrb[131].mxu1 }
 0x2e4   :  { %v4117_v36 = vadd.f32 %v4116_v19, %v4115_v32  ;;  %v3197_v26 = vadd.f32 %v4114_v13, %v6215_v10 }
 0x2e5   :  { %3440 = vst.msk [vmem:[%s6421_s3 + $0x28] sm:$0xff] %vm3434_vm2, %v3336_v6 }
 0x2e6   :  { %v3200_v50 = vadd.f32 %v4117_v36, %v6218_v22 }
 0x2e8   :  { %v4118_v54 = vpop.f32.mrb[140].mxu0  ;;  %v3340_v34 = vpop.f32.mrb[132].mxu1 }
 0x2e9   :  { %v3341_v15 = vadd.f32 %v3340_v34, %v3189_v11  ;;  %v4119_v62 = vpop.f32.mrb[141].mxu0  ;;  %v4228_v30 = vpop.f32.mrb[133].mxu1 }
 0x2ea   :  { %v4120_v33 = vadd.f32 %v4119_v62, %v4118_v54  ;;  %v4121_v23 = vpop.f32.mrb[142].mxu0  ;;  %v3343_v8 = vpop.f32.mrb[134].mxu1 }
 0x2eb   :  { %3441 = vst.msk [vmem:[%s6421_s3 + $0x30] sm:$0xff] %vm3434_vm2, %v3341_v15  ;;  %v3344_v10 = vadd.f32 %v3343_v8, %v3192_v37  ;;  %v4122_v35 = vpop.f32.mrb[143].mxu0  ;;  %v4229_v47 = vpop.f32.mrb[135].mxu1 }
 0x2ec   :  { %v4123_v40 = vadd.f32 %v4122_v35, %v4121_v23  ;;  %v3205_v56 = vadd.f32 %v4120_v33, %v6221_v27 }
 0x2ed   :  { %3442 = vst.msk [vmem:[%s6421_s3 + $0x38] sm:$0xff] %vm3434_vm2, %v3344_v10 }
 0x2ee   :  { %v3208_v22 = vadd.f32 %v4123_v40, %v6224_v45 }
 0x2f0   :  { %v4124_v58 = vpop.f32.mrb[144].mxu0  ;;  %v3348_v25 = vpop.f32.mrb[136].mxu1 }
 0x2f1   :  { %v3349_v48 = vadd.f32 %v3348_v25, %v3197_v26  ;;  %v4125_v29 = vpop.f32.mrb[145].mxu0  ;;  %v4232_v44 = vpop.f32.mrb[137].mxu1 }
 0x2f2   :  { %v4126_v51 = vadd.f32 %v4125_v29, %v4124_v58  ;;  %v4127_v63 = vpop.f32.mrb[146].mxu0  ;;  %v3351_v49 = vpop.f32.mrb[138].mxu1 }
 0x2f3   :  { %3443 = vst.msk [vmem:[%s6421_s3 + $0x40] sm:$0xff] %vm3434_vm2, %v3349_v48  ;;  %v3352_v27 = vadd.f32 %v3351_v49, %v3200_v50  ;;  %v4128_v52 = vpop.f32.mrb[147].mxu0  ;;  %v4233_v53 = vpop.f32.mrb[139].mxu1 }
 0x2f4   :  { %v4129_v57 = vadd.f32 %v4128_v52, %v4127_v63  ;;  %v3213_v31 = vadd.f32 %v4126_v51, %v6227_v55 }
 0x2f5   :  { %3444 = vst.msk [vmem:[%s6421_s3 + $0x48] sm:$0xff] %vm3434_vm2, %v3352_v27 }
 0x2f6   :  { %v3216_v45 = vadd.f32 %v4129_v57, %v6230_v46 }
 0x2f8   :  { %v4130_v0 = vpop.f32.mrb[148].mxu0  ;;  %v3356_v5 = vpop.f32.mrb[140].mxu1 }
 0x2f9   :  { %v3357_v14 = vadd.f32 %v3356_v5, %v3205_v56  ;;  %v4131_v11 = vpop.f32.mrb[149].mxu0  ;;  %v4236_v37 = vpop.f32.mrb[141].mxu1 }
 0x2fa   :  { %v4132_v7 = vadd.f32 %v4131_v11, %v4130_v0  ;;  %v4133_v9 = vpop.f32.mrb[150].mxu0  ;;  %v3359_v42 = vpop.f32.mrb[142].mxu1 }
 0x2fb   :  { %3445 = vst.msk [vmem:[%s6421_s3 + $0x50] sm:$0xff] %vm3434_vm2, %v3357_v14  ;;  %v3360_v55 = vadd.f32 %v3359_v42, %v3208_v22  ;;  %v4134_v3 = vpop.f32.mrb[151].mxu0  ;;  %v4237_v12 = vpop.f32.mrb[143].mxu1 }
 0x2fc   :  { %v4135_v13 = vadd.f32 %v4134_v3, %v4133_v9  ;;  %v3221_v32 = vadd.f32 %v4132_v7, %v6233_v61 }
 0x2fd   :  { %3446 = vst.msk [vmem:[%s6421_s3 + $0x58] sm:$0xff] %vm3434_vm2, %v3360_v55 }
 0x2fe   :  { %v3224_v46 = vadd.f32 %v4135_v13, %v6236_v2 }
 0x300   :  { %v4136_v16 = vpop.f32.mrb[152].mxu0  ;;  %v3364_v6 = vpop.f32.mrb[144].mxu1 }
 0x301   :  { %v3365_v19 = vadd.f32 %v3364_v6, %v3213_v31  ;;  %v4137_v20 = vpop.f32.mrb[153].mxu0  ;;  %v4240_v36 = vpop.f32.mrb[145].mxu1 }
 0x302   :  { %v4138_v26 = vadd.f32 %v4137_v20, %v4136_v16  ;;  %v4139_v50 = vpop.f32.mrb[154].mxu0  ;;  %v3367_v54 = vpop.f32.mrb[146].mxu1 }
 0x303   :  { %3447 = vst.msk [vmem:[%s6421_s3 + $0x60] sm:$0xff] %vm3434_vm2, %v3365_v19  ;;  %v3368_v61 = vadd.f32 %v3367_v54, %v3216_v45  ;;  %v4140_v34 = vpop.f32.mrb[155].mxu0  ;;  %v4241_v15 = vpop.f32.mrb[147].mxu1 }
 0x304   :  { %v4141_v62 = vadd.f32 %v4140_v34, %v4139_v50  ;;  %v3229_v30 = vadd.f32 %v4138_v26, %v6239_v17 }
 0x305   :  { %3448 = vst.msk [vmem:[%s6421_s3 + $0x68] sm:$0xff] %vm3434_vm2, %v3368_v61 }
 0x306   :  { %v3232_v2 = vadd.f32 %v4141_v62, %v6242_v21 }
 0x308   :  { %v4142_v33 = vpop.f32.mrb[156].mxu0  ;;  %v3372_v23 = vpop.f32.mrb[148].mxu1 }
 0x309   :  { %v3373_v8 = vadd.f32 %v3372_v23, %v3221_v32  ;;  %v4143_v10 = vpop.f32.mrb[157].mxu0  ;;  %v4244_v35 = vpop.f32.mrb[149].mxu1 }
 0x30a   :  { %v4144_v47 = vadd.f32 %v4143_v10, %v4142_v33  ;;  %v4145_v40 = vpop.f32.mrb[158].mxu0  ;;  %v3375_v56 = vpop.f32.mrb[150].mxu1 }
 0x30b   :  { %3449 = vst.msk [vmem:[%s6421_s3 + $0x70] sm:$0xff] %vm3434_vm2, %v3373_v8  ;;  %v3376_v17 = vadd.f32 %v3375_v56, %v3224_v46  ;;  %v4146_v22 = vpop.f32.mrb[159].mxu0  ;;  %v4245_v58 = vpop.f32.mrb[151].mxu1 }
 0x30c   :  { %v4147_v25 = vadd.f32 %v4146_v22, %v4145_v40  ;;  %v3237_v48 = vadd.f32 %v4144_v47, %v6245_v38 }
 0x30d   :  { %3450 = vst.msk [vmem:[%s6421_s3 + $0x78] sm:$0xff] %vm3434_vm2, %v3376_v17 }
 0x30e   :  { %v3240_v21 = vadd.f32 %v4147_v25, %v6248_v43 }
 0x310   :  { %v4148_v29 = vpop.f32.mrb[160].mxu0  ;;  %v3380_v44 = vpop.f32.mrb[152].mxu1 }
 0x311   :  { %v3381_v51 = vadd.f32 %v3380_v44, %v3229_v30  ;;  %v4149_v63 = vpop.f32.mrb[161].mxu0  ;;  %v4248_v49 = vpop.f32.mrb[153].mxu1 }
 0x312   :  { %v4150_v27 = vadd.f32 %v4149_v63, %v4148_v29  ;;  %v4151_v52 = vpop.f32.mrb[162].mxu0  ;;  %v3383_v53 = vpop.f32.mrb[154].mxu1 }
 0x313   :  { %3451 = vst.msk [vmem:[%s6421_s3 + $0x80] sm:$0xff] %vm3434_vm2, %v3381_v51  ;;  %v3384_v38 = vadd.f32 %v3383_v53, %v3232_v2  ;;  %v4152_v57 = vpop.f32.mrb[163].mxu0  ;;  %v4249_v31 = vpop.f32.mrb[155].mxu1 }
 0x314   :  { %v4153_v45 = vadd.f32 %v4152_v57, %v4151_v52  ;;  %v3245_v0 = vadd.f32 %v4150_v27, %v6251_v59 }
 0x315   :  { %3452 = vst.msk [vmem:[%s6421_s3 + $0x88] sm:$0xff] %vm3434_vm2, %v3384_v38 }
 0x316   :  { %v3248_v43 = vadd.f32 %v4153_v45, %v6254_v1 }
 0x318   :  { %v4154_v5 = vpop.f32.mrb[164].mxu0  ;;  %v3388_v14 = vpop.f32.mrb[156].mxu1 }
 0x319   :  { %v3389_v11 = vadd.f32 %v3388_v14, %v3237_v48  ;;  %v4155_v37 = vpop.f32.mrb[165].mxu0  ;;  %v4252_v7 = vpop.f32.mrb[157].mxu1 }
 0x31a   :  { %v4156_v9 = vadd.f32 %v4155_v37, %v4154_v5  ;;  %v4157_v42 = vpop.f32.mrb[166].mxu0  ;;  %v3391_v55 = vpop.f32.mrb[158].mxu1 }
 0x31b   :  { %3453 = vst.msk [vmem:[%s6421_s3 + $0x90] sm:$0xff] %vm3434_vm2, %v3389_v11  ;;  %v3392_v59 = vadd.f32 %v3391_v55, %v3240_v21  ;;  %v4158_v3 = vpop.f32.mrb[167].mxu0  ;;  %v4253_v12 = vpop.f32.mrb[159].mxu1 }
 0x31c   :  { %v4159_v13 = vadd.f32 %v4158_v3, %v4157_v42  ;;  %v3253_v32 = vadd.f32 %v4156_v9, %v6257_v18 }
 0x31d   :  { %3454 = vst.msk [vmem:[%s6421_s3 + $0x98] sm:$0xff] %vm3434_vm2, %v3392_v59 }
 0x31e   :  { %v3256_v1 = vadd.f32 %v4159_v13, %v6260_v24 }
 0x320   :  { %v4160_v46 = vpop.f32.mrb[168].mxu0  ;;  %v3396_v16 = vpop.f32.mrb[160].mxu1 }
 0x321   :  { %v3397_v6 = vadd.f32 %v3396_v16, %v3245_v0  ;;  %v4161_v19 = vpop.f32.mrb[169].mxu0  ;;  %v4256_v20 = vpop.f32.mrb[161].mxu1 }
 0x322   :  { %v4162_v36 = vadd.f32 %v4161_v19, %v4160_v46  ;;  %v4163_v26 = vpop.f32.mrb[170].mxu0  ;;  %v3399_v50 = vpop.f32.mrb[162].mxu1 }
 0x323   :  { %3455 = vst.msk [vmem:[%s6421_s3 + $0xa0] sm:$0xff] %vm3434_vm2, %v3397_v6  ;;  %v3400_v18 = vadd.f32 %v3399_v50, %v3248_v43  ;;  %v4164_v54 = vpop.f32.mrb[171].mxu0  ;;  %v4257_v61 = vpop.f32.mrb[163].mxu1 }
 0x324   :  { %v4165_v34 = vadd.f32 %v4164_v54, %v4163_v26  ;;  %v3261_v15 = vadd.f32 %v4162_v36, %v6263_v41 }
 0x325   :  { %3456 = vst.msk [vmem:[%s6421_s3 + $0xa8] sm:$0xff] %vm3434_vm2, %v3400_v18 }
 0x326   :  { %v3264_v24 = vadd.f32 %v4165_v34, %v6265_v39 }
 0x328   :  { %v4166_v62 = vpop.f32.mrb[172].mxu0  ;;  %v3404_v30 = vpop.f32.mrb[164].mxu1 }
 0x329   :  { %v3405_v2 = vadd.f32 %v3404_v30, %v3253_v32  ;;  %v4167_v33 = vpop.f32.mrb[173].mxu0  ;;  %v4260_v23 = vpop.f32.mrb[165].mxu1 }
 0x32a   :  { %v4168_v8 = vadd.f32 %v4167_v33, %v4166_v62  ;;  %v4169_v10 = vpop.f32.mrb[174].mxu0  ;;  %v3407_v35 = vpop.f32.mrb[166].mxu1 }
 0x32b   :  { %3457 = vst.msk [vmem:[%s6421_s3 + $0xb0] sm:$0xff] %vm3434_vm2, %v3405_v2  ;;  %v3408_v41 = vadd.f32 %v3407_v35, %v3256_v1  ;;  %v4170_v47 = vpop.f32.mrb[175].mxu0  ;;  %v4261_v40 = vpop.f32.mrb[167].mxu1 }
 0x32c   :  { %v4171_v56 = vadd.f32 %v4170_v47, %v4169_v10  ;;  %v3269_v17 = vadd.f32 %v4168_v8, %v6267_v60 }
 0x32d   :  { %3458 = vst.msk [vmem:[%s6421_s3 + $0xb8] sm:$0xff] %vm3434_vm2, %v3408_v41 }
 0x32e   :  { %v3272_v39 = vadd.f32 %v4171_v56, %v6270_v4 }
 0x330   :  { %v4172_v22 = vpop.f32.mrb[176].mxu0  ;;  %v3412_v58 = vpop.f32.mrb[168].mxu1 }
 0x331   :  { %v3413_v25 = vadd.f32 %v3412_v58, %v3261_v15  ;;  %v4173_v48 = vpop.f32.mrb[177].mxu0  ;;  %v4264_v21 = vpop.f32.mrb[169].mxu1 }
 0x332   :  { %v4174_v29 = vadd.f32 %v4173_v48, %v4172_v22  ;;  %v3415_v44 = vpop.f32.mrb[170].mxu1  ;;  %v4175_v51 = vpop.f32.mrb[178].mxu0 }
 0x333   :  { %3459 = vst.msk [vmem:[%s6421_s3 + $0xc0] sm:$0xff] %vm3434_vm2, %v3413_v25  ;;  %v3416_v60 = vadd.f32 %v3415_v44, %v3264_v24  ;;  %v4265_v63 = vpop.f32.mrb[171].mxu1  ;;  %v4176_v49 = vpop.f32.mrb[179].mxu0 }
 0x334   :  { %v3277_v27 = vadd.f32 %v4174_v29, %v6273_v28 }
 0x335   :  { %3460 = vst.msk [vmem:[%s6421_s3 + $0xc8] sm:$0xff] %vm3434_vm2, %v3416_v60 }
 0x338   :  { %v3420_v4 = vpop.f32.mrb[172].mxu1 }
 0x339   :  { %v3421_v52 = vadd.f32 %v3420_v4, %v3269_v17  ;;  %v4268_v53 = vpop.f32.mrb[173].mxu1 }
 0x33a   :  { %v3423_v38 = vpop.f32.mrb[174].mxu1 }
 0x33b   :  { %3461 = vst.msk [vmem:[%s6421_s3 + $0xd0] sm:$0xff] %vm3434_vm2, %v3421_v52  ;;  %v3424_v57 = vadd.f32 %v3423_v38, %v3272_v39  ;;  %v4269_v31 = vpop.f32.mrb[175].mxu1 }
 0x33d   :  { %3462 = vst.msk [vmem:[%s6421_s3 + $0xd8] sm:$0xff] %vm3434_vm2, %v3424_v57 }
 0x340   :  { %v3428_v28 = vpop.f32.mrb[176].mxu1 }
 0x341   :  { %v3429_v45 = vadd.f32 %v3428_v28, %v3277_v27  ;;  %v4272_v0 = vpop.f32.mrb[177].mxu1 }
 0x342   :  { %v3431_v43 = vpop.f32.mrb[178].mxu1 }
 0x343   :  { %3463 = vst.msk [vmem:[%s6421_s3 + $0xe0] sm:$0xff] %vm3434_vm2, %v3429_v45  ;;  %v4273_v5 = vpop.f32.mrb[179].mxu1 }

</bundles_post_ra>
